<compile_context>
chip_gen: v5e
topology: v5e:2x2
jax: 0.10.0
libtpu: 0.0.40
codegen_flags: <defaults>
</compile_context>

<pallas_src>
import functools

import jax
import jax.numpy as jnp
import numpy as np
from jax.experimental import pallas as pl
from jax.experimental.pallas import tpu as pltpu


def _round_up(x, m):
    return ((x + m - 1) // m) * m


# ----------------------------- Pallas kernel ------------------------------ #
def _conv_bn_relu_kernel(x_ref, w_ref, shift_ref, o_ref, acc_ref,
                         *, offsets, m_out):
    # x_ref:     (1, L, Cin)          bf16  flattened padded image (+ zero tail)
    # w_ref:     (KH*KW, Cin, Cpad)   bf16  per-tap weight, BN scale pre-folded
    # shift_ref: (1, Cpad)            f32   folded BN shift
    # o_ref:     (1, M_out, Cpad)     f32   conv output in the padded domain
    # acc_ref:   (M_out, Cpad)        f32   VMEM accumulator scratch
    acc_ref[...] = jnp.zeros_like(acc_ref)
    # Statically-unrolled loop over the KH*KW taps: shifted row-slab @ tap
    # weight, accumulated in f32 on the MXU.
    for tap, off in enumerate(offsets):
        x_tap = x_ref[0, pl.ds(off, m_out), :]              # (M_out, Cin) bf16
        acc_ref[...] += jnp.dot(x_tap, w_ref[tap],
                                preferred_element_type=jnp.float32)
    y = acc_ref[...] + shift_ref[...]                       # folded BN shift
    o_ref[0] = jnp.maximum(y, 0.0).astype(o_ref.dtype)      # ReLU


# ------------------------------ Host wrapper ------------------------------ #
def basic_conv_forward(x_nchw, weight, bn_gamma, bn_beta, bn_mean, bn_var,
                       *, stride=1, padding=0, dilation=1, eps=1e-5):
    """BasicConv forward: conv2d (no bias) -> BN (inference) -> ReLU."""
    N, Cin, H, W = x_nchw.shape
    Cout, Cin_w, KH, KW = weight.shape
    assert Cin == Cin_w, "groups != 1 not supported"

    KH_eff = (KH - 1) * dilation + 1
    KW_eff = (KW - 1) * dilation + 1
    H_pad = H + 2 * padding
    W_pad = W + 2 * padding
    OH = (H_pad - KH_eff) // stride + 1
    OW = (W_pad - KW_eff) // stride + 1

    # NCHW -> NHWC, zero-pad spatially, cast to bf16 (MXU-native), and flatten
    # H,W into one row axis.  This is the ONLY copy of the activations in HBM;
    # no KH*KW-inflated patch matrix is ever written.
    x = jnp.transpose(x_nchw, (0, 2, 3, 1)).astype(jnp.bfloat16)
    x = jnp.pad(x, ((0, 0), (padding, padding), (padding, padding), (0, 0)))
    x_flat = x.reshape(N, H_pad * W_pad, Cin)

    # Zero tail so every shifted row-slab read inside the kernel stays in
    # bounds; round sizes up to the sublane tile (8).
    max_off = (KH - 1) * dilation * W_pad + (KW - 1) * dilation
    M_out = _round_up(H_pad * W_pad, 8)
    L = _round_up(M_out + max_off, 8)
    x_flat = jnp.pad(x_flat, ((0, 0), (0, L - H_pad * W_pad), (0, 0)))

    # Fold BN (inference mode): scale goes into the weight, shift stays as a
    # per-channel add in the kernel epilogue.
    scale = bn_gamma / jnp.sqrt(bn_var + eps)                     # (Cout,)
    shift = bn_beta - bn_mean * scale                             # (Cout,)

    # Lane-dense output channels: pad Cout up to a multiple of 128.
    Cpad = _round_up(max(Cout, 128), 128)

    # (Cout, Cin, KH, KW) -> (KH*KW, Cin, Cpad), BN-scaled, bf16.
    w = jnp.transpose(weight, (2, 3, 1, 0)).reshape(KH * KW, Cin, Cout)
    w = w * scale[None, None, :]
    w = jnp.pad(w, ((0, 0), (0, 0), (0, Cpad - Cout))).astype(jnp.bfloat16)
    shift_p = jnp.pad(shift, (0, Cpad - Cout)).reshape(1, Cpad).astype(jnp.float32)

    # Static flat-index offset of each conv tap in the padded-image domain.
    offsets = tuple(kh * dilation * W_pad + kw * dilation
                    for kh in range(KH) for kw in range(KW))

    kernel = functools.partial(_conv_bn_relu_kernel,
                               offsets=offsets, m_out=M_out)

    o_full = pl.pallas_call(
        kernel,
        out_shape=jax.ShapeDtypeStruct((N, M_out, Cpad), jnp.float32),
        grid_spec=pltpu.PrefetchScalarGridSpec(
            num_scalar_prefetch=0,
            grid=(N,),
            in_specs=[
                pl.BlockSpec((1, L, Cin), lambda n: (n, 0, 0)),
                pl.BlockSpec((KH * KW, Cin, Cpad), lambda n: (0, 0, 0)),
                pl.BlockSpec((1, Cpad), lambda n: (0, 0)),
            ],
            out_specs=pl.BlockSpec((1, M_out, Cpad), lambda n: (n, 0, 0)),
            scratch_shapes=[pltpu.VMEM((M_out, Cpad), jnp.float32)],
        ),
        compiler_params=pltpu.CompilerParams(
            dimension_semantics=("parallel",)),
    )(x_flat, w, shift_p)

    # Extract the valid outputs: padded-domain rows -> (H_pad, W_pad) grid,
    # keep every `stride`-th valid position, drop the channel padding.
    o = o_full[:, :H_pad * W_pad, :].reshape(N, H_pad, W_pad, Cpad)
    o = o[:, 0:(OH - 1) * stride + 1:stride,
          0:(OW - 1) * stride + 1:stride, :Cout]
    return jnp.transpose(o, (0, 3, 1, 2))                     # NHWC -> NCHW


# Pure-JAX f32 reference for a correctness check.
def _reference(x_nchw, weight, bn_gamma, bn_beta, bn_mean, bn_var,
               *, stride=1, padding=0, eps=1e-5):
    y = jax.lax.conv_general_dilated(
        x_nchw, weight, window_strides=(stride, stride),
        padding=((padding, padding), (padding, padding)),
        dimension_numbers=("NCHW", "OIHW", "NCHW"))
    scale = (bn_gamma / jnp.sqrt(bn_var + eps)).reshape(1, -1, 1, 1)
    shift = (bn_beta - bn_mean * bn_gamma / jnp.sqrt(bn_var + eps)).reshape(1, -1, 1, 1)
    return jnp.maximum(y * scale + shift, 0.0)


if __name__ == "__main__":
    # BasicConv(in_planes=4, out_planes=8, kernel_size=3, stride=1, padding=1)
    N, Cin, H, W = 2, 4, 16, 16
    Cout, KH, KW = 8, 3, 3
    stride, padding = 1, 1

    key = jax.random.PRNGKey(0)
    kx, kw, kg, kb = jax.random.split(key, 4)
    x = jax.random.normal(kx, (N, Cin, H, W), dtype=jnp.float32)
    weight = jax.random.normal(kw, (Cout, Cin, KH, KW), dtype=jnp.float32) * 0.1
    bn_gamma = 1.0 + 0.1 * jax.random.normal(kg, (Cout,), dtype=jnp.float32)
    bn_beta = 0.1 * jax.random.normal(kb, (Cout,), dtype=jnp.float32)
    bn_mean = 0.05 * jnp.arange(Cout, dtype=jnp.float32)
    bn_var = 1.0 + 0.02 * jnp.arange(Cout, dtype=jnp.float32)

    fwd = functools.partial(basic_conv_forward, stride=stride, padding=padding)
    out = jax.jit(fwd)(x, weight, bn_gamma, bn_beta, bn_mean, bn_var)
    out = jax.block_until_ready(out)

    ref = _reference(x, weight, bn_gamma, bn_beta, bn_mean, bn_var,
                     stride=stride, padding=padding)
    # bf16 matmul operands vs f32 XLA reference -> widened tolerance.
    np.testing.assert_allclose(np.asarray(out), np.asarray(ref),
                               rtol=2e-2, atol=3e-2)
    assert out.shape == (N, Cout, H, W)
    print("KERNEL_OK")
</pallas_src>

<mosaic_0001>
module attributes {stable_mosaic.version = 11 : i64} {
  func.func @_conv_bn_relu_kernel(%arg0: i32, %arg1: memref<1x368x4xbf16, #tpu.memory_space<vmem>>, %arg2: memref<9x4x128xbf16, #tpu.memory_space<vmem>>, %arg3: memref<1x128xf32, #tpu.memory_space<vmem>>, %arg4: memref<1x328x128xf32, #tpu.memory_space<vmem>>, %arg5: memref<328x128xf32, #tpu.memory_space<vmem>>) attributes {dimension_semantics = [#tpu.dimension_semantics<parallel>], iteration_bounds = array<i64: 2>, scalar_prefetch = 0 : i64, scratch_operands = 1 : i64, tpu.core_type = #tpu.core_type<tc>, window_params = [{transform_indices = @transform_0, window_bounds = array<i64: 1, 368, 4>}, {pipeline_mode = #tpu.pipeline_mode<synchronous>, transform_indices = @transform_1, window_bounds = array<i64: 9, 4, 128>}, {pipeline_mode = #tpu.pipeline_mode<synchronous>, transform_indices = @transform_2, window_bounds = array<i64: 1, 128>}, {transform_indices = @transform_3, window_bounds = array<i64: 1, 328, 128>}]} {
    %cst = arith.constant 0.000000e+00 : f32
    %0 = vector.broadcast %cst : f32 to vector<328x128xf32>
    %c0 = arith.constant 0 : index
    %c0_0 = arith.constant 0 : index
    %1 = vector.load %arg5[%c0, %c0_0] : memref<328x128xf32, #tpu.memory_space<vmem>>, vector<328x128xf32>
    tpu.vector_store %arg5[%c0, %c0_0], %0 {strides = array<i32>} : memref<328x128xf32, #tpu.memory_space<vmem>>, vector<328x128xf32>,
    %c0_1 = arith.constant 0 : index
    %c0_2 = arith.constant 0 : index
    %c0_3 = arith.constant 0 : index
    %2 = vector.load %arg1[%c0_1, %c0_2, %c0_3] : memref<1x368x4xbf16, #tpu.memory_space<vmem>>, vector<1x328x4xbf16>
    %3 = vector.shape_cast %2 : vector<1x328x4xbf16> to vector<328x4xbf16>
    %c0_4 = arith.constant 0 : index
    %c0_5 = arith.constant 0 : index
    %4 = vector.load %arg5[%c0_4, %c0_5] : memref<328x128xf32, #tpu.memory_space<vmem>>, vector<328x128xf32>
    %c0_6 = arith.constant 0 : index
    %c0_7 = arith.constant 0 : index
    %c0_8 = arith.constant 0 : index
    %5 = vector.load %arg2[%c0_6, %c0_7, %c0_8] : memref<9x4x128xbf16, #tpu.memory_space<vmem>>, vector<1x4x128xbf16>
    %6 = vector.shape_cast %5 : vector<1x4x128xbf16> to vector<4x128xbf16>
    %cst_9 = arith.constant dense<0.000000e+00> : vector<328x128xf32>
    %7 = tpu.matmul %3, %6, %cst_9 {dimension_numbers = #tpu.dot_dimension_numbers<[1], [0], [0], [1], [0, 0, 1, 1], [], []>} : vector<328x4xbf16>, vector<4x128xbf16>, vector<328x128xf32> -> vector<328x128xf32>
    %8 = arith.addf %4, %7 : vector<328x128xf32>
    %c0_10 = arith.constant 0 : index
    %c0_11 = arith.constant 0 : index
    %9 = vector.load %arg5[%c0_10, %c0_11] : memref<328x128xf32, #tpu.memory_space<vmem>>, vector<328x128xf32>
    tpu.vector_store %arg5[%c0_10, %c0_11], %8 {strides = array<i32>} : memref<328x128xf32, #tpu.memory_space<vmem>>, vector<328x128xf32>,
    %c0_12 = arith.constant 0 : index
    %c1 = arith.constant 1 : index
    %c0_13 = arith.constant 0 : index
    %10 = vector.load %arg1[%c0_12, %c1, %c0_13] : memref<1x368x4xbf16, #tpu.memory_space<vmem>>, vector<1x328x4xbf16>
    %11 = vector.shape_cast %10 : vector<1x328x4xbf16> to vector<328x4xbf16>
    %c0_14 = arith.constant 0 : index
    %c0_15 = arith.constant 0 : index
    %12 = vector.load %arg5[%c0_14, %c0_15] : memref<328x128xf32, #tpu.memory_space<vmem>>, vector<328x128xf32>
    %c1_16 = arith.constant 1 : index
    %c0_17 = arith.constant 0 : index
    %c0_18 = arith.constant 0 : index
    %13 = vector.load %arg2[%c1_16, %c0_17, %c0_18] : memref<9x4x128xbf16, #tpu.memory_space<vmem>>, vector<1x4x128xbf16>
    %14 = vector.shape_cast %13 : vector<1x4x128xbf16> to vector<4x128xbf16>
    %cst_19 = arith.constant dense<0.000000e+00> : vector<328x128xf32>
    %15 = tpu.matmul %11, %14, %cst_19 {dimension_numbers = #tpu.dot_dimension_numbers<[1], [0], [0], [1], [0, 0, 1, 1], [], []>} : vector<328x4xbf16>, vector<4x128xbf16>, vector<328x128xf32> -> vector<328x128xf32>
    %16 = arith.addf %12, %15 : vector<328x128xf32>
    %c0_20 = arith.constant 0 : index
    %c0_21 = arith.constant 0 : index
    %17 = vector.load %arg5[%c0_20, %c0_21] : memref<328x128xf32, #tpu.memory_space<vmem>>, vector<328x128xf32>
    tpu.vector_store %arg5[%c0_20, %c0_21], %16 {strides = array<i32>} : memref<328x128xf32, #tpu.memory_space<vmem>>, vector<328x128xf32>,
    %c0_22 = arith.constant 0 : index
    %c2 = arith.constant 2 : index
    %c0_23 = arith.constant 0 : index
    %18 = vector.load %arg1[%c0_22, %c2, %c0_23] : memref<1x368x4xbf16, #tpu.memory_space<vmem>>, vector<1x328x4xbf16>
    %19 = vector.shape_cast %18 : vector<1x328x4xbf16> to vector<328x4xbf16>
    %c0_24 = arith.constant 0 : index
    %c0_25 = arith.constant 0 : index
    %20 = vector.load %arg5[%c0_24, %c0_25] : memref<328x128xf32, #tpu.memory_space<vmem>>, vector<328x128xf32>
    %c2_26 = arith.constant 2 : index
    %c0_27 = arith.constant 0 : index
    %c0_28 = arith.constant 0 : index
    %21 = vector.load %arg2[%c2_26, %c0_27, %c0_28] : memref<9x4x128xbf16, #tpu.memory_space<vmem>>, vector<1x4x128xbf16>
    %22 = vector.shape_cast %21 : vector<1x4x128xbf16> to vector<4x128xbf16>
    %cst_29 = arith.constant dense<0.000000e+00> : vector<328x128xf32>
    %23 = tpu.matmul %19, %22, %cst_29 {dimension_numbers = #tpu.dot_dimension_numbers<[1], [0], [0], [1], [0, 0, 1, 1], [], []>} : vector<328x4xbf16>, vector<4x128xbf16>, vector<328x128xf32> -> vector<328x128xf32>
    %24 = arith.addf %20, %23 : vector<328x128xf32>
    %c0_30 = arith.constant 0 : index
    %c0_31 = arith.constant 0 : index
    %25 = vector.load %arg5[%c0_30, %c0_31] : memref<328x128xf32, #tpu.memory_space<vmem>>, vector<328x128xf32>
    tpu.vector_store %arg5[%c0_30, %c0_31], %24 {strides = array<i32>} : memref<328x128xf32, #tpu.memory_space<vmem>>, vector<328x128xf32>,
    %c0_32 = arith.constant 0 : index
    %c18 = arith.constant 18 : index
    %c0_33 = arith.constant 0 : index
    %26 = vector.load %arg1[%c0_32, %c18, %c0_33] : memref<1x368x4xbf16, #tpu.memory_space<vmem>>, vector<1x328x4xbf16>
    %27 = vector.shape_cast %26 : vector<1x328x4xbf16> to vector<328x4xbf16>
    %c0_34 = arith.constant 0 : index
    %c0_35 = arith.constant 0 : index
    %28 = vector.load %arg5[%c0_34, %c0_35] : memref<328x128xf32, #tpu.memory_space<vmem>>, vector<328x128xf32>
    %c3 = arith.constant 3 : index
    %c0_36 = arith.constant 0 : index
    %c0_37 = arith.constant 0 : index
    %29 = vector.load %arg2[%c3, %c0_36, %c0_37] : memref<9x4x128xbf16, #tpu.memory_space<vmem>>, vector<1x4x128xbf16>
    %30 = vector.shape_cast %29 : vector<1x4x128xbf16> to vector<4x128xbf16>
    %cst_38 = arith.constant dense<0.000000e+00> : vector<328x128xf32>
    %31 = tpu.matmul %27, %30, %cst_38 {dimension_numbers = #tpu.dot_dimension_numbers<[1], [0], [0], [1], [0, 0, 1, 1], [], []>} : vector<328x4xbf16>, vector<4x128xbf16>, vector<328x128xf32> -> vector<328x128xf32>
    %32 = arith.addf %28, %31 : vector<328x128xf32>
    %c0_39 = arith.constant 0 : index
    %c0_40 = arith.constant 0 : index
    %33 = vector.load %arg5[%c0_39, %c0_40] : memref<328x128xf32, #tpu.memory_space<vmem>>, vector<328x128xf32>
    tpu.vector_store %arg5[%c0_39, %c0_40], %32 {strides = array<i32>} : memref<328x128xf32, #tpu.memory_space<vmem>>, vector<328x128xf32>,
    %c0_41 = arith.constant 0 : index
    %c19 = arith.constant 19 : index
    %c0_42 = arith.constant 0 : index
    %34 = vector.load %arg1[%c0_41, %c19, %c0_42] : memref<1x368x4xbf16, #tpu.memory_space<vmem>>, vector<1x328x4xbf16>
    %35 = vector.shape_cast %34 : vector<1x328x4xbf16> to vector<328x4xbf16>
    %c0_43 = arith.constant 0 : index
    %c0_44 = arith.constant 0 : index
    %36 = vector.load %arg5[%c0_43, %c0_44] : memref<328x128xf32, #tpu.memory_space<vmem>>, vector<328x128xf32>
    %c4 = arith.constant 4 : index
    %c0_45 = arith.constant 0 : index
    %c0_46 = arith.constant 0 : index
    %37 = vector.load %arg2[%c4, %c0_45, %c0_46] : memref<9x4x128xbf16, #tpu.memory_space<vmem>>, vector<1x4x128xbf16>
    %38 = vector.shape_cast %37 : vector<1x4x128xbf16> to vector<4x128xbf16>
    %cst_47 = arith.constant dense<0.000000e+00> : vector<328x128xf32>
    %39 = tpu.matmul %35, %38, %cst_47 {dimension_numbers = #tpu.dot_dimension_numbers<[1], [0], [0], [1], [0, 0, 1, 1], [], []>} : vector<328x4xbf16>, vector<4x128xbf16>, vector<328x128xf32> -> vector<328x128xf32>
    %40 = arith.addf %36, %39 : vector<328x128xf32>
    %c0_48 = arith.constant 0 : index
    %c0_49 = arith.constant 0 : index
    %41 = vector.load %arg5[%c0_48, %c0_49] : memref<328x128xf32, #tpu.memory_space<vmem>>, vector<328x128xf32>
    tpu.vector_store %arg5[%c0_48, %c0_49], %40 {strides = array<i32>} : memref<328x128xf32, #tpu.memory_space<vmem>>, vector<328x128xf32>,
    %c0_50 = arith.constant 0 : index
    %c20 = arith.constant 20 : index
    %c0_51 = arith.constant 0 : index
    %42 = vector.load %arg1[%c0_50, %c20, %c0_51] : memref<1x368x4xbf16, #tpu.memory_space<vmem>>, vector<1x328x4xbf16>
    %43 = vector.shape_cast %42 : vector<1x328x4xbf16> to vector<328x4xbf16>
    %c0_52 = arith.constant 0 : index
    %c0_53 = arith.constant 0 : index
    %44 = vector.load %arg5[%c0_52, %c0_53] : memref<328x128xf32, #tpu.memory_space<vmem>>, vector<328x128xf32>
    %c5 = arith.constant 5 : index
    %c0_54 = arith.constant 0 : index
    %c0_55 = arith.constant 0 : index
    %45 = vector.load %arg2[%c5, %c0_54, %c0_55] : memref<9x4x128xbf16, #tpu.memory_space<vmem>>, vector<1x4x128xbf16>
    %46 = vector.shape_cast %45 : vector<1x4x128xbf16> to vector<4x128xbf16>
    %cst_56 = arith.constant dense<0.000000e+00> : vector<328x128xf32>
    %47 = tpu.matmul %43, %46, %cst_56 {dimension_numbers = #tpu.dot_dimension_numbers<[1], [0], [0], [1], [0, 0, 1, 1], [], []>} : vector<328x4xbf16>, vector<4x128xbf16>, vector<328x128xf32> -> vector<328x128xf32>
    %48 = arith.addf %44, %47 : vector<328x128xf32>
    %c0_57 = arith.constant 0 : index
    %c0_58 = arith.constant 0 : index
    %49 = vector.load %arg5[%c0_57, %c0_58] : memref<328x128xf32, #tpu.memory_space<vmem>>, vector<328x128xf32>
    tpu.vector_store %arg5[%c0_57, %c0_58], %48 {strides = array<i32>} : memref<328x128xf32, #tpu.memory_space<vmem>>, vector<328x128xf32>,
    %c0_59 = arith.constant 0 : index
    %c36 = arith.constant 36 : index
    %c0_60 = arith.constant 0 : index
    %50 = vector.load %arg1[%c0_59, %c36, %c0_60] : memref<1x368x4xbf16, #tpu.memory_space<vmem>>, vector<1x328x4xbf16>
    %51 = vector.shape_cast %50 : vector<1x328x4xbf16> to vector<328x4xbf16>
    %c0_61 = arith.constant 0 : index
    %c0_62 = arith.constant 0 : index
    %52 = vector.load %arg5[%c0_61, %c0_62] : memref<328x128xf32, #tpu.memory_space<vmem>>, vector<328x128xf32>
    %c6 = arith.constant 6 : index
    %c0_63 = arith.constant 0 : index
    %c0_64 = arith.constant 0 : index
    %53 = vector.load %arg2[%c6, %c0_63, %c0_64] : memref<9x4x128xbf16, #tpu.memory_space<vmem>>, vector<1x4x128xbf16>
    %54 = vector.shape_cast %53 : vector<1x4x128xbf16> to vector<4x128xbf16>
    %cst_65 = arith.constant dense<0.000000e+00> : vector<328x128xf32>
    %55 = tpu.matmul %51, %54, %cst_65 {dimension_numbers = #tpu.dot_dimension_numbers<[1], [0], [0], [1], [0, 0, 1, 1], [], []>} : vector<328x4xbf16>, vector<4x128xbf16>, vector<328x128xf32> -> vector<328x128xf32>
    %56 = arith.addf %52, %55 : vector<328x128xf32>
    %c0_66 = arith.constant 0 : index
    %c0_67 = arith.constant 0 : index
    %57 = vector.load %arg5[%c0_66, %c0_67] : memref<328x128xf32, #tpu.memory_space<vmem>>, vector<328x128xf32>
    tpu.vector_store %arg5[%c0_66, %c0_67], %56 {strides = array<i32>} : memref<328x128xf32, #tpu.memory_space<vmem>>, vector<328x128xf32>,
    %c0_68 = arith.constant 0 : index
    %c37 = arith.constant 37 : index
    %c0_69 = arith.constant 0 : index
    %58 = vector.load %arg1[%c0_68, %c37, %c0_69] : memref<1x368x4xbf16, #tpu.memory_space<vmem>>, vector<1x328x4xbf16>
    %59 = vector.shape_cast %58 : vector<1x328x4xbf16> to vector<328x4xbf16>
    %c0_70 = arith.constant 0 : index
    %c0_71 = arith.constant 0 : index
    %60 = vector.load %arg5[%c0_70, %c0_71] : memref<328x128xf32, #tpu.memory_space<vmem>>, vector<328x128xf32>
    %c7 = arith.constant 7 : index
    %c0_72 = arith.constant 0 : index
    %c0_73 = arith.constant 0 : index
    %61 = vector.load %arg2[%c7, %c0_72, %c0_73] : memref<9x4x128xbf16, #tpu.memory_space<vmem>>, vector<1x4x128xbf16>
    %62 = vector.shape_cast %61 : vector<1x4x128xbf16> to vector<4x128xbf16>
    %cst_74 = arith.constant dense<0.000000e+00> : vector<328x128xf32>
    %63 = tpu.matmul %59, %62, %cst_74 {dimension_numbers = #tpu.dot_dimension_numbers<[1], [0], [0], [1], [0, 0, 1, 1], [], []>} : vector<328x4xbf16>, vector<4x128xbf16>, vector<328x128xf32> -> vector<328x128xf32>
    %64 = arith.addf %60, %63 : vector<328x128xf32>
    %c0_75 = arith.constant 0 : index
    %c0_76 = arith.constant 0 : index
    %65 = vector.load %arg5[%c0_75, %c0_76] : memref<328x128xf32, #tpu.memory_space<vmem>>, vector<328x128xf32>
    tpu.vector_store %arg5[%c0_75, %c0_76], %64 {strides = array<i32>} : memref<328x128xf32, #tpu.memory_space<vmem>>, vector<328x128xf32>,
    %c0_77 = arith.constant 0 : index
    %c38 = arith.constant 38 : index
    %c0_78 = arith.constant 0 : index
    %66 = vector.load %arg1[%c0_77, %c38, %c0_78] : memref<1x368x4xbf16, #tpu.memory_space<vmem>>, vector<1x328x4xbf16>
    %67 = vector.shape_cast %66 : vector<1x328x4xbf16> to vector<328x4xbf16>
    %c0_79 = arith.constant 0 : index
    %c0_80 = arith.constant 0 : index
    %68 = vector.load %arg5[%c0_79, %c0_80] : memref<328x128xf32, #tpu.memory_space<vmem>>, vector<328x128xf32>
    %c8 = arith.constant 8 : index
    %c0_81 = arith.constant 0 : index
    %c0_82 = arith.constant 0 : index
    %69 = vector.load %arg2[%c8, %c0_81, %c0_82] : memref<9x4x128xbf16, #tpu.memory_space<vmem>>, vector<1x4x128xbf16>
    %70 = vector.shape_cast %69 : vector<1x4x128xbf16> to vector<4x128xbf16>
    %cst_83 = arith.constant dense<0.000000e+00> : vector<328x128xf32>
    %71 = tpu.matmul %67, %70, %cst_83 {dimension_numbers = #tpu.dot_dimension_numbers<[1], [0], [0], [1], [0, 0, 1, 1], [], []>} : vector<328x4xbf16>, vector<4x128xbf16>, vector<328x128xf32> -> vector<328x128xf32>
    %72 = arith.addf %68, %71 : vector<328x128xf32>
    %c0_84 = arith.constant 0 : index
    %c0_85 = arith.constant 0 : index
    %73 = vector.load %arg5[%c0_84, %c0_85] : memref<328x128xf32, #tpu.memory_space<vmem>>, vector<328x128xf32>
    tpu.vector_store %arg5[%c0_84, %c0_85], %72 {strides = array<i32>} : memref<328x128xf32, #tpu.memory_space<vmem>>, vector<328x128xf32>,
    %c0_86 = arith.constant 0 : index
    %c0_87 = arith.constant 0 : index
    %74 = vector.load %arg5[%c0_86, %c0_87] : memref<328x128xf32, #tpu.memory_space<vmem>>, vector<328x128xf32>
    %c0_88 = arith.constant 0 : index
    %c0_89 = arith.constant 0 : index
    %75 = vector.load %arg3[%c0_88, %c0_89] : memref<1x128xf32, #tpu.memory_space<vmem>>, vector<1x128xf32>
    %76 = vector.broadcast %75 : vector<1x128xf32> to vector<328x128xf32>
    %77 = arith.addf %74, %76 : vector<328x128xf32>
    %cst_90 = arith.constant 0.000000e+00 : f32
    %78 = vector.broadcast %cst_90 : f32 to vector<328x128xf32>
    %79 = arith.maximumf %77, %78 : vector<328x128xf32>
    %c0_91 = arith.constant 0 : index
    %c0_92 = arith.constant 0 : index
    %c0_93 = arith.constant 0 : index
    %80 = vector.load %arg4[%c0_91, %c0_92, %c0_93] : memref<1x328x128xf32, #tpu.memory_space<vmem>>, vector<1x328x128xf32>
    %81 = vector.shape_cast %80 : vector<1x328x128xf32> to vector<328x128xf32>
    %82 = vector.shape_cast %79 : vector<328x128xf32> to vector<1x328x128xf32>
    tpu.vector_store %arg4[%c0_91, %c0_92, %c0_93], %82 {strides = array<i32>} : memref<1x328x128xf32, #tpu.memory_space<vmem>>, vector<1x328x128xf32>,
    return
  }
  func.func @transform_0(%arg0: i32) -> (i32, i32, i32) {
    %c0_i32 = arith.constant 0 : i32
    %c0_i32_0 = arith.constant 0 : i32
    %c0_i32_1 = arith.constant 0 : i32
    return %arg0, %c0_i32, %c0_i32_0 : i32, i32, i32
  }
  func.func @transform_1(%arg0: i32) -> (i32, i32, i32) {
    %c0_i32 = arith.constant 0 : i32
    %c0_i32_0 = arith.constant 0 : i32
    %c0_i32_1 = arith.constant 0 : i32
    %c0_i32_2 = arith.constant 0 : i32
    return %c0_i32, %c0_i32_0, %c0_i32_1 : i32, i32, i32
  }
  func.func @transform_2(%arg0: i32) -> (i32, i32) {
    %c0_i32 = arith.constant 0 : i32
    %c0_i32_0 = arith.constant 0 : i32
    %c0_i32_1 = arith.constant 0 : i32
    return %c0_i32, %c0_i32_0 : i32, i32
  }
  func.func @transform_3(%arg0: i32) -> (i32, i32, i32) {
    %c0_i32 = arith.constant 0 : i32
    %c0_i32_0 = arith.constant 0 : i32
    %c0_i32_1 = arith.constant 0 : i32
    return %arg0, %c0_i32, %c0_i32_0 : i32, i32, i32
  }
}

</mosaic_0001>

<bundles_post_ra>
// kernel: basic_conv_forward.1
= control target key start
LH: loop header
LB: loop body
LE: loop exit
PB: predicated region body
PF: predicated region fallthrough
CT: control target
= control target key end

     0   :  { %s6436_s12 = smov 0   ;;  %s7692_s0 = inlined_call_operand.vmem [shape: bf16[2,368,4], index: 0, kind: input, shape index: {}]   ;;  %s7693_s1 = inlined_call_operand.vmem [shape: bf16[9,4,128], index: 1, kind: input, shape index: {}]   ;;  %s7694_s2 = inlined_call_operand.vmem [shape: f32[1,128], index: 2, kind: input, shape index: {}]   ;;  %s7695_s3 = inlined_call_operand.vmem [shape: f32[2,328,128], index: 3, kind: output, shape index: {}]  }
   0x1 LB: > { %s5247_s13 = sadd.s32 4294967295, %s6414_s12   ;;  %p5251_p0 = scmp.ge.s32.totalorder %s6414_s12, 1  ;;  %s6414_s12 = sphi %s6436_s12, %s13_s12  }
   0x2   : > { %p137_p1 = scmp.lt.s32.totalorder %s6414_s12, 3 }
   0x4   : > { %p138_p2 = pnand %p5251_p0, %p137_p1 }
   0x6   : > { %141 = sbr.rel (%p138_p2) target bundleno = 914 (0x392), region = 32 }
   0xb   : > { %v295_v0 = vld [vmem:[%s7693_s1] sm:$0x3]  ;;  %vm463_vm0 = vcmask 1041408   ;;  %p161_p3 = scmp.lt.s32.totalorder %s5247_s13, 1  ;;  %v5461_v2 = vld [vmem:[%s7693_s1 + $0x4] sm:$0x3] }
   0xc   : > { %v465_v1 = vsel %vm463_vm0, %v295_v0, 0  ;;  %v5355_v3 = vld [vmem:[%s7693_s1 + $0x2] sm:$0x3]  ;;  %v1577_v4 = vsel %vm463_vm0, %v5461_v2, 0  ;;  %v5673_v6 = vld [vmem:[%s7693_s1 + $0x8] sm:$0x3] }
   0xd   : > { %6393 = vmatpush.bf16.msra.mxu1 %v465_v1  ;;  %6394 = vmatpush.bf16.msra.mxu2 %v465_v1  ;;  %s7725_s13 = smov (!%p161_p3, %s5247_s13), 1  ;;  %v1084_v5 = vsel %vm463_vm0, %v5355_v3, 0  ;;  %v2709_v7 = vsel %vm463_vm0, %v5673_v6, 0  ;;  %vm399_vm1 = vcmask 31744   ;;  %v5567_v15 = vld [vmem:[%s7693_s1 + $0x6] sm:$0x3] }
   0xe   : > { %474 = vmatpush.bf16.msra.mxu0 %v465_v1  ;;  %s6396_s22 = smul.u32 184, %s7725_s13  ;;  %6395 = vmatpush.bf16.msra.mxu3 %v465_v1  ;;  %v2069_v17 = vsel %vm463_vm0, %v5567_v15, 0  ;;  %vm1471_vm2 = vcmask 1046528   ;;  %v5885_v37 = vld [vmem:[%s7693_s1 + $0xc] sm:$0x3]  ;;  %vm3096_vm6 = vcmask 1045504  }
   0xf   : > { %v3694_v38 = vsel %vm463_vm0, %v5885_v37, 0  ;;  %v5991_v39 = vld [vmem:[%s7693_s1 + $0xe] sm:$0x3]  ;;  %v5779_v40 = vld [vmem:[%s7693_s1 + $0xa] sm:$0x3]  ;;  %vm4721_vm7 = vcmask 1044480  }
  0x10   : > { %s6466_s25 = scalar_lea.vmem %s7692_s0, %s6396_s22  ;;  %v4334_v42 = vsel %vm463_vm0, %v5991_v39, 0  ;;  %v3202_v43 = vsel %vm463_vm0, %v5779_v40, 0  ;;  %v6097_v44 = vld [vmem:[%s7693_s1 + $0x10] sm:$0x3]  ;;  %vm852_vm3 = vsmask.f32 7424 }
  0x11   : > { %1586 = vmatpush.bf16.msrb.mxu2 %v1577_v4  ;;  %1093 = vmatpush.bf16.msrb.mxu1 %v1084_v5  ;;  %v6211_v8 = vld [vmem:[%s6466_s25 + $0x30] sm:$0xff]  ;;  %v6217_v9 = vld [vmem:[%s6466_s25 + $0x60] sm:$0xff]  ;;  %v6212_v12 = vld [vmem:[%s6466_s25 + $0x38] sm:$0xff]  ;;  %v4827_v45 = vsel %vm463_vm0, %v6097_v44, 0  ;;  %vm2456_vm4 = vsmask.f32 6400 }
  0x12   : > { %2718 = vmatpush.bf16.msrb.mxu0 %v2709_v7  ;;  %v6205_v10 = vld [vmem:[%s6466_s25] sm:$0xff]  ;;  %5340 = vmatmul.msk.bf16.vlgmr.msra.gmra.mxu1 %vm399_vm1, %v6211_v8  ;;  %v6223_v11 = vld [vmem:[%s6466_s25 + $0x90] sm:$0xff]  ;;  %v6218_v13 = vld [vmem:[%s6466_s25 + $0x68] sm:$0xff]  ;;  %vm4081_vm5 = vsmask.f32 5376  ;;  %s6397_s11 = smul.u32 328, %s7725_s13 }
  0x13   : > { %5346 = vmatmul.msk.bf16.vlgmr.msra.gmra.mxu2 %vm399_vm1, %v6217_v9  ;;  %5334 = vmatmul.msk.bf16.vlgmr.msra.gmra.mxu0 %vm399_vm1, %v6205_v10  ;;  %v6206_v14 = vld [vmem:[%s6466_s25 + $0x8] sm:$0xff]  ;;  %v6224_v16 = vld [vmem:[%s6466_s25 + $0x98] sm:$0xff]  ;;  %v6213_v18 = vld [vmem:[%s6466_s25 + $0x40] sm:$0xff] }
  0x14   : > { %5352 = vmatmul.msk.bf16.vlgmr.msra.gmra.mxu3 %vm399_vm1, %v6223_v11  ;;  %v6219_v19 = vld [vmem:[%s6466_s25 + $0x70] sm:$0xff]  ;;  %v253_v21 = vld [vmem:[%s6466_s25 + $0xa0] sm:$0xf]  ;;  %v6214_v24 = vld [vmem:[%s6466_s25 + $0x48] sm:$0xff]  ;;  %s7303_s13 = scalar_lea.vmem %s7695_s3, %s6397_s11 }
  0x15   : > { %2078 = vmatpush.bf16.msrb.mxu3 %v2069_v17  ;;  %v6207_v20 = vld [vmem:[%s6466_s25 + $0x10] sm:$0xff]  ;;  %v377_v22 = vunpack.c.l.b16 %v253_v21  ;;  %v6220_v25 = vld [vmem:[%s6466_s25 + $0x78] sm:$0xff]  ;;  %v5570_v27 = vld [vmem:[%s6466_s25 + $0x8] sm:$0xe]  ;;  %3703 = vmatpush.bf16.msra.mxu2 %v3694_v38 }
  0x16   : > { %v6208_v26 = vld [vmem:[%s6466_s25 + $0x18] sm:$0xff]  ;;  %v6267_v28 = vld [vmem:[%s6466_s25 + $0x8] sm:$0xf0]  ;;  %v6268_v29 = vld [vmem:[%s6466_s25 + $0x10] sm:$0xff]  ;;  %3211 = vmatpush.bf16.msra.mxu1 %v3202_v43  ;;  %4836 = vmatpush.bf16.msra.mxu0 %v4827_v45 }
  0x17   : > { %v398_v23 = vpack.c.b16 %v377_v22, %v377_v22  ;;  %v5571_v30 = vor.u32 %v6267_v28, %v5570_v27  ;;  %v1965_v31 = vrot.slane %v6268_v29, 1  ;;  %v6215_v34 = vld [vmem:[%s6466_s25 + $0x50] sm:$0xff]  ;;  %v6221_v35 = vld [vmem:[%s6466_s25 + $0x80] sm:$0xff]  ;;  %v6269_v41 = vld [vmem:[%s6466_s25 + $0x18] sm:$0xff] }
  0x18   : > { %v6209_v36 = vld [vmem:[%s6466_s25 + $0x20] sm:$0xff]  ;;  %v1967_v46 = vrot.slane %v6269_v41, 1  ;;  %v5676_v48 = vld [vmem:[%s6466_s25 + $0x8] sm:$0xe]  ;;  %v6288_v49 = vld [vmem:[%s6466_s25 + $0x8] sm:$0xf0] }
  0x19   : > { %v1964_v32 = vrot.slane %v5571_v30, 1  ;;  %4343 = vmatpush.bf16.msra.mxu3 %v4334_v42  ;;  %v6216_v50 = vld [vmem:[%s6466_s25 + $0x58] sm:$0xff]  ;;  %v6222_v51 = vld [vmem:[%s6466_s25 + $0x88] sm:$0xff]  ;;  %v6225_v53 = vld [vmem:[%s6466_s25] sm:$0xff]  ;;  %v5677_v55 = vor.u32 %v6288_v49, %v5676_v48 }
  0x1a   : > { %v1968_v47 = vsel %vm1471_vm2, %v1965_v31, %v1967_v46  ;;  %v6210_v52 = vld [vmem:[%s6466_s25 + $0x28] sm:$0xff]  ;;  %v6289_v54 = vld [vmem:[%s6466_s25 + $0x10] sm:$0xff]  ;;  %v856_v57 = vshll.u32 %v6225_v53, 16  ;;  %v5464_v58 = vld [vmem:[%s6466_s25] sm:$0xe]  ;;  %v854_v2 = vshrl.u32 %v6225_v53, 16 }
  0x1b   : > { %v1966_v33 = vsel %vm1471_vm2, %v1964_v32, %v1965_v31  ;;  %v6226_v56 = vld [vmem:[%s6466_s25 + $0x8] sm:$0xff]  ;;  %v6270_v59 = vld [vmem:[%s6466_s25 + $0x20] sm:$0xff]  ;;  %v2458_v61 = vshrl.u32 %v5677_v55, 16  ;;  %v2461_v62 = vshll.u32 %v5677_v55, 16  ;;  %v2466_v63 = vshrl.u32 %v6289_v54, 16  ;;  %v6290_v21 = vld [vmem:[%s6466_s25 + $0x18] sm:$0xff] }
  0x1c   : > { %v6246_v60 = vld [vmem:[%s6466_s25] sm:$0xf0]  ;;  %v2469_v0 = vshll.u32 %v6289_v54, 16  ;;  %v1969_v1 = vrot.slane %v6270_v59, 1  ;;  %v858_v3 = vrot.slane %v856_v57, 1  ;;  %v861_v4 = vshll.u32 %v6226_v56, 16 }
  0x1d   : > { %v6247_v5 = vld [vmem:[%s6466_s25 + $0x8] sm:$0xff]  ;;  %v5465_v6 = vor.u32 %v6246_v60, %v5464_v58  ;;  %v2460_v8 = vrot.slane %v2458_v61, 1  ;;  %v2463_v9 = vrot.slane %v2461_v62, 2  ;;  %v2468_v10 = vrot.slane %v2466_v63, 1  ;;  %v6227_v22 = vld [vmem:[%s6466_s25 + $0x10] sm:$0xff]  ;;  %v6291_v40 = vld [vmem:[%s6466_s25 + $0x20] sm:$0xff] }
  0x1e   : > { %v1970_v7 = vsel %vm1471_vm2, %v1967_v46, %v1969_v1  ;;  %v2471_v11 = vrot.slane %v2469_v0, 2  ;;  %v1473_v15 = vrot.slane %v6247_v5, 1  ;;  %v6248_v27 = vld [vmem:[%s6466_s25 + $0x10] sm:$0xff]  ;;  %v6271_v28 = vld [vmem:[%s6466_s25 + $0x28] sm:$0xff]  ;;  %v6228_v41 = vld [vmem:[%s6466_s25 + $0x18] sm:$0xff]  ;;  %v2484_v42 = vshrl.u32 %v6291_v40, 16 }
  0x1f   : > { %v1971_v31 = vrot.slane %v6271_v28, 1  ;;  %v2487_v43 = vshll.u32 %v6291_v40, 16  ;;  %v873_v44 = vshrl.u32 %v6227_v22, 16  ;;  %v877_v45 = vshll.u32 %v6228_v41, 16  ;;  %v6249_v46 = vld [vmem:[%s6466_s25 + $0x18] sm:$0xff]  ;;  %v6292_v61 = vld [vmem:[%s6466_s25 + $0x28] sm:$0xff] }
  0x20   : > { %v2472_v17 = vor.u32 %v2471_v11, %v2468_v10  ;;  %v2486_v48 = vrot.slane %v2484_v42, 1  ;;  %v1477_v53 = vrot.slane %v6249_v46, 1  ;;  %v6229_v62 = vld [vmem:[%s6466_s25 + $0x20] sm:$0xff]  ;;  %v2493_v63 = vshrl.u32 %v6292_v61, 16 }
  0x21   : > { %v2489_v49 = vrot.slane %v2487_v43, 2  ;;  %v2496_v0 = vshll.u32 %v6292_v61, 16  ;;  %v6250_v5 = vld [vmem:[%s6466_s25 + $0x20] sm:$0xff] }
  0x22   : > { %5341 = vmatmul.msk.bf16.gmra.mxu1 %vm399_vm1, %v6212_v12  ;;  %v859_v12 = vor.u32 %v858_v3, %v854_v2  ;;  %v881_v3 = vshrl.u32 %v6228_v41, 16 }
  0x23   : > { %5347 = vmatmul.msk.bf16.gmra.mxu2 %vm399_vm1, %v6218_v13  ;;  %5335 = vmatmul.msk.bf16.gmra.mxu0 %vm399_vm1, %v6206_v14  ;;  %v863_v13 = vrot.slane %v861_v4, 1  ;;  %v1472_v14 = vrot.slane %v5465_v6, 1  ;;  %v2490_v55 = vor.u32 %v2489_v49, %v2486_v48  ;;  %v885_v4 = vshll.u32 %v6229_v62, 16  ;;  %v6273_v6 = vld [vmem:[%s6466_s25 + $0x38] sm:$0xff] }
  0x24   : > { %5353 = vmatmul.msk.bf16.gmra.mxu3 %vm399_vm1, %v6224_v16  ;;  %v2464_v16 = vor.u32 %v2463_v9, %v2460_v8  ;;  %v2495_v8 = vrot.slane %v2493_v63, 1  ;;  %v2498_v9 = vrot.slane %v2496_v0, 2  ;;  %v1975_v10 = vrot.slane %v6273_v6, 1 }
  0x32   : > { %5342 = vmatmul.msk.bf16.gmra.mxu1 %vm399_vm1, %v6213_v18  ;;  %v864_v18 = vsel %vm852_vm3, %v859_v12, %v863_v13  ;;  %v887_v12 = vrot.slane %v885_v4, 1 }
  0x33   : > { %5348 = vmatmul.msk.bf16.gmra.mxu2 %vm399_vm1, %v6219_v19  ;;  %5336 = vmatmul.msk.bf16.gmra.mxu0 %vm399_vm1, %v6207_v20  ;;  %v1474_v19 = vsel %vm1471_vm2, %v1472_v14, %v1473_v15  ;;  %v2473_v20 = vsel %vm2456_vm4, %v2464_v16, %v2472_v17 }
  0x34   : > { %5354 = vmatmul.msk.bf16.gmra.mxu3 %vm399_vm1, %v398_v23  ;;  %v2475_v23 = vshrl.u32 %v6290_v21, 16 }
  0x36   : > { %v2477_v29 = vrot.slane %v2475_v23, 1  ;;  %v6293_v23 = vld [vmem:[%s6466_s25 + $0x30] sm:$0xff] }
  0x42   : > { %5343 = vmatmul.msk.bf16.gmra.mxu1 %vm399_vm1, %v6214_v24  ;;  %v2478_v24 = vshll.u32 %v6290_v21, 16 }
  0x43   : > { %5349 = vmatmul.msk.bf16.gmra.mxu2 %vm399_vm1, %v6220_v25  ;;  %5337 = vmatmul.msk.bf16.gmra.mxu0 %vm399_vm1, %v6208_v26  ;;  %v865_v25 = vshrl.u32 %v6226_v56, 16  ;;  %v869_v26 = vshll.u32 %v6227_v22, 16 }
  0x44   : > { %5652 = vmatmul.msk.bf16.vlgmr.msrb.gmra.mxu3 %vm399_vm1, %v1966_v33  ;;  %v2480_v30 = vrot.slane %v2478_v24, 2  ;;  %v6230_v24 = vld [vmem:[%s6466_s25 + $0x28] sm:$0xff] }
  0x45   : > { %v867_v32 = vor.u32 %v865_v25, %v863_v13  ;;  %v871_v33 = vrot.slane %v869_v26, 1  ;;  %v1479_v13 = vrot.slane %v6250_v5, 1  ;;  %v2502_v25 = vshrl.u32 %v6293_v23, 16 }
  0x46   : > { %v2505_v26 = vshll.u32 %v6293_v23, 16  ;;  %v6232_v23 = vld [vmem:[%s6466_s25 + $0x38] sm:$0xff] }
  0x47   : > { %v872_v37 = vsel %vm852_vm3, %v867_v32, %v871_v33 }
  0x52   : > { %5344 = vmatmul.msk.bf16.gmra.mxu1 %vm399_vm1, %v6215_v34  ;;  %v1475_v34 = vrot.slane %v6248_v27, 1 }
  0x53   : > { %5350 = vmatmul.msk.bf16.gmra.mxu2 %vm399_vm1, %v6221_v35  ;;  %5338 = vmatmul.msk.bf16.gmra.mxu0 %vm399_vm1, %v6209_v36  ;;  %v1972_v35 = vsel %vm1471_vm2, %v1969_v1, %v1971_v31  ;;  %v2481_v36 = vor.u32 %v2480_v30, %v2477_v29  ;;  %v889_v29 = vshrl.u32 %v6229_v62, 16  ;;  %v893_v30 = vshll.u32 %v6230_v24, 16  ;;  %v6275_v62 = vld [vmem:[%s6466_s25 + $0x48] sm:$0xff] }
  0x54   : > { %5653 = vmatmul.msk.bf16.gmra.mxu3 %vm399_vm1, %v1968_v47  ;;  %v1476_v38 = vsel %vm1471_vm2, %v1473_v15, %v1475_v34  ;;  %v6272_v47 = vld [vmem:[%s6466_s25 + $0x30] sm:$0xff]  ;;  %v1478_v58 = vsel %vm1471_vm2, %v1475_v34, %v1477_v53  ;;  %v2499_v15 = vor.u32 %v2498_v9, %v2495_v8  ;;  %v1979_v4 = vrot.slane %v6275_v62, 1  ;;  %v6296_v62 = vld [vmem:[%s6466_s25 + $0x48] sm:$0xff] }
  0x55   : > { %v2482_v39 = vsel %vm2456_vm4, %v2472_v17, %v2481_v36  ;;  %v2491_v60 = vsel %vm2456_vm4, %v2481_v36, %v2490_v55  ;;  %v2507_v36 = vrot.slane %v2505_v26, 2 }
  0x56   : > { %v2500_v22 = vsel %vm2456_vm4, %v2490_v55, %v2499_v15 }
  0x62   : > { %5345 = vmatmul.msk.bf16.gmra.mxu1 %vm399_vm1, %v6216_v50  ;;  %v1973_v50 = vrot.slane %v6272_v47, 1 }
  0x63   : > { %5351 = vmatmul.msk.bf16.gmra.mxu2 %vm399_vm1, %v6222_v51  ;;  %5339 = vmatmul.msk.bf16.gmra.mxu0 %vm399_vm1, %v6210_v52  ;;  %v875_v51 = vor.u32 %v873_v44, %v871_v33  ;;  %v879_v52 = vrot.slane %v877_v45, 1  ;;  %v6274_v33 = vld [vmem:[%s6466_s25 + $0x40] sm:$0xff] }
  0x64   : > { %5654 = vmatmul.msk.bf16.gmra.mxu3 %vm399_vm1, %v1970_v7  ;;  %v1974_v54 = vsel %vm1471_vm2, %v1971_v31, %v1973_v50  ;;  %v1976_v14 = vsel %vm1471_vm2, %v1973_v50, %v1975_v10  ;;  %v6251_v31 = vld [vmem:[%s6466_s25 + $0x28] sm:$0xff]  ;;  %v6294_v50 = vld [vmem:[%s6466_s25 + $0x38] sm:$0xff] }
  0x65   : > { %v880_v57 = vsel %vm852_vm3, %v875_v51, %v879_v52  ;;  %v883_v11 = vor.u32 %v881_v3, %v879_v52  ;;  %v1481_v40 = vrot.slane %v6251_v31, 1  ;;  %v6231_v51 = vld [vmem:[%s6466_s25 + $0x30] sm:$0xff]  ;;  %v2511_v52 = vshrl.u32 %v6294_v50, 16 }
  0x66   : > { %v909_v31 = vshll.u32 %v6232_v23, 16 }
  0x67   : > { %v1482_v46 = vsel %vm1471_vm2, %v1479_v13, %v1481_v40  ;;  %v2513_v0 = vrot.slane %v2511_v52, 1 }
  0x72   : > { %5440 = vmatmul.msk.bf16.vlgmr.msrb.gmra.mxu1 %vm399_vm1, %v864_v18  ;;  %v888_v18 = vsel %vm852_vm3, %v883_v11, %v887_v12 }
  0x73   : > { %5546 = vmatmul.msk.bf16.vlgmr.msrb.gmra.mxu2 %vm399_vm1, %v1474_v19  ;;  %5758 = vmatmul.msk.bf16.vlgmr.msrb.gmra.mxu0 %vm399_vm1, %v2473_v20  ;;  %v1480_v19 = vsel %vm1471_vm2, %v1477_v53, %v1479_v13  ;;  %v2514_v53 = vshll.u32 %v6294_v50, 16 }
  0x74   : > { %5655 = vmatmul.msk.bf16.gmra.mxu3 %vm399_vm1, %v1972_v35  ;;  %v2504_v35 = vrot.slane %v2502_v25, 1 }
  0x75   : > { %v2516_v3 = vrot.slane %v2514_v53, 2 }
  0x76   : > { %v2508_v42 = vor.u32 %v2507_v36, %v2504_v35  ;;  %v6276_v36 = vld [vmem:[%s6466_s25 + $0x50] sm:$0xff] }
  0x78   : > { %v2509_v49 = vsel %vm2456_vm4, %v2499_v15, %v2508_v42 }
  0x82   : > { %5441 = vmatmul.msk.bf16.gmra.mxu1 %vm399_vm1, %v872_v37  ;;  %v1977_v37 = vrot.slane %v6274_v33, 1  ;;  %v6253_v33 = vld [vmem:[%s6466_s25 + $0x38] sm:$0xff] }
  0x83   : > { %5547 = vmatmul.msk.bf16.gmra.mxu2 %vm399_vm1, %v1476_v38  ;;  %5759 = vmatmul.msk.bf16.gmra.mxu0 %vm399_vm1, %v2482_v39  ;;  %v891_v38 = vor.u32 %v889_v29, %v887_v12  ;;  %v895_v39 = vrot.slane %v893_v30, 1  ;;  %v905_v30 = vshrl.u32 %v6231_v51, 16 }
  0x84   : > { %5656 = vmatmul.msk.bf16.gmra.mxu3 %vm399_vm1, %v1974_v54  ;;  %v1978_v41 = vsel %vm1471_vm2, %v1975_v10, %v1977_v37  ;;  %v1980_v9 = vsel %vm1471_vm2, %v1977_v37, %v1979_v4  ;;  %v2517_v10 = vor.u32 %v2516_v3, %v2513_v0  ;;  %v6233_v0 = vld [vmem:[%s6466_s25 + $0x40] sm:$0xff]  ;;  %v2529_v3 = vshrl.u32 %v6296_v62, 16 }
  0x85   : > { %v896_v45 = vsel %vm852_vm3, %v891_v38, %v895_v39 }
  0x8f   : > { %v6573_v56 = vpop.f32.mrf.mxu1 }
  0x90   : > { %v6577_v59 = vpop.f32.mrf.mxu0 }
  0x92   : > { %5442 = vmatmul.msk.bf16.gmra.mxu1 %vm399_vm1, %v880_v57  ;;  %v897_v57 = vshrl.u32 %v6230_v24, 16 }
  0x93   : > { %5548 = vmatmul.msk.bf16.gmra.mxu2 %vm399_vm1, %v1478_v58  ;;  %5760 = vmatmul.msk.bf16.gmra.mxu0 %vm399_vm1, %v2491_v60  ;;  %v901_v58 = vshll.u32 %v6231_v51, 16  ;;  %v6252_v60 = vld [vmem:[%s6466_s25 + $0x30] sm:$0xff] }
  0x94   : > { %5657 = vmatmul.msk.bf16.gmra.mxu3 %vm399_vm1, %v1976_v14  ;;  %v899_v5 = vor.u32 %v897_v57, %v895_v39  ;;  %v1483_v8 = vrot.slane %v6252_v60, 1 }
  0x95   : > { %v903_v6 = vrot.slane %v901_v58, 1 }
  0x96   : > { %v6585_v1 = vpop.f32.mrf.mxu2  ;;  %v1484_v14 = vsel %vm1471_vm2, %v1481_v40, %v1483_v8  ;;  %v1981_v40 = vrot.slane %v6276_v36, 1 }
  0x97   : > { %v6587_v2 = vpop.f32.mrf.mxu1  ;;  %v6601_v20 = vpop.f32.mrf.mxu3  ;;  %v904_v13 = vsel %vm852_vm3, %v899_v5, %v903_v6 }
  0x98   : > { %v6591_v7 = vpop.f32.mrf.mxu0  ;;  %7697 = vst [vmem:[#allocation3_spill] sm:$0xff] %v6601_v20  ;;  %v6279_v20 = vld [vmem:[%s6466_s25 + $0x68] sm:$0xff] }
  0x9e   : > { %v6595_v16 = vpop.f32.mrf.mxu2 }
  0x9f   : > { %v6597_v17 = vpop.f32.mrf.mxu1  ;;  %v6616_v32 = vpop.f32.mrf.mxu3 }
  0xa0   : > { %v6603_v21 = vpop.f32.mrf.mxu0  ;;  %7698 = vst [vmem:[#allocation4_spill] sm:$0xff] %v6616_v32  ;;  %v6256_v32 = vld [vmem:[%s6466_s25 + $0x50] sm:$0xff] }
  0xa2   : > { %5443 = vmatmul.msk.bf16.gmra.mxu1 %vm399_vm1, %v888_v18 }
  0xa3   : > { %5549 = vmatmul.msk.bf16.gmra.mxu2 %vm399_vm1, %v1480_v19  ;;  %5761 = vmatmul.msk.bf16.gmra.mxu0 %vm399_vm1, %v2500_v22  ;;  %v2518_v19 = vsel %vm2456_vm4, %v2508_v42, %v2517_v10  ;;  %v6295_v22 = vld [vmem:[%s6466_s25 + $0x40] sm:$0xff]  ;;  %v911_v42 = vrot.slane %v909_v31, 1 }
  0xa4   : > { %5658 = vmatmul.msk.bf16.gmra.mxu3 %vm399_vm1, %v1978_v41  ;;  %v2520_v24 = vshrl.u32 %v6295_v22, 16  ;;  %v2523_v25 = vshll.u32 %v6295_v22, 16  ;;  %v907_v41 = vor.u32 %v905_v30, %v903_v6  ;;  %v2531_v22 = vrot.slane %v2529_v3, 1 }
  0xa6   : > { %v6611_v27 = vpop.f32.mrf.mxu2  ;;  %v2522_v38 = vrot.slane %v2520_v24, 1  ;;  %v2525_v39 = vrot.slane %v2523_v25, 2  ;;  %v912_v52 = vsel %vm852_vm3, %v907_v41, %v911_v42 }
  0xa7   : > { %v6613_v28 = vpop.f32.mrf.mxu1  ;;  %v6629_v47 = vpop.f32.mrf.mxu3 }
  0xa8   : > { %v6619_v34 = vpop.f32.mrf.mxu0  ;;  %7699 = vst [vmem:[#allocation5_spill] sm:$0xff] %v6629_v47 }
  0xae   : > { %v6623_v43 = vpop.f32.mrf.mxu2 }
  0xaf   : > { %v6625_v44 = vpop.f32.mrf.mxu1  ;;  %v6644_v61 = vpop.f32.mrf.mxu3 }
  0xb0   : > { %v6631_v48 = vpop.f32.mrf.mxu0  ;;  %7700 = vst [vmem:[#allocation6_spill] sm:$0xff] %v6644_v61 }
  0xb2   : > { %5444 = vmatmul.msk.bf16.gmra.mxu1 %vm399_vm1, %v896_v45  ;;  %v1485_v45 = vrot.slane %v6253_v33, 1 }
  0xb3   : > { %5550 = vmatmul.msk.bf16.gmra.mxu2 %vm399_vm1, %v1482_v46  ;;  %5762 = vmatmul.msk.bf16.gmra.mxu0 %vm399_vm1, %v2509_v49  ;;  %v1982_v46 = vsel %vm1471_vm2, %v1979_v4, %v1981_v40  ;;  %v2526_v49 = vor.u32 %v2525_v39, %v2522_v38  ;;  %v2532_v4 = vshll.u32 %v6296_v62, 16 }
  0xb4   : > { %5659 = vmatmul.msk.bf16.gmra.mxu3 %vm399_vm1, %v1980_v9  ;;  %v1486_v53 = vsel %vm1471_vm2, %v1483_v8, %v1485_v45  ;;  %v913_v8 = vshrl.u32 %v6232_v23, 16  ;;  %v917_v9 = vshll.u32 %v6233_v0, 16 }
  0xb5   : > { %v2527_v60 = vsel %vm2456_vm4, %v2517_v10, %v2526_v49  ;;  %v6277_v10 = vld [vmem:[%s6466_s25 + $0x58] sm:$0xff]  ;;  %v2534_v24 = vrot.slane %v2532_v4, 2  ;;  %v921_v4 = vshrl.u32 %v6233_v0, 16 }
  0xb6   : > { %v6639_v54 = vpop.f32.mrf.mxu2  ;;  %v1983_v25 = vrot.slane %v6277_v10, 1  ;;  %v915_v30 = vor.u32 %v913_v8, %v911_v42  ;;  %v919_v31 = vrot.slane %v917_v9, 1  ;;  %v6255_v9 = vld [vmem:[%s6466_s25 + $0x48] sm:$0xff] }
  0xb7   : > { %v6641_v55 = vpop.f32.mrf.mxu1  ;;  %v6657_v15 = vpop.f32.mrf.mxu3  ;;  %v2535_v36 = vor.u32 %v2534_v24, %v2531_v22 }
  0xb8   : > { %v6647_v63 = vpop.f32.mrf.mxu0  ;;  %7701 = vst [vmem:[#allocation7_spill] sm:$0xff] %v6657_v15  ;;  %v920_v39 = vsel %vm852_vm3, %v915_v30, %v919_v31 }
  0xbe   : > { %v6651_v11 = vpop.f32.mrf.mxu2 }
  0xbf   : > { %v6653_v12 = vpop.f32.mrf.mxu1  ;;  %v578_v35 = vpop.f32.mrf.mxu3 }
  0xc0   : > { %v6659_v18 = vpop.f32.mrf.mxu0  ;;  %v1984_v35 = vsel %vm1471_vm2, %v1981_v40, %v1983_v25  ;;  %v6297_v40 = vld [vmem:[%s6466_s25 + $0x50] sm:$0xff] }
  0xc1   : > { %v2541_v62 = vshll.u32 %v6297_v40, 16 }
  0xc2   : > { %5445 = vmatmul.msk.bf16.gmra.mxu1 %vm399_vm1, %v904_v13  ;;  %v6254_v13 = vld [vmem:[%s6466_s25 + $0x40] sm:$0xff] }
  0xc3   : > { %5551 = vmatmul.msk.bf16.gmra.mxu2 %vm399_vm1, %v1484_v14  ;;  %5763 = vmatmul.msk.bf16.gmra.mxu0 %vm399_vm1, %v2518_v19  ;;  %v1487_v33 = vrot.slane %v6254_v13, 1  ;;  %v2543_v24 = vrot.slane %v2541_v62, 2 }
  0xc4   : > { %5660 = vmatmul.msk.bf16.gmra.mxu3 %vm399_vm1, %v1982_v46 }
  0xc5   : > { %v1488_v41 = vsel %vm1471_vm2, %v1485_v45, %v1487_v33 }
  0xc6   : > { %v6667_v26 = vpop.f32.mrf.mxu2 }
  0xc7   : > { %v6669_v29 = vpop.f32.mrf.mxu1  ;;  %v6683_v57 = vpop.f32.mrf.mxu3 }
  0xc8   : > { %v6673_v37 = vpop.f32.mrf.mxu0 }
  0xce   : > { %v6677_v50 = vpop.f32.mrf.mxu2 }
  0xcf   : > { %v6679_v51 = vpop.f32.mrf.mxu1  ;;  %v6698_v14 = vpop.f32.mrf.mxu3 }
  0xd0   : > { %v6685_v58 = vpop.f32.mrf.mxu0 }
  0xd2   : > { %5446 = vmatmul.msk.bf16.gmra.mxu1 %vm399_vm1, %v912_v52  ;;  %v2536_v52 = vsel %vm2456_vm4, %v2526_v49, %v2535_v36  ;;  %v6278_v49 = vld [vmem:[%s6466_s25 + $0x60] sm:$0xff] }
  0xd3   : > { %5552 = vmatmul.msk.bf16.gmra.mxu2 %vm399_vm1, %v1486_v53  ;;  %5764 = vmatmul.msk.bf16.gmra.mxu0 %vm399_vm1, %v2527_v60  ;;  %v6234_v53 = vld [vmem:[%s6466_s25 + $0x48] sm:$0xff]  ;;  %v2538_v60 = vshrl.u32 %v6297_v40, 16  ;;  %v1985_v30 = vrot.slane %v6278_v49, 1 }
  0xd4   : > { %5661 = vmatmul.msk.bf16.gmra.mxu3 %vm399_vm1, %v1984_v35  ;;  %v925_v8 = vshll.u32 %v6234_v53, 16  ;;  %v923_v35 = vor.u32 %v921_v4, %v919_v31  ;;  %v6298_v4 = vld [vmem:[%s6466_s25 + $0x58] sm:$0xff] }
  0xd5   : > { %v2540_v22 = vrot.slane %v2538_v60, 1  ;;  %v2550_v49 = vshll.u32 %v6298_v4, 16 }
  0xd6   : > { %v6693_v5 = vpop.f32.mrf.mxu2 }
  0xd7   : > { %7702 = vst [vmem:[#allocation8_spill] sm:$0xff] %v6693_v5  ;;  %v6695_v6 = vpop.f32.mrf.mxu1  ;;  %v6711_v46 = vpop.f32.mrf.mxu3  ;;  %v2544_v40 = vor.u32 %v2543_v24, %v2540_v22 }
  0xd8   : > { %v6701_v19 = vpop.f32.mrf.mxu0 }
  0xd9   : > { %v2545_v31 = vsel %vm2456_vm4, %v2535_v36, %v2544_v40 }
  0xde   : > { %v6705_v23 = vpop.f32.mrf.mxu2 }
  0xdf   : > { %7703 = vst [vmem:[#allocation9_spill] sm:$0xff] %v6705_v23  ;;  %v6707_v38 = vpop.f32.mrf.mxu1  ;;  %v6726_v13 = vpop.f32.mrf.mxu3 }
  0xe0   : > { %v6713_v42 = vpop.f32.mrf.mxu0 }
  0xe2   : > { %5447 = vmatmul.msk.bf16.gmra.mxu1 %vm399_vm1, %v920_v39  ;;  %v927_v39 = vrot.slane %v925_v8, 1 }
  0xe3   : > { %5553 = vmatmul.msk.bf16.gmra.mxu2 %vm399_vm1, %v1488_v41  ;;  %5765 = vmatmul.msk.bf16.gmra.mxu0 %vm399_vm1, %v2536_v52  ;;  %v1489_v41 = vrot.slane %v6255_v9, 1  ;;  %v1986_v52 = vsel %vm1471_vm2, %v1983_v25, %v1985_v30  ;;  %v6235_v25 = vld [vmem:[%s6466_s25 + $0x50] sm:$0xff]  ;;  %v2547_v9 = vshrl.u32 %v6298_v4, 16  ;;  %v1491_v4 = vrot.slane %v6256_v32, 1 }
  0xe4   : > { %5662 = vmatmul.msk.bf16.gmra.mxu3 %vm399_vm1, %v1986_v52  ;;  %v928_v61 = vsel %vm852_vm3, %v923_v35, %v927_v39  ;;  %v929_v35 = vshrl.u32 %v6234_v53, 16  ;;  %v933_v52 = vshll.u32 %v6235_v25, 16 }
  0xe5   : > { %v1490_v47 = vsel %vm1471_vm2, %v1487_v33, %v1489_v41 }
  0xe6   : > { %v6721_v3 = vpop.f32.mrf.mxu2 }
  0xe7   : > { %7704 = vst [vmem:[#allocation10_spill] sm:$0xff] %v6721_v3  ;;  %v6723_v45 = vpop.f32.mrf.mxu1  ;;  %v6737_v60 = vpop.f32.mrf.mxu3  ;;  %v2552_v3 = vrot.slane %v2550_v49, 2 }
  0xe8   : > { %v6729_v10 = vpop.f32.mrf.mxu0 }
  0xee   : > { %v6733_v0 = vpop.f32.mrf.mxu2 }
  0xef   : > { %7705 = vst [vmem:[#allocation11_spill] sm:$0xff] %v6733_v0  ;;  %v1095_v15 = vpop.f32.mrf.mxu1  ;;  %v6747_v36 = vpop.f32.mrf.mxu3 }
  0xf0   : > { %v2720_v62 = vpop.f32.mrf.mxu0  ;;  %v1199_v8 = vadd.f32 %v1095_v15, %v6577_v59  ;;  %v931_v59 = vor.u32 %v929_v35, %v927_v39  ;;  %v935_v15 = vrot.slane %v933_v52, 1 }
  0xf2   : > { %5448 = vmatmul.msk.bf16.gmra.mxu1 %vm399_vm1, %v928_v61 }
  0xf3   : > { %5554 = vmatmul.msk.bf16.gmra.mxu2 %vm399_vm1, %v1490_v47  ;;  %5766 = vmatmul.msk.bf16.gmra.mxu0 %vm399_vm1, %v2545_v31  ;;  %v2549_v47 = vrot.slane %v2547_v9, 1  ;;  %v1987_v31 = vrot.slane %v6279_v20, 1  ;;  %v936_v9 = vsel %vm852_vm3, %v931_v59, %v935_v15  ;;  %v1492_v20 = vsel %vm1471_vm2, %v1489_v41, %v1491_v4 }
  0xf6   : > { %v1588_v33 = vpop.f32.mrf.mxu2 }
  0xf7   : > { %v1692_v22 = vadd.f32 %v1588_v33, %v1199_v8  ;;  %v1097_v24 = vpop.f32.mrf.mxu1  ;;  %v1988_v8 = vsel %vm1471_vm2, %v1985_v30, %v1987_v31  ;;  %v2553_v33 = vor.u32 %v2552_v3, %v2549_v47  ;;  %v6236_v3 = vld [vmem:[%s6466_s25 + $0x58] sm:$0xff] }
  0xf8   : > { %v2722_v0 = vpop.f32.mrf.mxu0  ;;  %v1200_v53 = vadd.f32 %v1097_v24, %v6591_v7  ;;  %5663 = vmatmul.msk.bf16.gmra.mxu3 %vm399_vm1, %v1988_v8  ;;  %v6299_v7 = vld [vmem:[%s6466_s25 + $0x60] sm:$0xff]  ;;  %v6257_v47 = vld [vmem:[%s6466_s25 + $0x58] sm:$0xff]  ;;  %v6280_v8 = vld [vmem:[%s6466_s25 + $0x70] sm:$0xff] }
  0xf9   : > { %v2184_v61 = vadd.f32 %v6683_v57, %v1692_v22  ;;  %v2554_v30 = vsel %vm2456_vm4, %v2544_v40, %v2553_v33  ;;  %v2556_v49 = vshrl.u32 %v6299_v7, 16  ;;  %v2559_v24 = vshll.u32 %v6299_v7, 16 }
  0xfa   : > { %v941_v40 = vshll.u32 %v6236_v3, 16 }
  0xfb   : > { %v6751_v23 = vadd.f32 %v2720_v62, %v2184_v61  ;;  %v6758_v62 = vpop.f32.mrf.mxu3  ;;  %v937_v61 = vshrl.u32 %v6235_v25, 16 }
  0xfe   : > { %v1590_v5 = vpop.f32.mrf.mxu2 }
  0xff   : > { %v1693_v57 = vadd.f32 %v1590_v5, %v1200_v53  ;;  %v1100_v22 = vpop.f32.mrf.mxu1 }
 0x100   : > { %v2725_v32 = vpop.f32.mrf.mxu0  ;;  %v1201_v41 = vadd.f32 %v1100_v22, %v6603_v21  ;;  %v939_v21 = vor.u32 %v937_v61, %v935_v15  ;;  %v943_v22 = vrot.slane %v941_v40, 1  ;;  %v6237_v40 = vld [vmem:[%s6466_s25 + $0x60] sm:$0xff] }
 0x101   : > { %v2185_v39 = vadd.f32 %v6698_v14, %v1693_v57  ;;  %v2558_v57 = vrot.slane %v2556_v49, 1 }
 0x102   : > { %5449 = vmatmul.msk.bf16.gmra.mxu1 %vm399_vm1, %v936_v9  ;;  %v2561_v9 = vrot.slane %v2559_v24, 2  ;;  %v944_v49 = vsel %vm852_vm3, %v939_v21, %v943_v22  ;;  %v6258_v21 = vld [vmem:[%s6466_s25 + $0x60] sm:$0xff] }
 0x103   : > { %5555 = vmatmul.msk.bf16.gmra.mxu2 %vm399_vm1, %v1492_v20  ;;  %v6765_v5 = vadd.f32 %v2722_v0, %v2185_v39  ;;  %5767 = vmatmul.msk.bf16.gmra.mxu0 %vm399_vm1, %v2554_v30  ;;  %v6771_v59 = vpop.f32.mrf.mxu3  ;;  %v1989_v20 = vrot.slane %v6280_v8, 1  ;;  %v1493_v30 = vrot.slane %v6257_v47, 1 }
 0x105   : > { %v1990_v7 = vsel %vm1471_vm2, %v1987_v31, %v1989_v20 }
 0x106   : > { %v1593_v14 = vpop.f32.mrf.mxu2 }
 0x107   : > { %v1694_v35 = vadd.f32 %v1593_v14, %v1201_v41  ;;  %v1102_v52 = vpop.f32.mrf.mxu1  ;;  %v2562_v41 = vor.u32 %v2561_v9, %v2558_v57  ;;  %v945_v9 = vshrl.u32 %v6236_v3, 16 }
 0x108   : > { %v2727_v0 = vpop.f32.mrf.mxu0  ;;  %v1202_v25 = vadd.f32 %v1102_v52, %v6619_v34  ;;  %5664 = vmatmul.msk.bf16.gmra.mxu3 %vm399_vm1, %v1990_v7  ;;  %v6300_v34 = vld [vmem:[%s6466_s25 + $0x68] sm:$0xff] }
 0x109   : > { %v2186_v53 = vadd.f32 %v6711_v46, %v1694_v35  ;;  %v2563_v31 = vsel %vm2456_vm4, %v2553_v33, %v2562_v41  ;;  %v2565_v47 = vshrl.u32 %v6300_v34, 16  ;;  %v2568_v8 = vshll.u32 %v6300_v34, 16 }
 0x10a   : > { %v949_v33 = vshll.u32 %v6237_v40, 16 }
 0x10b   : > { %v6775_v39 = vadd.f32 %v2725_v32, %v2186_v53  ;;  %v1494_v32 = vsel %vm1471_vm2, %v1491_v4, %v1493_v30  ;;  %v6782_v24 = vpop.f32.mrf.mxu3 }
 0x10e   : > { %v1595_v14 = vpop.f32.mrf.mxu2 }
 0x10f   : > { %v1695_v46 = vadd.f32 %v1595_v14, %v1202_v25  ;;  %v1105_v35 = vpop.f32.mrf.mxu1  ;;  %v6281_v25 = vld [vmem:[%s6466_s25 + $0x78] sm:$0xff] }
 0x110   : > { %v2730_v61 = vpop.f32.mrf.mxu0  ;;  %v1203_v4 = vadd.f32 %v1105_v35, %v6631_v48  ;;  %v947_v48 = vor.u32 %v945_v9, %v943_v22  ;;  %v951_v35 = vrot.slane %v949_v33, 1  ;;  %v6238_v33 = vld [vmem:[%s6466_s25 + $0x68] sm:$0xff] }
 0x111   : > { %v2187_v15 = vadd.f32 %v6726_v13, %v1695_v46  ;;  %v2567_v46 = vrot.slane %v2565_v47, 1 }
 0x112   : > { %5450 = vmatmul.msk.bf16.gmra.mxu1 %vm399_vm1, %v944_v49  ;;  %v2570_v49 = vrot.slane %v2568_v8, 2  ;;  %v952_v47 = vsel %vm852_vm3, %v947_v48, %v951_v35  ;;  %v6259_v48 = vld [vmem:[%s6466_s25 + $0x68] sm:$0xff] }
 0x113   : > { %5556 = vmatmul.msk.bf16.gmra.mxu2 %vm399_vm1, %v1494_v32  ;;  %v6789_v52 = vadd.f32 %v2727_v0, %v2187_v15  ;;  %5768 = vmatmul.msk.bf16.gmra.mxu0 %vm399_vm1, %v2563_v31  ;;  %v6795_v7 = vpop.f32.mrf.mxu3  ;;  %v1991_v32 = vrot.slane %v6281_v25, 1  ;;  %v1495_v31 = vrot.slane %v6258_v21, 1 }
 0x115   : > { %v1992_v34 = vsel %vm1471_vm2, %v1989_v20, %v1991_v32 }
 0x116   : > { %v1598_v13 = vpop.f32.mrf.mxu2 }
 0x117   : > { %v1696_v53 = vadd.f32 %v1598_v13, %v1203_v4  ;;  %v1107_v57 = vpop.f32.mrf.mxu1  ;;  %v2571_v4 = vor.u32 %v2570_v49, %v2567_v46  ;;  %v953_v49 = vshrl.u32 %v6237_v40, 16 }
 0x118   : > { %v2732_v0 = vpop.f32.mrf.mxu0  ;;  %v1204_v3 = vadd.f32 %v1107_v57, %v6647_v63  ;;  %5665 = vmatmul.msk.bf16.gmra.mxu3 %vm399_vm1, %v1992_v34  ;;  %v6301_v63 = vld [vmem:[%s6466_s25 + $0x70] sm:$0xff] }
 0x119   : > { %v2188_v14 = vadd.f32 %v6737_v60, %v1696_v53  ;;  %v2572_v20 = vsel %vm2456_vm4, %v2562_v41, %v2571_v4  ;;  %v2574_v21 = vshrl.u32 %v6301_v63, 16  ;;  %v2577_v25 = vshll.u32 %v6301_v63, 16 }
 0x11a   : > { %v957_v41 = vshll.u32 %v6238_v33, 16 }
 0x11b   : > { %v6799_v15 = vadd.f32 %v2730_v61, %v2188_v14  ;;  %v1496_v61 = vsel %vm1471_vm2, %v1493_v30, %v1495_v31  ;;  %v6806_v8 = vpop.f32.mrf.mxu3 }
 0x11e   : > { %v1600_v13 = vpop.f32.mrf.mxu2 }
 0x11f   : > { %v1697_v60 = vadd.f32 %v1600_v13, %v1204_v3  ;;  %v1110_v53 = vpop.f32.mrf.mxu1  ;;  %v6282_v3 = vld [vmem:[%s6466_s25 + $0x80] sm:$0xff] }
 0x120   : > { %v2735_v9 = vpop.f32.mrf.mxu0  ;;  %v1205_v30 = vadd.f32 %v1110_v53, %v6659_v18  ;;  %v955_v18 = vor.u32 %v953_v49, %v951_v35  ;;  %v959_v53 = vrot.slane %v957_v41, 1  ;;  %v6239_v41 = vld [vmem:[%s6466_s25 + $0x70] sm:$0xff] }
 0x121   : > { %v2189_v22 = vadd.f32 %v6747_v36, %v1697_v60  ;;  %v2576_v60 = vrot.slane %v2574_v21, 1 }
 0x122   : > { %5451 = vmatmul.msk.bf16.gmra.mxu1 %vm399_vm1, %v952_v47  ;;  %v2579_v47 = vrot.slane %v2577_v25, 2  ;;  %v960_v21 = vsel %vm852_vm3, %v955_v18, %v959_v53  ;;  %v6260_v18 = vld [vmem:[%s6466_s25 + $0x70] sm:$0xff] }
 0x123   : > { %5557 = vmatmul.msk.bf16.gmra.mxu2 %vm399_vm1, %v1496_v61  ;;  %v6813_v57 = vadd.f32 %v2732_v0, %v2189_v22  ;;  %5769 = vmatmul.msk.bf16.gmra.mxu0 %vm399_vm1, %v2572_v20  ;;  %v6819_v34 = vpop.f32.mrf.mxu3  ;;  %v1993_v61 = vrot.slane %v6282_v3, 1  ;;  %v1497_v20 = vrot.slane %v6259_v48, 1 }
 0x125   : > { %v1994_v63 = vsel %vm1471_vm2, %v1991_v32, %v1993_v61 }
 0x126   : > { %v1603_v36 = vpop.f32.mrf.mxu2 }
 0x127   : > { %v1698_v14 = vadd.f32 %v1603_v36, %v1205_v30  ;;  %v1112_v46 = vpop.f32.mrf.mxu1  ;;  %v2580_v30 = vor.u32 %v2579_v47, %v2576_v60  ;;  %v961_v47 = vshrl.u32 %v6238_v33, 16 }
 0x128   : > { %v2737_v0 = vpop.f32.mrf.mxu0  ;;  %v1206_v40 = vadd.f32 %v1112_v46, %v6673_v37  ;;  %5666 = vmatmul.msk.bf16.gmra.mxu3 %vm399_vm1, %v1994_v63  ;;  %v6302_v37 = vld [vmem:[%s6466_s25 + $0x78] sm:$0xff] }
 0x129   : > { %v2190_v13 = vadd.f32 %v6758_v62, %v1698_v14  ;;  %v2581_v32 = vsel %vm2456_vm4, %v2571_v4, %v2580_v30  ;;  %v2583_v48 = vshrl.u32 %v6302_v37, 16  ;;  %v2586_v3 = vshll.u32 %v6302_v37, 16 }
 0x12a   : > { %v965_v4 = vshll.u32 %v6239_v41, 16 }
 0x12b   : > { %v6823_v22 = vadd.f32 %v2735_v9, %v2190_v13  ;;  %v1498_v9 = vsel %vm1471_vm2, %v1495_v31, %v1497_v20  ;;  %v6830_v25 = vpop.f32.mrf.mxu3 }
 0x12e   : > { %v1605_v36 = vpop.f32.mrf.mxu2 }
 0x12f   : > { %v1699_v62 = vadd.f32 %v1605_v36, %v1206_v40  ;;  %v1115_v14 = vpop.f32.mrf.mxu1  ;;  %v6283_v40 = vld [vmem:[%s6466_s25 + $0x88] sm:$0xff] }
 0x130   : > { %v2740_v49 = vpop.f32.mrf.mxu0  ;;  %v1207_v31 = vadd.f32 %v1115_v14, %v6685_v58  ;;  %v963_v58 = vor.u32 %v961_v47, %v959_v53  ;;  %v967_v14 = vrot.slane %v965_v4, 1  ;;  %v6240_v4 = vld [vmem:[%s6466_s25 + $0x78] sm:$0xff] }
 0x131   : > { %v2191_v35 = vadd.f32 %v6771_v59, %v1699_v62  ;;  %v2585_v62 = vrot.slane %v2583_v48, 1 }
 0x132   : > { %5452 = vmatmul.msk.bf16.gmra.mxu1 %vm399_vm1, %v960_v21  ;;  %v2588_v21 = vrot.slane %v2586_v3, 2  ;;  %v968_v48 = vsel %vm852_vm3, %v963_v58, %v967_v14  ;;  %v6261_v58 = vld [vmem:[%s6466_s25 + $0x78] sm:$0xff] }
 0x133   : > { %5558 = vmatmul.msk.bf16.gmra.mxu2 %vm399_vm1, %v1498_v9  ;;  %v6837_v46 = vadd.f32 %v2737_v0, %v2191_v35  ;;  %5770 = vmatmul.msk.bf16.gmra.mxu0 %vm399_vm1, %v2581_v32  ;;  %v6843_v63 = vpop.f32.mrf.mxu3  ;;  %v1995_v9 = vrot.slane %v6283_v40, 1  ;;  %v1499_v32 = vrot.slane %v6260_v18, 1 }
 0x135   : > { %v1996_v37 = vsel %vm1471_vm2, %v1993_v61, %v1995_v9 }
 0x136   : > { %v1608_v59 = vpop.f32.mrf.mxu2 }
 0x137   : > { %v1700_v13 = vadd.f32 %v1608_v59, %v1207_v31  ;;  %v1117_v60 = vpop.f32.mrf.mxu1  ;;  %v2589_v31 = vor.u32 %v2588_v21, %v2585_v62  ;;  %v969_v21 = vshrl.u32 %v6239_v41, 16 }
 0x138   : > { %v2742_v0 = vpop.f32.mrf.mxu0  ;;  %v1208_v33 = vadd.f32 %v1117_v60, %v6701_v19  ;;  %5667 = vmatmul.msk.bf16.gmra.mxu3 %vm399_vm1, %v1996_v37  ;;  %v6303_v19 = vld [vmem:[%s6466_s25 + $0x80] sm:$0xff] }
 0x139   : > { %v2192_v36 = vadd.f32 %v6782_v24, %v1700_v13  ;;  %v2590_v61 = vsel %vm2456_vm4, %v2580_v30, %v2589_v31  ;;  %v2592_v18 = vshrl.u32 %v6303_v19, 16  ;;  %v2595_v40 = vshll.u32 %v6303_v19, 16 }
 0x13a   : > { %v973_v30 = vshll.u32 %v6240_v4, 16 }
 0x13b   : > { %v6847_v35 = vadd.f32 %v2740_v49, %v2192_v36  ;;  %v1500_v49 = vsel %vm1471_vm2, %v1497_v20, %v1499_v32  ;;  %v6854_v3 = vpop.f32.mrf.mxu3 }
 0x13e   : > { %v1610_v59 = vpop.f32.mrf.mxu2 }
 0x13f   : > { %v1701_v24 = vadd.f32 %v1610_v59, %v1208_v33  ;;  %v1120_v13 = vpop.f32.mrf.mxu1  ;;  %v6284_v33 = vld [vmem:[%s6466_s25 + $0x90] sm:$0xff] }
 0x140   : > { %v2745_v47 = vpop.f32.mrf.mxu0  ;;  %v1209_v20 = vadd.f32 %v1120_v13, %v6713_v42  ;;  %v971_v42 = vor.u32 %v969_v21, %v967_v14  ;;  %v975_v13 = vrot.slane %v973_v30, 1  ;;  %v6241_v30 = vld [vmem:[%s6466_s25 + $0x80] sm:$0xff] }
 0x141   : > { %v2193_v53 = vadd.f32 %v6795_v7, %v1701_v24  ;;  %v2594_v24 = vrot.slane %v2592_v18, 1 }
 0x142   : > { %5453 = vmatmul.msk.bf16.gmra.mxu1 %vm399_vm1, %v968_v48  ;;  %v2597_v48 = vrot.slane %v2595_v40, 2  ;;  %v976_v18 = vsel %vm852_vm3, %v971_v42, %v975_v13  ;;  %v6262_v42 = vld [vmem:[%s6466_s25 + $0x80] sm:$0xff] }
 0x143   : > { %5559 = vmatmul.msk.bf16.gmra.mxu2 %vm399_vm1, %v1500_v49  ;;  %v6861_v60 = vadd.f32 %v2742_v0, %v2193_v53  ;;  %5771 = vmatmul.msk.bf16.gmra.mxu0 %vm399_vm1, %v2590_v61  ;;  %v6867_v37 = vpop.f32.mrf.mxu3  ;;  %v1997_v49 = vrot.slane %v6284_v33, 1  ;;  %v1501_v61 = vrot.slane %v6261_v58, 1 }
 0x145   : > { %v1998_v19 = vsel %vm1471_vm2, %v1995_v9, %v1997_v49 }
 0x146   : > { %v1613_v7 = vpop.f32.mrf.mxu2 }
 0x147   : > { %v1702_v36 = vadd.f32 %v1613_v7, %v1209_v20  ;;  %v1122_v62 = vpop.f32.mrf.mxu1  ;;  %v2598_v20 = vor.u32 %v2597_v48, %v2594_v24  ;;  %v977_v48 = vshrl.u32 %v6240_v4, 16 }
 0x148   : > { %v2747_v0 = vpop.f32.mrf.mxu0  ;;  %v1210_v41 = vadd.f32 %v1122_v62, %v6729_v10  ;;  %5668 = vmatmul.msk.bf16.gmra.mxu3 %vm399_vm1, %v1998_v19  ;;  %v6304_v10 = vld [vmem:[%s6466_s25 + $0x88] sm:$0xff] }
 0x149   : > { %v2194_v59 = vadd.f32 %v6806_v8, %v1702_v36  ;;  %v2599_v9 = vsel %vm2456_vm4, %v2589_v31, %v2598_v20  ;;  %v2601_v58 = vshrl.u32 %v6304_v10, 16  ;;  %v2604_v33 = vshll.u32 %v6304_v10, 16 }
 0x14a   : > { %v981_v31 = vshll.u32 %v6241_v30, 16 }
 0x14b   : > { %v6871_v53 = vadd.f32 %v2745_v47, %v2194_v59  ;;  %v1502_v47 = vsel %vm1471_vm2, %v1499_v32, %v1501_v61  ;;  %v6878_v40 = vpop.f32.mrf.mxu3 }
 0x14e   : > { %v1615_v7 = vpop.f32.mrf.mxu2 }
 0x14f   : > { %v1703_v8 = vadd.f32 %v1615_v7, %v1210_v41  ;;  %v1125_v36 = vpop.f32.mrf.mxu1  ;;  %v6285_v41 = vld [vmem:[%s6466_s25 + $0x98] sm:$0xff] }
 0x150   : > { %v2750_v21 = vpop.f32.mrf.mxu0  ;;  %v1211_v32 = vadd.f32 %v1125_v36, %v6573_v56  ;;  %v979_v56 = vor.u32 %v977_v48, %v975_v13  ;;  %v983_v36 = vrot.slane %v981_v31, 1  ;;  %v6242_v31 = vld [vmem:[%s6466_s25 + $0x88] sm:$0xff] }
 0x151   : > { %v2195_v14 = vadd.f32 %v6819_v34, %v1703_v8  ;;  %v2603_v8 = vrot.slane %v2601_v58, 1 }
 0x152   : > { %5454 = vmatmul.msk.bf16.gmra.mxu1 %vm399_vm1, %v976_v18  ;;  %v2606_v18 = vrot.slane %v2604_v33, 2  ;;  %v984_v58 = vsel %vm852_vm3, %v979_v56, %v983_v36  ;;  %v6915_v56 = vld [vmem:[%s6466_s25 + $0x88] sm:$0xff] }
 0x153   : > { %5560 = vmatmul.msk.bf16.gmra.mxu2 %vm399_vm1, %v1502_v47  ;;  %v6885_v62 = vadd.f32 %v2747_v0, %v2195_v14  ;;  %5772 = vmatmul.msk.bf16.gmra.mxu0 %vm399_vm1, %v2599_v9  ;;  %v6891_v19 = vpop.f32.mrf.mxu3  ;;  %v1999_v47 = vrot.slane %v6285_v41, 1  ;;  %v1503_v9 = vrot.slane %v6262_v42, 1 }
 0x155   : > { %v2000_v10 = vsel %vm1471_vm2, %v1997_v49, %v1999_v47 }
 0x156   : > { %v1618_v34 = vpop.f32.mrf.mxu2 }
 0x157   : > { %v1704_v59 = vadd.f32 %v1618_v34, %v1211_v32  ;;  %v1127_v24 = vpop.f32.mrf.mxu1  ;;  %v2607_v32 = vor.u32 %v2606_v18, %v2603_v8  ;;  %v985_v18 = vshrl.u32 %v6241_v30, 16 }
 0x158   : > { %v2752_v0 = vpop.f32.mrf.mxu0  ;;  %v1212_v4 = vadd.f32 %v1127_v24, %v6587_v2  ;;  %5669 = vmatmul.msk.bf16.gmra.mxu3 %vm399_vm1, %v2000_v10  ;;  %v6305_v2 = vld [vmem:[%s6466_s25 + $0x90] sm:$0xff] }
 0x159   : > { %v2196_v7 = vadd.f32 %v6830_v25, %v1704_v59  ;;  %v2608_v49 = vsel %vm2456_vm4, %v2598_v20, %v2607_v32  ;;  %v2610_v42 = vshrl.u32 %v6305_v2, 16  ;;  %v2613_v41 = vshll.u32 %v6305_v2, 16 }
 0x15a   : > { %v989_v20 = vshll.u32 %v6242_v31, 16 }
 0x15b   : > { %v6895_v14 = vadd.f32 %v2750_v21, %v2196_v7  ;;  %v1504_v21 = vsel %vm1471_vm2, %v1501_v61, %v1503_v9  ;;  %v6902_v33 = vpop.f32.mrf.mxu3 }
 0x15e   : > { %v1620_v34 = vpop.f32.mrf.mxu2 }
 0x15f   : > { %v1705_v25 = vadd.f32 %v1620_v34, %v1212_v4  ;;  %v1130_v59 = vpop.f32.mrf.mxu1  ;;  %v6286_v4 = vld [vmem:[%s6466_s25 + $0xa0] sm:$0xff] }
 0x160   : > { %v2755_v48 = vpop.f32.mrf.mxu0  ;;  %v1213_v61 = vadd.f32 %v1130_v59, %v6597_v17  ;;  %v987_v17 = vor.u32 %v985_v18, %v983_v36  ;;  %v991_v59 = vrot.slane %v989_v20, 1 }
 0x161   : > { %v2197_v13 = vadd.f32 %v6843_v63, %v1705_v25  ;;  %v2612_v25 = vrot.slane %v2610_v42, 1 }
 0x162   : > { %5455 = vmatmul.msk.bf16.gmra.mxu1 %vm399_vm1, %v984_v58  ;;  %v2615_v58 = vrot.slane %v2613_v41, 2  ;;  %v992_v41 = vsel %vm852_vm3, %v987_v17, %v991_v59  ;;  %v993_v17 = vshrl.u32 %v6242_v31, 16 }
 0x163   : > { %5561 = vmatmul.msk.bf16.gmra.mxu2 %vm399_vm1, %v1504_v21  ;;  %v6909_v24 = vadd.f32 %v2752_v0, %v2197_v13  ;;  %5773 = vmatmul.msk.bf16.gmra.mxu0 %vm399_vm1, %v2608_v49  ;;  %v6917_v10 = vpop.f32.mrf.mxu3  ;;  %v2001_v21 = vrot.slane %v6286_v4, 1  ;;  %v1505_v49 = vrot.slane %v6915_v56, 1 }
 0x165   : > { %v2002_v30 = vsel %vm1471_vm2, %v1999_v47, %v2001_v21 }
 0x166   : > { %v1623_v63 = vpop.f32.mrf.mxu2 }
 0x167   : > { %v1706_v7 = vadd.f32 %v1623_v63, %v1213_v61  ;;  %v1132_v8 = vpop.f32.mrf.mxu1  ;;  %v2616_v61 = vor.u32 %v2615_v58, %v2612_v25  ;;  %v5650_v25 = vld [vmem:[%s6466_s25 + $0xa8] sm:$0xf]  ;;  %v6287_v58 = vld [vmem:[%s6466_s25 + $0xa8] sm:$0x10] }
 0x168   : > { %v2757_v34 = vpop.f32.mrf.mxu0  ;;  %v1214_v2 = vadd.f32 %v1132_v8, %v6613_v28  ;;  %5670 = vmatmul.msk.bf16.gmra.mxu3 %vm399_vm1, %v2002_v30  ;;  %v6306_v8 = vld [vmem:[%s6466_s25 + $0x98] sm:$0xff] }
 0x169   : > { %v2198_v0 = vadd.f32 %v6854_v3, %v1706_v7  ;;  %v2617_v28 = vsel %vm2456_vm4, %v2607_v32, %v2616_v61  ;;  %v2619_v56 = vshrl.u32 %v6306_v8, 16  ;;  %v2622_v4 = vshll.u32 %v6306_v8, 16 }
 0x16b   : > { %v6921_v13 = vadd.f32 %v2755_v48, %v2198_v0  ;;  %v1506_v48 = vsel %vm1471_vm2, %v1503_v9, %v1505_v49  ;;  %v6929_v36 = vpop.f32.mrf.mxu3  ;;  %v6243_v9 = vld [vmem:[%s6466_s25 + $0x90] sm:$0xff] }
 0x16c   : > { %v997_v30 = vshll.u32 %v6243_v9, 16 }
 0x16e   : > { %v1625_v3 = vpop.f32.mrf.mxu2  ;;  %v999_v8 = vrot.slane %v997_v30, 1 }
 0x16f   : > { %v1707_v63 = vadd.f32 %v1625_v3, %v1214_v2  ;;  %v1135_v42 = vpop.f32.mrf.mxu1  ;;  %v6264_v2 = vld [vmem:[%s6466_s25 + $0x90] sm:$0xff] }
 0x170   : > { %v2760_v47 = vpop.f32.mrf.mxu0  ;;  %v1215_v20 = vadd.f32 %v1135_v42, %v6625_v44  ;;  %v995_v42 = vor.u32 %v993_v17, %v991_v59  ;;  %v6965_v17 = vld [vmem:[%s6466_s25 + $0x98] sm:$0xff] }
 0x171   : > { %v2199_v7 = vadd.f32 %v6867_v37, %v1707_v63  ;;  %v5651_v63 = vor.u32 %v6287_v58, %v5650_v25 }
 0x172   : > { %5456 = vmatmul.msk.bf16.gmra.mxu1 %vm399_vm1, %v992_v41 }
 0x173   : > { %5562 = vmatmul.msk.bf16.gmra.mxu2 %vm399_vm1, %v1506_v48  ;;  %v6936_v18 = vadd.f32 %v2757_v34, %v2199_v7  ;;  %5774 = vmatmul.msk.bf16.gmra.mxu0 %vm399_vm1, %v2617_v28  ;;  %v6944_v3 = vpop.f32.mrf.mxu3  ;;  %v2621_v48 = vrot.slane %v2619_v56, 1  ;;  %v2624_v7 = vrot.slane %v2622_v4, 2  ;;  %v2003_v28 = vrot.slane %v5651_v63, 1 }
 0x174   : > { %v1000_v56 = vsel %vm852_vm3, %v995_v42, %v999_v8 }
 0x175   : > { %7706 = vst [vmem:[#allocation12_spill] sm:$0xff] %v6936_v18  ;;  %v2625_v18 = vor.u32 %v2624_v7, %v2621_v48  ;;  %v1001_v48 = vshrl.u32 %v6243_v9, 16  ;;  %v6970_v7 = vld [vmem:[%s6466_s25 + $0x98] sm:$0xff] }
 0x176   : > { %v1628_v0 = vpop.f32.mrf.mxu2  ;;  %v7696_v9 = vrot.slane %v6970_v7, 1 }
 0x177   : > { %v1708_v37 = vadd.f32 %v1628_v0, %v1215_v20  ;;  %v1137_v32 = vpop.f32.mrf.mxu1  ;;  %v1507_v20 = vrot.slane %v6264_v2, 1  ;;  %v2004_v0 = vsel %vm1471_vm2, %v2001_v21, %v2003_v28  ;;  %v2626_v21 = vsel %vm2456_vm4, %v2616_v61, %v2625_v18 }
 0x178   : > { %v2762_v41 = vpop.f32.mrf.mxu0  ;;  %v1216_v31 = vadd.f32 %v1137_v32, %v6641_v55  ;;  %5671 = vmatmul.msk.bf16.gmra.mxu3 %vm399_vm1, %v2004_v0  ;;  %v6307_v55 = vld [vmem:[%s6466_s25 + $0xa0] sm:$0xff]  ;;  %v1005_v61 = vshll.u32 %v6965_v17, 16 }
 0x179   : > { %v2200_v34 = vadd.f32 %v6878_v40, %v1708_v37  ;;  %v2628_v30 = vshrl.u32 %v6307_v55, 16  ;;  %v2631_v2 = vshll.u32 %v6307_v55, 16 }
 0x17b   : > { %v6947_v44 = vadd.f32 %v2760_v47, %v2200_v34  ;;  %v1508_v47 = vsel %vm1471_vm2, %v1505_v49, %v1507_v20  ;;  %v6954_v4 = vpop.f32.mrf.mxu3 }
 0x17e   : > { %v1630_v25 = vpop.f32.mrf.mxu2 }
 0x17f   : > { %v1709_v40 = vadd.f32 %v1630_v25, %v1216_v31  ;;  %v1140_v37 = vpop.f32.mrf.mxu1  ;;  %v2630_v31 = vrot.slane %v2628_v30, 1  ;;  %v6245_v30 = vld [vmem:[%s6466_s25 + $0xa0] sm:$0x10] }
 0x180   : > { %v2765_v58 = vpop.f32.mrf.mxu0  ;;  %v1217_v49 = vadd.f32 %v1140_v37, %v6653_v12  ;;  %v2633_v12 = vrot.slane %v2631_v2, 2  ;;  %v1007_v37 = vrot.slane %v1005_v61, 1  ;;  %v6351_v61 = vld [vmem:[%s6466_s25 + $0x10] sm:$0xf0] }
 0x181   : > { %v2201_v59 = vadd.f32 %v6891_v19, %v1709_v40  ;;  %v1003_v40 = vor.u32 %v1001_v48, %v999_v8  ;;  %v1510_v8 = vsel %vm1471_vm2, %v1507_v20, %v7696_v9  ;;  %v5994_v20 = vld [vmem:[%s6466_s25 + $0x10] sm:$0xc] }
 0x182   : > { %5457 = vmatmul.msk.bf16.gmra.mxu1 %vm399_vm1, %v1000_v56 }
 0x183   : > { %5563 = vmatmul.msk.bf16.gmra.mxu2 %vm399_vm1, %v1508_v47  ;;  %v6961_v32 = vadd.f32 %v2762_v41, %v2201_v59  ;;  %5775 = vmatmul.msk.bf16.gmra.mxu0 %vm399_vm1, %v2626_v21  ;;  %v6972_v41 = vpop.f32.mrf.mxu3  ;;  %v6979_v47 = vor.u32 %v2633_v12, %v2630_v31  ;;  %v5756_v21 = vld [vmem:[%s6466_s25 + $0xa8] sm:$0xf]  ;;  %v5544_v31 = vld [vmem:[%s6466_s25 + $0xa0] sm:$0xf]  ;;  %v6266_v12 = vld [vmem:[%s6466_s25 + $0xa0] sm:$0x10] }
 0x185   : > { %7707 = vst [vmem:[#allocation13_spill] sm:$0xff] %v6961_v32 }
 0x186   : > { %v1633_v19 = vpop.f32.mrf.mxu2 }
 0x187   : > { %v1710_v63 = vadd.f32 %v1633_v19, %v1217_v49  ;;  %v1142_v34 = vpop.f32.mrf.mxu1 }
 0x188   : > { %v2767_v0 = vpop.f32.mrf.mxu0  ;;  %v1218_v56 = vadd.f32 %v1142_v34, %v6669_v29  ;;  %5672 = vmatmul.msk.bf16.gmra.mxu3 %vm399_vm1, %v2003_v28  ;;  %v5438_v29 = vld [vmem:[%s6466_s25 + $0xa0] sm:$0xf] }
 0x189   : > { %v2202_v42 = vadd.f32 %v6902_v33, %v1710_v63  ;;  %v6308_v33 = vld [vmem:[%s6466_s25 + $0xa8] sm:$0x30]  ;;  %v2635_v63 = vsel %vm2456_vm4, %v2625_v18, %v6979_v47  ;;  %v6997_v48 = vor.u32 %v6245_v30, %v5438_v29  ;;  %v1009_v30 = vshrl.u32 %v6965_v17, 16 }
 0x18a   : > { %v5757_v34 = vor.u32 %v6308_v33, %v5756_v21 }
 0x18b   : > { %v6975_v25 = vadd.f32 %v2765_v58, %v2202_v42  ;;  %v1008_v58 = vsel %vm852_vm3, %v1003_v40, %v1007_v37  ;;  %v6990_v2 = vpop.f32.mrf.mxu3  ;;  %v5995_v40 = vor.u32 %v6351_v61, %v5994_v20  ;;  %v1011_v17 = vor.u32 %v1009_v30, %v1007_v37  ;;  %v6353_v30 = vld [vmem:[%s6466_s25 + $0x20] sm:$0xff] }
 0x18c   : > { %v2637_v18 = vshrl.u32 %v5757_v34, 16 }
 0x18d   : > { %7708 = vst [vmem:[#allocation14_spill] sm:$0xff] %v6975_v25  ;;  %v4083_v33 = vshrl.u32 %v5995_v40, 16 }
 0x18e   : > { %v1635_v59 = vpop.f32.mrf.mxu2  ;;  %v2639_v25 = vrot.slane %v2637_v18, 1 }
 0x18f   : > { %v1711_v55 = vadd.f32 %v1635_v59, %v1218_v56  ;;  %v1145_v49 = vpop.f32.mrf.mxu1  ;;  %v2640_v59 = vshll.u32 %v5757_v34, 16 }
 0x190   : > { %v2770_v19 = vpop.f32.mrf.mxu0  ;;  %v1219_v56 = vadd.f32 %v1145_v49, %v6679_v51 }
 0x191   : > { %v2203_v28 = vadd.f32 %v6917_v10, %v1711_v55  ;;  %v6352_v10 = vld [vmem:[%s6466_s25 + $0x18] sm:$0xff]  ;;  %v4086_v55 = vshll.u32 %v5995_v40, 16  ;;  %v2642_v40 = vrot.slane %v2640_v59, 2 }
 0x192   : > { %5458 = vmatmul.msk.bf16.gmra.mxu1 %vm399_vm1, %v1008_v58  ;;  %v4091_v58 = vshrl.u32 %v6352_v10, 16 }
 0x193   : > { %5564 = vmatmul.msk.bf16.gmra.mxu2 %vm399_vm1, %v1510_v8  ;;  %v7001_v42 = vadd.f32 %v2767_v0, %v2203_v28  ;;  %5776 = vmatmul.msk.bf16.gmra.mxu0 %vm399_vm1, %v2635_v63  ;;  %v4094_v8 = vshll.u32 %v6352_v10, 16  ;;  %v1013_v0 = vshll.u32 %v6997_v48, 16  ;;  %v5545_v28 = vor.u32 %v6266_v12, %v5544_v31  ;;  %v7010_v9 = vpop.f32.mrf.mxu3 }
 0x194   : > { %v4088_v20 = vrot.slane %v4086_v55, 3  ;;  %v4093_v61 = vrot.slane %v4091_v58, 2  ;;  %v2643_v55 = vor.u32 %v2642_v40, %v2639_v25 }
 0x195   : > { %7709 = vst [vmem:[#allocation15_spill] sm:$0xff] %v7001_v42  ;;  %v4085_v42 = vrot.slane %v4083_v33, 2  ;;  %v4096_v51 = vrot.slane %v4094_v8, 3  ;;  %v1015_v32 = vrot.slane %v1013_v0, 1  ;;  %v1511_v31 = vrot.slane %v5545_v28, 1 }
 0x196   : > { %v1638_v21 = vpop.f32.mrf.mxu2  ;;  %v4100_v28 = vshrl.u32 %v6353_v30, 16 }
 0x197   : > { %v1712_v29 = vadd.f32 %v1638_v21, %v1219_v56  ;;  %v1147_v63 = vpop.f32.mrf.mxu1  ;;  %v4089_v10 = vor.u32 %v4088_v20, %v4085_v42  ;;  %v4097_v56 = vor.u32 %v4096_v51, %v4093_v61  ;;  %v1016_v59 = vsel %vm852_vm3, %v1011_v17, %v1015_v32 }
 0x198   : > { %v2772_v34 = vpop.f32.mrf.mxu0  ;;  %v1220_v33 = vadd.f32 %v1147_v63, %v6695_v6  ;;  %v7710_v42 = vrot.slane %v6970_v7, 1  ;;  %v2644_v6 = vsel %vm2456_vm4, %v6979_v47, %v2643_v55  ;;  %v4103_v63 = vshll.u32 %v6353_v30, 16  ;;  %v6372_v30 = vld [vmem:[%s6466_s25 + $0x10] sm:$0xf0] }
 0x199   : > { %v2204_v49 = vadd.f32 %v6929_v36, %v1712_v29  ;;  %v4098_v12 = vsel %vm4081_vm5, %v4089_v10, %v4097_v56  ;;  %v4102_v51 = vrot.slane %v4100_v28, 2 }
 0x19a   : > { %6076 = vmatmul.msk.bf16.vlgmr.msra.gmra.mxu3 %vm399_vm1, %v4098_v12  ;;  %v4105_v47 = vrot.slane %v4103_v63, 3 }
 0x19b   : > { %v7013_v21 = vadd.f32 %v2770_v19, %v2204_v49  ;;  %v1512_v19 = vsel %vm1471_vm2, %v7710_v42, %v1511_v31  ;;  %v7022_v37 = vpop.f32.mrf.mxu3  ;;  %v6354_v42 = vld [vmem:[%s6466_s25 + $0x28] sm:$0xff] }
 0x19c   : > { %v4106_v10 = vor.u32 %v4105_v47, %v4102_v51 }
 0x19e   : > { %v1640_v36 = vpop.f32.mrf.mxu2 }
 0x19f   : > { %v1713_v58 = vadd.f32 %v1640_v36, %v1220_v33  ;;  %v1150_v18 = vpop.f32.mrf.mxu1 }
 0x1a0   : > { %v2775_v29 = vpop.f32.mrf.mxu0  ;;  %v1221_v7 = vadd.f32 %v1150_v18, %v6707_v38  ;;  %v4107_v38 = vsel %vm4081_vm5, %v4097_v56, %v4106_v10  ;;  %v5782_v56 = vld [vmem:[%s6466_s25 + $0x8] sm:$0xc] }
 0x1a1   : > { %v2205_v8 = vadd.f32 %v6944_v3, %v1713_v58 }
 0x1a2   : > { %5459 = vmatmul.msk.bf16.gmra.mxu1 %vm399_vm1, %v1016_v59 }
 0x1a3   : > { %5565 = vmatmul.msk.bf16.gmra.mxu2 %vm399_vm1, %v1512_v19  ;;  %v7029_v25 = vadd.f32 %v2772_v34, %v2205_v8  ;;  %5777 = vmatmul.msk.bf16.gmra.mxu0 %vm399_vm1, %v2644_v6  ;;  %v7034_v61 = vpop.f32.mrf.mxu3  ;;  %v1017_v34 = vshrl.u32 %v6997_v48, 16  ;;  %v5888_v8 = vld [vmem:[%s6466_s25 + $0x10] sm:$0xc] }
 0x1a6   : > { %v1643_v0 = vpop.f32.mrf.mxu2 }
 0x1a7   : > { %v1714_v20 = vadd.f32 %v1643_v0, %v1221_v7  ;;  %v1152_v3 = vpop.f32.mrf.mxu1  ;;  %v4109_v7 = vshrl.u32 %v6354_v42, 16  ;;  %v4112_v0 = vshll.u32 %v6354_v42, 16 }
 0x1a8   : > { %v2777_v40 = vpop.f32.mrf.mxu0  ;;  %v1222_v12 = vadd.f32 %v1152_v3, %v6723_v45 }
 0x1a9   : > { %v2206_v49 = vadd.f32 %v6954_v4, %v1714_v20  ;;  %v1019_v4 = vor.u32 %v1017_v34, %v1015_v32  ;;  %v6309_v32 = vld [vmem:[%s6466_s25 + $0x8] sm:$0xf0]  ;;  %v7060_v20 = vld [vmem:[%s6466_s25 + $0x10] sm:$0xff]  ;;  %v4111_v47 = vrot.slane %v4109_v7, 2  ;;  %v6373_v34 = vld [vmem:[%s6466_s25 + $0x18] sm:$0xff] }
 0x1aa   : > { %6077 = vmatmul.msk.bf16.gmra.mxu3 %vm399_vm1, %v4107_v38  ;;  %v5783_v28 = vor.u32 %v6309_v32, %v5782_v56 }
 0x1ab   : > { %v7038_v17 = vadd.f32 %v2775_v29, %v2206_v49  ;;  %v7043_v48 = vpop.f32.mrf.mxu3  ;;  %v6330_v29 = vld [vmem:[%s6466_s25 + $0x10] sm:$0xf0] }
 0x1ac   : > { %v5889_v3 = vor.u32 %v6330_v29, %v5888_v8 }
 0x1ae   : > { %v1645_v33 = vpop.f32.mrf.mxu2 }
 0x1af   : > { %v1715_v36 = vadd.f32 %v1645_v33, %v1222_v12  ;;  %v1155_v58 = vpop.f32.mrf.mxu1  ;;  %v3097_v33 = vrot.slane %v5783_v28, 2 }
 0x1b0   : > { %v2780_v59 = vpop.f32.mrf.mxu0  ;;  %v1223_v19 = vadd.f32 %v1155_v58, %v6585_v1  ;;  %v4114_v1 = vrot.slane %v4112_v0, 3  ;;  %v3589_v58 = vrot.slane %v5889_v3, 2  ;;  %v6355_v0 = vld [vmem:[%s6466_s25 + $0x30] sm:$0xff]  ;;  %v6311_v3 = vld [vmem:[%s6466_s25 + $0x18] sm:$0xff] }
 0x1b1   : > { %v2207_v18 = vadd.f32 %v6972_v41, %v1715_v36  ;;  %v6100_v41 = vld [vmem:[%s6466_s25 + $0x10] sm:$0x8] }
 0x1b2   : > { %5460 = vmatmul.msk.bf16.gmra.mxu1 %vm399_vm1, %v1019_v4  ;;  %v6101_v38 = vor.u32 %v6372_v30, %v6100_v41  ;;  %v4115_v12 = vor.u32 %v4114_v1, %v4111_v47  ;;  %v3098_v4 = vrot.slane %v7060_v20, 2  ;;  %v4121_v20 = vshll.u32 %v6355_v0, 16  ;;  %v6332_v47 = vld [vmem:[%s6466_s25 + $0x20] sm:$0xff] }
 0x1b3   : > { %5566 = vmatmul.msk.bf16.gmra.mxu2 %vm399_vm1, %v1511_v31  ;;  %v7048_v45 = vadd.f32 %v2777_v40, %v2207_v18  ;;  %5778 = vmatmul.msk.bf16.gmra.mxu0 %vm399_vm1, %v2643_v55  ;;  %v7063_v55 = vld [vmem:[%s6466_s25 + $0x18] sm:$0xff]  ;;  %v7065_v51 = vpop.f32.mrf.mxu3 }
 0x1b4   : > { %v3590_v18 = vrot.slane %v7063_v55, 2  ;;  %v4116_v56 = vsel %vm4081_vm5, %v4106_v10, %v4115_v12  ;;  %v4722_v42 = vrot.slane %v6101_v38, 3  ;;  %v3099_v29 = vsel %vm3096_vm6, %v3097_v33, %v3098_v4  ;;  %v6374_v33 = vld [vmem:[%s6466_s25 + $0x20] sm:$0xff] }
 0x1b6   : > { %v1648_v6 = vpop.f32.mrf.mxu2 }
 0x1b7   : > { %v1716_v31 = vadd.f32 %v1648_v6, %v1223_v19  ;;  %v1157_v63 = vpop.f32.mrf.mxu1  ;;  %v4723_v19 = vrot.slane %v6373_v34, 3  ;;  %v3591_v6 = vsel %vm3096_vm6, %v3589_v58, %v3590_v18  ;;  %v4123_v34 = vrot.slane %v4121_v20, 3 }
 0x1b8   : > { %v2782_v40 = vpop.f32.mrf.mxu0  ;;  %v1224_v32 = vadd.f32 %v1157_v63, %v6595_v16  ;;  %v4118_v63 = vshrl.u32 %v6355_v0, 16 }
 0x1b9   : > { %v2208_v49 = vadd.f32 %v6990_v2, %v1716_v31  ;;  %v4724_v30 = vsel %vm4721_vm7, %v4722_v42, %v4723_v19 }
 0x1ba   : > { %6078 = vmatmul.msk.bf16.gmra.mxu3 %vm399_vm1, %v4116_v56 }
 0x1bb   : > { %v7069_v36 = vadd.f32 %v2780_v59, %v2208_v49  ;;  %v7078_v41 = vpop.f32.mrf.mxu3  ;;  %v4120_v49 = vrot.slane %v4118_v63, 2 }
 0x1bd   : > { %v4124_v58 = vor.u32 %v4123_v34, %v4120_v49 }
 0x1be   : > { %v1650_v2 = vpop.f32.mrf.mxu2 }
 0x1bf   : > { %v1717_v8 = vadd.f32 %v1650_v2, %v1224_v32  ;;  %v1160_v59 = vpop.f32.mrf.mxu1  ;;  %v3100_v32 = vrot.slane %v6311_v3, 2  ;;  %v4125_v42 = vsel %vm4081_vm5, %v4115_v12, %v4124_v58 }
 0x1c0   : > { %v2785_v10 = vpop.f32.mrf.mxu0  ;;  %v1225_v31 = vadd.f32 %v1160_v59, %v6611_v27  ;;  %v3592_v27 = vrot.slane %v6332_v47, 2 }
 0x1c1   : > { %v2209_v16 = vadd.f32 %v7010_v9, %v1717_v8  ;;  %v4725_v8 = vrot.slane %v6374_v33, 3 }
 0x1c2   : > { %5864 = vmatmul.msk.bf16.vlgmr.msra.gmra.mxu1 %vm399_vm1, %v3099_v29 }
 0x1c3   : > { %5970 = vmatmul.msk.bf16.vlgmr.msra.gmra.mxu2 %vm399_vm1, %v3591_v6  ;;  %v7084_v7 = vadd.f32 %v2782_v40, %v2209_v16  ;;  %6182 = vmatmul.msk.bf16.vlgmr.msra.gmra.mxu0 %vm399_vm1, %v4724_v30  ;;  %v7091_v1 = vpop.f32.mrf.mxu3  ;;  %v3593_v16 = vsel %vm3096_vm6, %v3590_v18, %v3592_v27 }
 0x1c6   : > { %v1653_v28 = vpop.f32.mrf.mxu2 }
 0x1c7   : > { %v1718_v55 = vadd.f32 %v1653_v28, %v1225_v31  ;;  %v1162_v9 = vpop.f32.mrf.mxu1 }
 0x1c8   : > { %v2787_v38 = vpop.f32.mrf.mxu0  ;;  %v1226_v2 = vadd.f32 %v1162_v9, %v6623_v43  ;;  %v4726_v43 = vsel %vm4721_vm7, %v4723_v19, %v4725_v8  ;;  %v6333_v9 = vld [vmem:[%s6466_s25 + $0x28] sm:$0xff] }
 0x1c9   : > { %v2210_v40 = vadd.f32 %v7022_v37, %v1718_v55  ;;  %v3101_v37 = vsel %vm3096_vm6, %v3098_v4, %v3100_v32  ;;  %v6356_v4 = vld [vmem:[%s6466_s25 + $0x38] sm:$0xff]  ;;  %v6312_v55 = vld [vmem:[%s6466_s25 + $0x20] sm:$0xff] }
 0x1ca   : > { %6079 = vmatmul.msk.bf16.gmra.mxu3 %vm399_vm1, %v4125_v42  ;;  %v4127_v28 = vshrl.u32 %v6356_v4, 16  ;;  %v4130_v63 = vshll.u32 %v6356_v4, 16  ;;  %v3102_v42 = vrot.slane %v6312_v55, 2 }
 0x1cb   : > { %v7095_v56 = vadd.f32 %v2785_v10, %v2210_v40  ;;  %v7102_v10 = vpop.f32.mrf.mxu3  ;;  %v6375_v40 = vld [vmem:[%s6466_s25 + $0x28] sm:$0xff] }
 0x1cc   : > { %v4129_v3 = vrot.slane %v4127_v28, 2  ;;  %v4132_v47 = vrot.slane %v4130_v63, 3 }
 0x1ce   : > { %v1655_v59 = vpop.f32.mrf.mxu2 }
 0x1cf   : > { %v1719_v29 = vadd.f32 %v1655_v59, %v1226_v2  ;;  %v1165_v6 = vpop.f32.mrf.mxu1 }
 0x1d0   : > { %v2790_v12 = vpop.f32.mrf.mxu0  ;;  %v1227_v18 = vadd.f32 %v1165_v6, %v6639_v54  ;;  %v3594_v54 = vrot.slane %v6333_v9, 2 }
 0x1d1   : > { %v2211_v30 = vadd.f32 %v7034_v61, %v1719_v29  ;;  %v4727_v29 = vrot.slane %v6375_v40, 3 }
 0x1d2   : > { %5865 = vmatmul.msk.bf16.gmra.mxu1 %vm399_vm1, %v3101_v37 }
 0x1d3   : > { %5971 = vmatmul.msk.bf16.gmra.mxu2 %vm399_vm1, %v3593_v16  ;;  %v7108_v0 = vadd.f32 %v2787_v38, %v2211_v30  ;;  %6183 = vmatmul.msk.bf16.gmra.mxu0 %vm399_vm1, %v4726_v43  ;;  %v7115_v19 = vpop.f32.mrf.mxu3  ;;  %v4133_v38 = vor.u32 %v4132_v47, %v4129_v3  ;;  %v3595_v30 = vsel %vm3096_vm6, %v3592_v27, %v3594_v54 }
 0x1d5   : > { %v4134_v2 = vsel %vm4081_vm5, %v4124_v58, %v4133_v38 }
 0x1d6   : > { %v1658_v31 = vpop.f32.mrf.mxu2 }
 0x1d7   : > { %v1720_v20 = vadd.f32 %v1658_v31, %v1227_v18  ;;  %v1167_v61 = vpop.f32.mrf.mxu1 }
 0x1d8   : > { %v2792_v34 = vpop.f32.mrf.mxu0  ;;  %v1228_v59 = vadd.f32 %v1167_v61, %v6651_v11  ;;  %v4728_v11 = vsel %vm4721_vm7, %v4725_v8, %v4727_v29  ;;  %v6334_v61 = vld [vmem:[%s6466_s25 + $0x30] sm:$0xff] }
 0x1d9   : > { %v2212_v49 = vadd.f32 %v7043_v48, %v1720_v20  ;;  %v3103_v48 = vsel %vm3096_vm6, %v3100_v32, %v3102_v42  ;;  %v6357_v32 = vld [vmem:[%s6466_s25 + $0x40] sm:$0xff]  ;;  %v6313_v20 = vld [vmem:[%s6466_s25 + $0x28] sm:$0xff] }
 0x1da   : > { %6080 = vmatmul.msk.bf16.gmra.mxu3 %vm399_vm1, %v4134_v2  ;;  %v4136_v31 = vshrl.u32 %v6357_v32, 16  ;;  %v4139_v28 = vshll.u32 %v6357_v32, 16  ;;  %v3104_v2 = vrot.slane %v6313_v20, 2  ;;  %v6335_v20 = vld [vmem:[%s6466_s25 + $0x38] sm:$0xff] }
 0x1db   : > { %v7119_v33 = vadd.f32 %v2790_v12, %v2212_v49  ;;  %v7126_v12 = vpop.f32.mrf.mxu3  ;;  %v6376_v49 = vld [vmem:[%s6466_s25 + $0x30] sm:$0xff] }
 0x1dc   : > { %v4138_v55 = vrot.slane %v4136_v31, 2  ;;  %v4141_v9 = vrot.slane %v4139_v28, 3 }
 0x1de   : > { %v1660_v6 = vpop.f32.mrf.mxu2 }
 0x1df   : > { %v1721_v37 = vadd.f32 %v1660_v6, %v1228_v59  ;;  %v1170_v16 = vpop.f32.mrf.mxu1 }
 0x1e0   : > { %v2795_v58 = vpop.f32.mrf.mxu0  ;;  %v1229_v27 = vadd.f32 %v1170_v16, %v6667_v26  ;;  %v3596_v26 = vrot.slane %v6334_v61, 2 }
 0x1e1   : > { %v2213_v43 = vadd.f32 %v7065_v51, %v1721_v37  ;;  %v4729_v37 = vrot.slane %v6376_v49, 3 }
 0x1e2   : > { %5866 = vmatmul.msk.bf16.gmra.mxu1 %vm399_vm1, %v3103_v48 }
 0x1e3   : > { %5972 = vmatmul.msk.bf16.gmra.mxu2 %vm399_vm1, %v3595_v30  ;;  %v7132_v4 = vadd.f32 %v2792_v34, %v2213_v43  ;;  %6184 = vmatmul.msk.bf16.gmra.mxu0 %vm399_vm1, %v4728_v11  ;;  %v7139_v8 = vpop.f32.mrf.mxu3  ;;  %v4142_v34 = vor.u32 %v4141_v9, %v4138_v55  ;;  %v3597_v43 = vsel %vm3096_vm6, %v3594_v54, %v3596_v26  ;;  %v7711_v54 = vld [vmem:[#allocation8_spill] sm:$0xff] }
 0x1e5   : > { %v4143_v59 = vsel %vm4081_vm5, %v4133_v38, %v4142_v34 }
 0x1e6   : > { %v1663_v18 = vpop.f32.mrf.mxu2 }
 0x1e7   : > { %v1722_v63 = vadd.f32 %v1663_v18, %v1229_v27  ;;  %v1172_v51 = vpop.f32.mrf.mxu1 }
 0x1e8   : > { %v2797_v47 = vpop.f32.mrf.mxu0  ;;  %v1230_v6 = vadd.f32 %v1172_v51, %v6677_v50  ;;  %v4730_v50 = vsel %vm4721_vm7, %v4727_v29, %v4729_v37  ;;  %v6314_v51 = vld [vmem:[%s6466_s25 + $0x30] sm:$0xff] }
 0x1e9   : > { %v2214_v3 = vadd.f32 %v7078_v41, %v1722_v63  ;;  %v3105_v41 = vsel %vm3096_vm6, %v3102_v42, %v3104_v2  ;;  %v6358_v42 = vld [vmem:[%s6466_s25 + $0x48] sm:$0xff] }
 0x1ea   : > { %6081 = vmatmul.msk.bf16.gmra.mxu3 %vm399_vm1, %v4143_v59  ;;  %v4145_v31 = vshrl.u32 %v6358_v42, 16  ;;  %v4148_v28 = vshll.u32 %v6358_v42, 16 }
 0x1eb   : > { %v7143_v40 = vadd.f32 %v2795_v58, %v2214_v3  ;;  %v7150_v58 = vpop.f32.mrf.mxu3 }
 0x1ec   : > { %v4147_v61 = vrot.slane %v4145_v31, 2  ;;  %v4150_v55 = vrot.slane %v4148_v28, 3 }
 0x1ee   : > { %v1665_v16 = vpop.f32.mrf.mxu2  ;;  %v4151_v49 = vor.u32 %v4150_v55, %v4147_v61  ;;  %v6315_v61 = vld [vmem:[%s6466_s25 + $0x38] sm:$0xff]  ;;  %v6336_v55 = vld [vmem:[%s6466_s25 + $0x40] sm:$0xff] }
 0x1ef   : > { %v1723_v48 = vadd.f32 %v1665_v16, %v1230_v6  ;;  %v1175_v30 = vpop.f32.mrf.mxu1  ;;  %v3106_v6 = vrot.slane %v6314_v51, 2  ;;  %v3598_v16 = vrot.slane %v6335_v20, 2 }
 0x1f0   : > { %v2800_v38 = vpop.f32.mrf.mxu0  ;;  %v1231_v27 = vadd.f32 %v1175_v30, %v7711_v54  ;;  %v7712_v30 = vld [vmem:[#allocation9_spill] sm:$0xff] }
 0x1f1   : > { %v2215_v11 = vadd.f32 %v7091_v1, %v1723_v48  ;;  %v4152_v48 = vsel %vm4081_vm5, %v4142_v34, %v4151_v49  ;;  %v3599_v54 = vsel %vm3096_vm6, %v3596_v26, %v3598_v16  ;;  %v7713_v26 = vld [vmem:[#allocation10_spill] sm:$0xff] }
 0x1f2   : > { %5867 = vmatmul.msk.bf16.gmra.mxu1 %vm399_vm1, %v3105_v41 }
 0x1f3   : > { %5973 = vmatmul.msk.bf16.gmra.mxu2 %vm399_vm1, %v3597_v43  ;;  %v7156_v32 = vadd.f32 %v2797_v47, %v2215_v11  ;;  %6185 = vmatmul.msk.bf16.gmra.mxu0 %vm399_vm1, %v4730_v50  ;;  %v7163_v29 = vpop.f32.mrf.mxu3  ;;  %v6377_v47 = vld [vmem:[%s6466_s25 + $0x38] sm:$0xff] }
 0x1f4   : > { %v4731_v43 = vrot.slane %v6377_v47, 3 }
 0x1f6   : > { %v1668_v18 = vpop.f32.mrf.mxu2 }
 0x1f7   : > { %v1724_v63 = vadd.f32 %v1668_v18, %v1231_v27  ;;  %v1177_v1 = vpop.f32.mrf.mxu1  ;;  %v4732_v18 = vsel %vm4721_vm7, %v4729_v37, %v4731_v43 }
 0x1f8   : > { %v2802_v3 = vpop.f32.mrf.mxu0  ;;  %v1232_v41 = vadd.f32 %v1177_v1, %v7712_v30  ;;  %v6378_v30 = vld [vmem:[%s6466_s25 + $0x40] sm:$0xff] }
 0x1f9   : > { %v2216_v9 = vadd.f32 %v7102_v10, %v1724_v63  ;;  %v3107_v10 = vsel %vm3096_vm6, %v3104_v2, %v3106_v6  ;;  %v6359_v2 = vld [vmem:[%s6466_s25 + $0x50] sm:$0xff] }
 0x1fa   : > { %6082 = vmatmul.msk.bf16.gmra.mxu3 %vm399_vm1, %v4152_v48  ;;  %v4154_v1 = vshrl.u32 %v6359_v2, 16  ;;  %v4157_v51 = vshll.u32 %v6359_v2, 16 }
 0x1fb   : > { %v7167_v59 = vadd.f32 %v2800_v38, %v2216_v9  ;;  %v7174_v38 = vpop.f32.mrf.mxu3 }
 0x1fc   : > { %v4156_v9 = vrot.slane %v4154_v1, 2  ;;  %v4159_v47 = vrot.slane %v4157_v51, 3 }
 0x1fe   : > { %v1670_v11 = vpop.f32.mrf.mxu2 }
 0x1ff   : > { %v1725_v50 = vadd.f32 %v1670_v11, %v1232_v41  ;;  %v1180_v42 = vpop.f32.mrf.mxu1  ;;  %v4160_v41 = vor.u32 %v4159_v47, %v4156_v9 }
 0x200   : > { %v2805_v34 = vpop.f32.mrf.mxu0  ;;  %v1233_v28 = vadd.f32 %v1180_v42, %v7713_v26  ;;  %v3600_v42 = vrot.slane %v6336_v55, 2 }
 0x201   : > { %v2217_v27 = vadd.f32 %v7115_v19, %v1725_v50  ;;  %v3108_v50 = vrot.slane %v6315_v61, 2 }
 0x202   : > { %5868 = vmatmul.msk.bf16.gmra.mxu1 %vm399_vm1, %v3107_v10  ;;  %v4161_v10 = vsel %vm4081_vm5, %v4151_v49, %v4160_v41 }
 0x203   : > { %5974 = vmatmul.msk.bf16.gmra.mxu2 %vm399_vm1, %v3599_v54  ;;  %v7180_v31 = vadd.f32 %v2802_v3, %v2217_v27  ;;  %6186 = vmatmul.msk.bf16.gmra.mxu0 %vm399_vm1, %v4732_v18  ;;  %v7187_v37 = vpop.f32.mrf.mxu3  ;;  %v7714_v54 = vld [vmem:[#allocation11_spill] sm:$0xff]  ;;  %v4733_v18 = vrot.slane %v6378_v30, 3  ;;  %v6337_v30 = vld [vmem:[%s6466_s25 + $0x48] sm:$0xff] }
 0x205   : > { %v4734_v51 = vsel %vm4721_vm7, %v4731_v43, %v4733_v18 }
 0x206   : > { %v1673_v63 = vpop.f32.mrf.mxu2 }
 0x207   : > { %v1726_v20 = vadd.f32 %v1673_v63, %v1233_v28  ;;  %v1182_v19 = vpop.f32.mrf.mxu1  ;;  %v3601_v63 = vsel %vm3096_vm6, %v3598_v16, %v3600_v42  ;;  %v7715_v16 = vld [vmem:[#allocation3_spill] sm:$0xff] }
 0x208   : > { %v2807_v48 = vpop.f32.mrf.mxu0  ;;  %v1234_v27 = vadd.f32 %v1182_v19, %v7714_v54 }
 0x209   : > { %v2218_v3 = vadd.f32 %v7126_v12, %v1726_v20  ;;  %v3109_v12 = vsel %vm3096_vm6, %v3106_v6, %v3108_v50  ;;  %v6360_v6 = vld [vmem:[%s6466_s25 + $0x58] sm:$0xff] }
 0x20a   : > { %6083 = vmatmul.msk.bf16.gmra.mxu3 %vm399_vm1, %v4161_v10  ;;  %v4163_v55 = vshrl.u32 %v6360_v6, 16  ;;  %v4166_v9 = vshll.u32 %v6360_v6, 16 }
 0x20b   : > { %v7191_v11 = vadd.f32 %v2805_v34, %v2218_v3  ;;  %v7198_v34 = vpop.f32.mrf.mxu3  ;;  %v6316_v3 = vld [vmem:[%s6466_s25 + $0x40] sm:$0xff] }
 0x20c   : > { %v4165_v10 = vrot.slane %v4163_v55, 2  ;;  %v4168_v54 = vrot.slane %v4166_v9, 3 }
 0x20e   : > { %v1675_v2 = vpop.f32.mrf.mxu2 }
 0x20f   : > { %v1727_v26 = vadd.f32 %v1675_v2, %v1234_v27  ;;  %v1185_v28 = vpop.f32.mrf.mxu1  ;;  %v6379_v2 = vld [vmem:[%s6466_s25 + $0x48] sm:$0xff] }
 0x210   : > { %v2810_v49 = vpop.f32.mrf.mxu0  ;;  %v1235_v19 = vadd.f32 %v1185_v28, %v7715_v16  ;;  %v4735_v16 = vrot.slane %v6379_v2, 3  ;;  %v6317_v2 = vld [vmem:[%s6466_s25 + $0x48] sm:$0xff] }
 0x211   : > { %v2219_v1 = vadd.f32 %v7139_v8, %v1727_v26  ;;  %v4169_v26 = vor.u32 %v4168_v54, %v4165_v10 }
 0x212   : > { %5869 = vmatmul.msk.bf16.gmra.mxu1 %vm399_vm1, %v3109_v12 }
 0x213   : > { %5975 = vmatmul.msk.bf16.gmra.mxu2 %vm399_vm1, %v3601_v63  ;;  %v7204_v20 = vadd.f32 %v2807_v48, %v2219_v1  ;;  %6187 = vmatmul.msk.bf16.gmra.mxu0 %vm399_vm1, %v4734_v51  ;;  %v2182_v43 = vpop.f32.mrf.mxu3  ;;  %v3110_v63 = vrot.slane %v6316_v3, 2  ;;  %v3602_v1 = vrot.slane %v6337_v30, 2  ;;  %v4170_v28 = vsel %vm4081_vm5, %v4160_v41, %v4169_v26  ;;  %v7716_v51 = vld [vmem:[#allocation4_spill] sm:$0xff] }
 0x215   : > { %v3603_v9 = vsel %vm3096_vm6, %v3600_v42, %v3602_v1  ;;  %v7717_v42 = vld [vmem:[#allocation5_spill] sm:$0xff] }
 0x216   : > { %v1678_v61 = vpop.f32.mrf.mxu2 }
 0x217   : > { %v1728_v47 = vadd.f32 %v1678_v61, %v1235_v19  ;;  %v1187_v8 = vpop.f32.mrf.mxu1 }
 0x218   : > { %v2812_v48 = vpop.f32.mrf.mxu0  ;;  %v1236_v6 = vadd.f32 %v1187_v8, %v7716_v51  ;;  %v4736_v8 = vsel %vm4721_vm7, %v4733_v18, %v4735_v16 }
 0x219   : > { %v2220_v27 = vadd.f32 %v7150_v58, %v1728_v47  ;;  %v3111_v58 = vsel %vm3096_vm6, %v3108_v50, %v3110_v63  ;;  %v6361_v50 = vld [vmem:[%s6466_s25 + $0x60] sm:$0xff] }
 0x21a   : > { %6084 = vmatmul.msk.bf16.gmra.mxu3 %vm399_vm1, %v4170_v28  ;;  %v4172_v10 = vshrl.u32 %v6361_v50, 16  ;;  %v4175_v54 = vshll.u32 %v6361_v50, 16  ;;  %v6338_v28 = vld [vmem:[%s6466_s25 + $0x50] sm:$0xff]  ;;  %v7718_v50 = vld [vmem:[#allocation6_spill] sm:$0xff] }
 0x21b   : > { %v7213_v12 = vadd.f32 %v2810_v49, %v2220_v27 }
 0x21c   : > { %v4174_v51 = vrot.slane %v4172_v10, 2 }
 0x21d   : > { %v7220_v49 = vpop.f32.mrf.mxu3 }
 0x21e   : > { %v1680_v19 = vpop.f32.mrf.mxu2 }
 0x21f   : > { %v1729_v61 = vadd.f32 %v1680_v19, %v1236_v6  ;;  %v1190_v55 = vpop.f32.mrf.mxu1  ;;  %v4177_v6 = vrot.slane %v4175_v54, 3 }
 0x220   : > { %v2815_v41 = vpop.f32.mrf.mxu0  ;;  %v1237_v30 = vadd.f32 %v1190_v55, %v7717_v42  ;;  %v3604_v55 = vrot.slane %v6338_v28, 2 }
 0x221   : > { %v2221_v47 = vadd.f32 %v7163_v29, %v1729_v61  ;;  %v6380_v61 = vld [vmem:[%s6466_s25 + $0x50] sm:$0xff] }
 0x222   : > { %5870 = vmatmul.msk.bf16.gmra.mxu1 %vm399_vm1, %v3111_v58  ;;  %v4178_v58 = vor.u32 %v4177_v6, %v4174_v51 }
 0x223   : > { %5976 = vmatmul.msk.bf16.gmra.mxu2 %vm399_vm1, %v3603_v9  ;;  %v7226_v3 = vadd.f32 %v2812_v48, %v2221_v47  ;;  %6188 = vmatmul.msk.bf16.gmra.mxu0 %vm399_vm1, %v4736_v8  ;;  %v3112_v47 = vrot.slane %v6317_v2, 2 }
 0x224   : > { %v4179_v8 = vsel %vm4081_vm5, %v4169_v26, %v4178_v58 }
 0x225   : > { %v7233_v18 = vpop.f32.mrf.mxu3 }
 0x226   : > { %v1683_v43 = vpop.f32.mrf.mxu2 }
 0x227   : > { %v1730_v27 = vadd.f32 %v1683_v43, %v1237_v30  ;;  %v1192_v29 = vpop.f32.mrf.mxu1  ;;  %v4737_v30 = vrot.slane %v6380_v61, 3 }
 0x228   : > { %v2817_v19 = vpop.f32.mrf.mxu0  ;;  %v1238_v42 = vadd.f32 %v1192_v29, %v7718_v50  ;;  %v6318_v50 = vld [vmem:[%s6466_s25 + $0x50] sm:$0xff] }
 0x229   : > { %v2222_v48 = vadd.f32 %v7174_v38, %v1730_v27  ;;  %v3113_v38 = vsel %vm3096_vm6, %v3110_v63, %v3112_v47  ;;  %v3605_v27 = vsel %vm3096_vm6, %v3602_v1, %v3604_v55  ;;  %v4738_v29 = vsel %vm4721_vm7, %v4735_v16, %v4737_v30  ;;  %v6362_v63 = vld [vmem:[%s6466_s25 + $0x68] sm:$0xff]  ;;  %v7719_v1 = vld [vmem:[#allocation7_spill] sm:$0xff] }
 0x22a   : > { %6085 = vmatmul.msk.bf16.gmra.mxu3 %vm399_vm1, %v4179_v8  ;;  %v4184_v61 = vshll.u32 %v6362_v63, 16 }
 0x22b   : > { %v7237_v9 = vadd.f32 %v2815_v41, %v2222_v48  ;;  %v4181_v48 = vshrl.u32 %v6362_v63, 16 }
 0x22d   : > { %v7244_v41 = vpop.f32.mrf.mxu3 }
 0x22e   : > { %v1685_v43 = vpop.f32.mrf.mxu2 }
 0x22f   : > { %v1731_v10 = vadd.f32 %v1685_v43, %v1238_v42  ;;  %v1195_v54 = vpop.f32.mrf.mxu1  ;;  %v6339_v42 = vld [vmem:[%s6466_s25 + $0x58] sm:$0xff]  ;;  %v4183_v43 = vrot.slane %v4181_v48, 2 }
 0x230   : > { %v2820_v26 = vpop.f32.mrf.mxu0  ;;  %v1239_v51 = vadd.f32 %v1195_v54, %v7719_v1  ;;  %v3114_v54 = vrot.slane %v6318_v50, 2  ;;  %v3606_v1 = vrot.slane %v6339_v42, 2 }
 0x231   : > { %v2223_v2 = vadd.f32 %v7187_v37, %v1731_v10  ;;  %v4186_v10 = vrot.slane %v4184_v61, 3 }
 0x232   : > { %5871 = vmatmul.msk.bf16.gmra.mxu1 %vm399_vm1, %v3113_v38  ;;  %v3115_v48 = vsel %vm3096_vm6, %v3112_v47, %v3114_v54 }
 0x233   : > { %5977 = vmatmul.msk.bf16.gmra.mxu2 %vm399_vm1, %v3605_v27  ;;  %v7250_v28 = vadd.f32 %v2817_v19, %v2223_v2  ;;  %6189 = vmatmul.msk.bf16.gmra.mxu0 %vm399_vm1, %v4738_v29  ;;  %v6381_v27 = vld [vmem:[%s6466_s25 + $0x58] sm:$0xff]  ;;  %v4187_v2 = vor.u32 %v4186_v10, %v4183_v43 }
 0x235   : > { %v7257_v16 = vpop.f32.mrf.mxu3  ;;  %v4188_v63 = vsel %vm4081_vm5, %v4178_v58, %v4187_v2  ;;  %v6363_v58 = vld [vmem:[%s6466_s25 + $0x70] sm:$0xff] }
 0x236   : > { %v1688_v6 = vpop.f32.mrf.mxu2  ;;  %v4190_v42 = vshrl.u32 %v6363_v58, 16  ;;  %v4193_v43 = vshll.u32 %v6363_v58, 16 }
 0x237   : > { %v1732_v8 = vadd.f32 %v1688_v6, %v1239_v51  ;;  %v1197_v37 = vpop.f32.mrf.mxu1  ;;  %v4739_v51 = vrot.slane %v6381_v27, 3 }
 0x238   : > { %v2822_v38 = vpop.f32.mrf.mxu0  ;;  %v4192_v27 = vrot.slane %v4190_v42, 2 }
 0x239   : > { %v2224_v19 = vadd.f32 %v7198_v34, %v1732_v8  ;;  %v3607_v34 = vsel %vm3096_vm6, %v3604_v55, %v3606_v1  ;;  %v4740_v8 = vsel %vm4721_vm7, %v4737_v30, %v4739_v51  ;;  %v7279_v38 = vld [vmem:[%s6466_s25 + $0x60] sm:$0xff] }
 0x23a   : > { %6086 = vmatmul.msk.bf16.gmra.mxu3 %vm399_vm1, %v4188_v63  ;;  %v4195_v63 = vrot.slane %v4193_v43, 3 }
 0x23b   : > { %v7261_v29 = vadd.f32 %v2820_v26, %v2224_v19  ;;  %v7276_v19 = vld [vmem:[%s6466_s25 + $0x58] sm:$0xff] }
 0x23c   : > { %v3116_v58 = vrot.slane %v7276_v19, 2 }
 0x23d   : > { %v7267_v61 = vpop.f32.mrf.mxu3 }
 0x23e   : > { %v1690_v6 = vpop.f32.mrf.mxu2 }
 0x23f   : > { %v3213_v37 = vpop.f32.mrf.mxu1 }
 0x240   : > { %v4838_v26 = vpop.f32.mrf.mxu0  ;;  %v3317_v50 = vadd.f32 %v3213_v37, %v6751_v23  ;;  %v7290_v37 = vld [vmem:[%s6466_s25 + $0x60] sm:$0xff] }
 0x241   : > { %v4741_v43 = vrot.slane %v7290_v37, 3 }
 0x242   : > { %5872 = vmatmul.msk.bf16.gmra.mxu1 %vm399_vm1, %v3115_v48  ;;  %v7287_v48 = vld [vmem:[%s7694_s2] ss:$0 sm:$0xff] }
 0x243   : > { %5978 = vmatmul.msk.bf16.gmra.mxu2 %vm399_vm1, %v3607_v34  ;;  %6190 = vmatmul.msk.bf16.gmra.mxu0 %vm399_vm1, %v4740_v8  ;;  %v4196_v34 = vor.u32 %v4195_v63, %v4192_v27 }
 0x245   : > { %v7281_v30 = vpop.f32.mrf.mxu3 }
 0x246   : > { %v3705_v47 = vpop.f32.mrf.mxu2 }
 0x247   : > { %v3809_v55 = vadd.f32 %v3705_v47, %v3317_v50  ;;  %v3215_v10 = vpop.f32.mrf.mxu1  ;;  %v3608_v50 = vrot.slane %v7279_v38, 2  ;;  %v4197_v47 = vsel %vm4081_vm5, %v4187_v2, %v4196_v34  ;;  %v3117_v2 = vsel %vm3096_vm6, %v3114_v54, %v3116_v58  ;;  %v6364_v54 = vld [vmem:[%s6466_s25 + $0x78] sm:$0xff] }
 0x248   : > { %v4840_v23 = vpop.f32.mrf.mxu0 }
 0x249   : > { %v4449_v6 = vadd.f32 %v7220_v49, %v3809_v55  ;;  %v3318_v49 = vadd.f32 %v3215_v10, %v6765_v5  ;;  %v3609_v27 = vsel %vm3096_vm6, %v3606_v1, %v3608_v50 }
 0x24a   : > { %6087 = vmatmul.msk.bf16.gmra.mxu3 %vm399_vm1, %v4197_v47  ;;  %v4199_v47 = vshrl.u32 %v6364_v54, 16 }
 0x24b   : > { %v4942_v8 = vadd.f32 %v4838_v26, %v4449_v6  ;;  %v4742_v6 = vsel %vm4721_vm7, %v4739_v51, %v4741_v43 }
 0x24d   : > { %v5069_v42 = vadd.f32 %v7287_v48, %v4942_v8  ;;  %v7307_v5 = vpop.f32.mrf.mxu3 }
 0x24e   : > { %v3707_v26 = vpop.f32.mrf.mxu2 }
 0x24f   : > { %v5110_v55 = vmax.f32 %v5069_v42, 0.0  ;;  %v3810_v19 = vadd.f32 %v3707_v26, %v3318_v49  ;;  %v3218_v38 = vpop.f32.mrf.mxu1  ;;  %v4202_v42 = vshll.u32 %v6364_v54, 16 }
 0x250   : > { %v4843_v63 = vpop.f32.mrf.mxu0  ;;  %v3319_v8 = vadd.f32 %v3218_v38, %v6775_v39 }
 0x251   : > { %5151 = vst [vmem:[%s7303_s13] sm:$0xff] %v5110_v55  ;;  %v4450_v10 = vadd.f32 %v7233_v18, %v3810_v19  ;;  %v7322_v55 = vld [vmem:[%s6466_s25 + $0x68] sm:$0xff] }
 0x252   : > { %5873 = vmatmul.msk.bf16.gmra.mxu1 %vm399_vm1, %v3117_v2  ;;  %v4201_v2 = vrot.slane %v4199_v47, 2 }
 0x253   : > { %v4943_v37 = vadd.f32 %v4840_v23, %v4450_v10  ;;  %5979 = vmatmul.msk.bf16.gmra.mxu2 %vm399_vm1, %v3609_v27  ;;  %6191 = vmatmul.msk.bf16.gmra.mxu0 %vm399_vm1, %v4742_v6  ;;  %v7319_v23 = vld [vmem:[%s6466_s25 + $0x60] sm:$0xff]  ;;  %v4204_v27 = vrot.slane %v4202_v42, 3 }
 0x254   : > { %v3118_v54 = vrot.slane %v7319_v23, 2 }
 0x255   : > { %v5070_v1 = vadd.f32 %v7287_v48, %v4943_v37  ;;  %v7324_v19 = vpop.f32.mrf.mxu3  ;;  %v7329_v37 = vld [vmem:[%s6466_s25 + $0x68] sm:$0xff]  ;;  %v4205_v39 = vor.u32 %v4204_v27, %v4201_v2 }
 0x256   : > { %v3710_v18 = vpop.f32.mrf.mxu2  ;;  %v4743_v42 = vrot.slane %v7329_v37, 3 }
 0x257   : > { %v5111_v49 = vmax.f32 %v5070_v1, 0.0  ;;  %v3811_v26 = vadd.f32 %v3710_v18, %v3319_v8  ;;  %v3220_v51 = vpop.f32.mrf.mxu1  ;;  %v3610_v1 = vrot.slane %v7322_v55, 2  ;;  %v4206_v8 = vsel %vm4081_vm5, %v4196_v34, %v4205_v39 }
 0x258   : > { %v4845_v6 = vpop.f32.mrf.mxu0  ;;  %v3320_v47 = vadd.f32 %v3220_v51, %v6789_v52  ;;  %v4744_v51 = vsel %vm4721_vm7, %v4741_v43, %v4743_v42 }
 0x259   : > { %5152 = vst [vmem:[%s7303_s13 + $0x8] sm:$0xff] %v5111_v49  ;;  %v4451_v10 = vadd.f32 %v7244_v41, %v3811_v26  ;;  %v3611_v23 = vsel %vm3096_vm6, %v3608_v50, %v3610_v1 }
 0x25a   : > { %6088 = vmatmul.msk.bf16.gmra.mxu3 %vm399_vm1, %v4206_v8 }
 0x25b   : > { %v4944_v38 = vadd.f32 %v4843_v63, %v4451_v10  ;;  %v3119_v63 = vsel %vm3096_vm6, %v3116_v58, %v3118_v54  ;;  %v6365_v58 = vld [vmem:[%s6466_s25 + $0x80] sm:$0xff] }
 0x25c   : > { %v4208_v37 = vshrl.u32 %v6365_v58, 16 }
 0x25d   : > { %v5071_v18 = vadd.f32 %v7287_v48, %v4944_v38  ;;  %v7340_v55 = vpop.f32.mrf.mxu3  ;;  %v4211_v38 = vshll.u32 %v6365_v58, 16 }
 0x25e   : > { %v3712_v41 = vpop.f32.mrf.mxu2 }
 0x25f   : > { %v5112_v49 = vmax.f32 %v5071_v18, 0.0  ;;  %v3812_v26 = vadd.f32 %v3712_v41, %v3320_v47  ;;  %v3223_v2 = vpop.f32.mrf.mxu1  ;;  %v7355_v47 = vld [vmem:[%s6466_s25 + $0x70] sm:$0xff] }
 0x260   : > { %v4848_v52 = vpop.f32.mrf.mxu0  ;;  %v3321_v10 = vadd.f32 %v3223_v2, %v6799_v15 }
 0x261   : > { %5153 = vst [vmem:[%s7303_s13 + $0x10] sm:$0xff] %v5112_v49  ;;  %v4452_v34 = vadd.f32 %v7257_v16, %v3812_v26  ;;  %v4210_v49 = vrot.slane %v4208_v37, 2  ;;  %v4213_v26 = vrot.slane %v4211_v38, 3 }
 0x262   : > { %5874 = vmatmul.msk.bf16.gmra.mxu1 %vm399_vm1, %v3119_v63 }
 0x263   : > { %v4945_v27 = vadd.f32 %v4845_v6, %v4452_v34  ;;  %5980 = vmatmul.msk.bf16.gmra.mxu2 %vm399_vm1, %v3611_v23  ;;  %6192 = vmatmul.msk.bf16.gmra.mxu0 %vm399_vm1, %v4744_v51  ;;  %v7352_v6 = vld [vmem:[%s6466_s25 + $0x68] sm:$0xff]  ;;  %v7362_v34 = vld [vmem:[%s6466_s25 + $0x70] sm:$0xff]  ;;  %v4214_v15 = vor.u32 %v4213_v26, %v4210_v49 }
 0x264   : > { %v3120_v51 = vrot.slane %v7352_v6, 2 }
 0x265   : > { %v5072_v50 = vadd.f32 %v7287_v48, %v4945_v27  ;;  %v7357_v41 = vpop.f32.mrf.mxu3  ;;  %v3612_v27 = vrot.slane %v7355_v47, 2  ;;  %v4215_v58 = vsel %vm4081_vm5, %v4205_v39, %v4214_v15 }
 0x266   : > { %v3715_v16 = vpop.f32.mrf.mxu2 }
 0x267   : > { %v5113_v8 = vmax.f32 %v5072_v50, 0.0  ;;  %v3813_v18 = vadd.f32 %v3715_v16, %v3321_v10  ;;  %v3225_v43 = vpop.f32.mrf.mxu1  ;;  %v4745_v16 = vrot.slane %v7362_v34, 3 }
 0x268   : > { %v4850_v23 = vpop.f32.mrf.mxu0  ;;  %v3322_v10 = vadd.f32 %v3225_v43, %v6813_v57 }
 0x269   : > { %5154 = vst [vmem:[%s7303_s13 + $0x18] sm:$0xff] %v5113_v8  ;;  %v4453_v63 = vadd.f32 %v7267_v61, %v3813_v18  ;;  %v3613_v18 = vsel %vm3096_vm6, %v3610_v1, %v3612_v27  ;;  %v4746_v43 = vsel %vm4721_vm7, %v4743_v42, %v4745_v16 }
 0x26a   : > { %6089 = vmatmul.msk.bf16.gmra.mxu3 %vm399_vm1, %v4215_v58  ;;  %v7388_v58 = vld [vmem:[%s6466_s25 + $0x78] sm:$0xff] }
 0x26b   : > { %v4946_v2 = vadd.f32 %v4848_v52, %v4453_v63  ;;  %v3121_v52 = vsel %vm3096_vm6, %v3118_v54, %v3120_v51  ;;  %v6366_v54 = vld [vmem:[%s6466_s25 + $0x88] sm:$0xff] }
 0x26c   : > { %v4217_v26 = vshrl.u32 %v6366_v54, 16  ;;  %v4220_v63 = vshll.u32 %v6366_v54, 16 }
 0x26d   : > { %v5073_v50 = vadd.f32 %v7287_v48, %v4946_v2  ;;  %v7373_v6 = vpop.f32.mrf.mxu3 }
 0x26e   : > { %v3717_v61 = vpop.f32.mrf.mxu2 }
 0x26f   : > { %v5114_v37 = vmax.f32 %v5073_v50, 0.0  ;;  %v3814_v38 = vadd.f32 %v3717_v61, %v3322_v10  ;;  %v3228_v8 = vpop.f32.mrf.mxu1  ;;  %v4219_v10 = vrot.slane %v4217_v26, 2  ;;  %v4222_v61 = vrot.slane %v4220_v63, 3 }
 0x270   : > { %v4853_v57 = vpop.f32.mrf.mxu0  ;;  %v3323_v49 = vadd.f32 %v3228_v8, %v6823_v22 }
 0x271   : > { %5155 = vst [vmem:[%s7303_s13 + $0x20] sm:$0xff] %v5114_v37  ;;  %v4454_v39 = vadd.f32 %v7281_v30, %v3814_v38  ;;  %v4223_v22 = vor.u32 %v4222_v61, %v4219_v10 }
 0x272   : > { %5875 = vmatmul.msk.bf16.gmra.mxu1 %vm399_vm1, %v3121_v52  ;;  %v7395_v52 = vld [vmem:[%s6466_s25 + $0x78] sm:$0xff] }
 0x273   : > { %v4947_v47 = vadd.f32 %v4850_v23, %v4454_v39  ;;  %5981 = vmatmul.msk.bf16.gmra.mxu2 %vm399_vm1, %v3613_v18  ;;  %6193 = vmatmul.msk.bf16.gmra.mxu0 %vm399_vm1, %v4746_v43  ;;  %v7385_v23 = vld [vmem:[%s6466_s25 + $0x70] sm:$0xff]  ;;  %v3614_v39 = vrot.slane %v7388_v58, 2  ;;  %v4224_v43 = vsel %vm4081_vm5, %v4214_v15, %v4223_v22 }
 0x274   : > { %v3122_v18 = vrot.slane %v7385_v23, 2 }
 0x275   : > { %v5074_v1 = vadd.f32 %v7287_v48, %v4947_v47  ;;  %v7390_v50 = vpop.f32.mrf.mxu3  ;;  %v3615_v63 = vsel %vm3096_vm6, %v3612_v27, %v3614_v39 }
 0x276   : > { %v3720_v30 = vpop.f32.mrf.mxu2 }
 0x277   : > { %v5115_v34 = vmax.f32 %v5074_v1, 0.0  ;;  %v3815_v2 = vadd.f32 %v3720_v30, %v3323_v49  ;;  %v3230_v42 = vpop.f32.mrf.mxu1  ;;  %v4747_v1 = vrot.slane %v7395_v52, 3  ;;  %v7421_v52 = vld [vmem:[%s6466_s25 + $0x80] sm:$0xff] }
 0x278   : > { %v4855_v38 = vpop.f32.mrf.mxu0  ;;  %v3324_v54 = vadd.f32 %v3230_v42, %v6837_v46 }
 0x279   : > { %5156 = vst [vmem:[%s7303_s13 + $0x28] sm:$0xff] %v5115_v34  ;;  %v4455_v37 = vadd.f32 %v7307_v5, %v3815_v2  ;;  %v4748_v2 = vsel %vm4721_vm7, %v4745_v16, %v4747_v1 }
 0x27a   : > { %6090 = vmatmul.msk.bf16.gmra.mxu3 %vm399_vm1, %v4224_v43 }
 0x27b   : > { %v4948_v8 = vadd.f32 %v4853_v57, %v4455_v37  ;;  %v3123_v57 = vsel %vm3096_vm6, %v3120_v51, %v3122_v18  ;;  %v6367_v51 = vld [vmem:[%s6466_s25 + $0x90] sm:$0xff] }
 0x27c   : > { %v4226_v58 = vshrl.u32 %v6367_v51, 16  ;;  %v4229_v10 = vshll.u32 %v6367_v51, 16 }
 0x27d   : > { %v5075_v47 = vadd.f32 %v7287_v48, %v4948_v8  ;;  %v7406_v34 = vpop.f32.mrf.mxu3 }
 0x27e   : > { %v3722_v5 = vpop.f32.mrf.mxu2  ;;  %v4228_v43 = vrot.slane %v4226_v58, 2 }
 0x27f   : > { %v5116_v49 = vmax.f32 %v5075_v47, 0.0  ;;  %v3816_v30 = vadd.f32 %v3722_v5, %v3324_v54  ;;  %v3233_v26 = vpop.f32.mrf.mxu1  ;;  %v4231_v47 = vrot.slane %v4229_v10, 3 }
 0x280   : > { %v4858_v46 = vpop.f32.mrf.mxu0  ;;  %v3325_v23 = vadd.f32 %v3233_v26, %v6847_v35 }
 0x281   : > { %5157 = vst [vmem:[%s7303_s13 + $0x30] sm:$0xff] %v5116_v49  ;;  %v4456_v15 = vadd.f32 %v7324_v19, %v3816_v30  ;;  %v7428_v49 = vld [vmem:[%s6466_s25 + $0x80] sm:$0xff]  ;;  %v4232_v35 = vor.u32 %v4231_v47, %v4228_v43 }
 0x282   : > { %5876 = vmatmul.msk.bf16.gmra.mxu1 %vm399_vm1, %v3123_v57  ;;  %v3616_v57 = vrot.slane %v7421_v52, 2  ;;  %v7451_v47 = vld [vmem:[%s6466_s25 + $0x80] sm:$0xff] }
 0x283   : > { %v4949_v42 = vadd.f32 %v4855_v38, %v4456_v15  ;;  %5982 = vmatmul.msk.bf16.gmra.mxu2 %vm399_vm1, %v3615_v63  ;;  %6194 = vmatmul.msk.bf16.gmra.mxu0 %vm399_vm1, %v4748_v2  ;;  %v7418_v38 = vld [vmem:[%s6466_s25 + $0x78] sm:$0xff]  ;;  %v4233_v63 = vsel %vm4081_vm5, %v4223_v22, %v4232_v35 }
 0x284   : > { %v3124_v26 = vrot.slane %v7418_v38, 2 }
 0x285   : > { %v5076_v27 = vadd.f32 %v7287_v48, %v4949_v42  ;;  %v7423_v8 = vpop.f32.mrf.mxu3  ;;  %v4749_v42 = vrot.slane %v7428_v49, 3 }
 0x286   : > { %v3725_v19 = vpop.f32.mrf.mxu2 }
 0x287   : > { %v5117_v61 = vmax.f32 %v5076_v27, 0.0  ;;  %v3817_v37 = vadd.f32 %v3725_v19, %v3325_v23  ;;  %v3235_v16 = vpop.f32.mrf.mxu1  ;;  %v3617_v19 = vsel %vm3096_vm6, %v3614_v39, %v3616_v57  ;;  %v4750_v10 = vsel %vm4721_vm7, %v4747_v1, %v4749_v42 }
 0x288   : > { %v4860_v5 = vpop.f32.mrf.mxu0  ;;  %v3326_v2 = vadd.f32 %v3235_v16, %v6861_v60 }
 0x289   : > { %5158 = vst [vmem:[%s7303_s13 + $0x38] sm:$0xff] %v5117_v61  ;;  %v4457_v54 = vadd.f32 %v7340_v55, %v3817_v37 }
 0x28a   : > { %6091 = vmatmul.msk.bf16.gmra.mxu3 %vm399_vm1, %v4233_v63 }
 0x28b   : > { %v4950_v30 = vadd.f32 %v4858_v46, %v4457_v54  ;;  %v3125_v46 = vsel %vm3096_vm6, %v3122_v18, %v3124_v26  ;;  %v6368_v18 = vld [vmem:[%s6466_s25 + $0x98] sm:$0xff]  ;;  %v7454_v54 = vld [vmem:[%s6466_s25 + $0x88] sm:$0xff] }
 0x28c   : > { %v4235_v16 = vshrl.u32 %v6368_v18, 16  ;;  %v4238_v38 = vshll.u32 %v6368_v18, 16 }
 0x28d   : > { %v5077_v15 = vadd.f32 %v7287_v48, %v4950_v30  ;;  %v7439_v58 = vpop.f32.mrf.mxu3 }
 0x28e   : > { %v3727_v55 = vpop.f32.mrf.mxu2  ;;  %v4237_v49 = vrot.slane %v4235_v16, 2  ;;  %v4240_v30 = vrot.slane %v4238_v38, 3 }
 0x28f   : > { %v5118_v51 = vmax.f32 %v5077_v15, 0.0  ;;  %v3818_v27 = vadd.f32 %v3727_v55, %v3326_v2  ;;  %v3238_v23 = vpop.f32.mrf.mxu1  ;;  %v7461_v2 = vld [vmem:[%s6466_s25 + $0x88] sm:$0xff] }
 0x290   : > { %v4863_v60 = vpop.f32.mrf.mxu0  ;;  %v3327_v37 = vadd.f32 %v3238_v23, %v6871_v53  ;;  %v4241_v53 = vor.u32 %v4240_v30, %v4237_v49  ;;  %v7487_v49 = vld [vmem:[%s6466_s25 + $0x90] sm:$0xff] }
 0x291   : > { %5159 = vst [vmem:[%s7303_s13 + $0x40] sm:$0xff] %v5118_v51  ;;  %v4458_v22 = vadd.f32 %v7357_v41, %v3818_v27  ;;  %v3126_v51 = vrot.slane %v7451_v47, 2  ;;  %v3618_v27 = vrot.slane %v7454_v54, 2  ;;  %v7484_v54 = vld [vmem:[%s6466_s25 + $0x88] sm:$0xff] }
 0x292   : > { %5877 = vmatmul.msk.bf16.gmra.mxu1 %vm399_vm1, %v3125_v46  ;;  %v4242_v23 = vsel %vm4081_vm5, %v4232_v35, %v4241_v53 }
 0x293   : > { %v4951_v61 = vadd.f32 %v4860_v5, %v4458_v22  ;;  %5983 = vmatmul.msk.bf16.gmra.mxu2 %vm399_vm1, %v3617_v19  ;;  %6195 = vmatmul.msk.bf16.gmra.mxu0 %vm399_vm1, %v4750_v10  ;;  %v4751_v22 = vrot.slane %v7461_v2, 3 }
 0x295   : > { %v5078_v39 = vadd.f32 %v7287_v48, %v4951_v61  ;;  %v7456_v5 = vpop.f32.mrf.mxu3 }
 0x296   : > { %v3730_v41 = vpop.f32.mrf.mxu2 }
 0x297   : > { %v5119_v52 = vmax.f32 %v5078_v39, 0.0  ;;  %v3819_v43 = vadd.f32 %v3730_v41, %v3327_v37  ;;  %v3240_v1 = vpop.f32.mrf.mxu1  ;;  %v3619_v39 = vsel %vm3096_vm6, %v3616_v57, %v3618_v27  ;;  %v4752_v41 = vsel %vm4721_vm7, %v4749_v42, %v4751_v22 }
 0x298   : > { %v4865_v15 = vpop.f32.mrf.mxu0  ;;  %v3328_v19 = vadd.f32 %v3240_v1, %v6885_v62 }
 0x299   : > { %5160 = vst [vmem:[%s7303_s13 + $0x48] sm:$0xff] %v5119_v52  ;;  %v4459_v63 = vadd.f32 %v7373_v6, %v3819_v43 }
 0x29a   : > { %6092 = vmatmul.msk.bf16.gmra.mxu3 %vm399_vm1, %v4242_v23  ;;  %v7494_v23 = vld [vmem:[%s6466_s25 + $0x90] sm:$0xff] }
 0x29b   : > { %v4952_v55 = vadd.f32 %v4863_v60, %v4459_v63  ;;  %v3127_v60 = vsel %vm3096_vm6, %v3124_v26, %v3126_v51  ;;  %v6369_v26 = vld [vmem:[%s6466_s25 + $0xa0] sm:$0xff] }
 0x29c   : > { %v4244_v52 = vshrl.u32 %v6369_v26, 16  ;;  %v4247_v43 = vshll.u32 %v6369_v26, 16 }
 0x29d   : > { %v5079_v46 = vadd.f32 %v7287_v48, %v4952_v55  ;;  %v7472_v37 = vpop.f32.mrf.mxu3 }
 0x29e   : > { %v3732_v6 = vpop.f32.mrf.mxu2  ;;  %v4246_v63 = vrot.slane %v4244_v52, 2 }
 0x29f   : > { %v5120_v10 = vmax.f32 %v5079_v46, 0.0  ;;  %v3820_v61 = vadd.f32 %v3732_v6, %v3328_v19  ;;  %v3243_v18 = vpop.f32.mrf.mxu1  ;;  %v3128_v19 = vrot.slane %v7484_v54, 2  ;;  %v3620_v6 = vrot.slane %v7487_v49, 2  ;;  %v7520_v54 = vld [vmem:[%s6466_s25 + $0x98] sm:$0xff] }
 0x2a0   : > { %v4868_v62 = vpop.f32.mrf.mxu0  ;;  %v3329_v38 = vadd.f32 %v3243_v18, %v6895_v14 }
 0x2a1   : > { %5161 = vst [vmem:[%s7303_s13 + $0x50] sm:$0xff] %v5120_v10  ;;  %v4460_v35 = vadd.f32 %v7390_v50, %v3820_v61 }
 0x2a2   : > { %5878 = vmatmul.msk.bf16.gmra.mxu1 %vm399_vm1, %v3127_v60  ;;  %v4753_v60 = vrot.slane %v7494_v23, 3  ;;  %v7527_v23 = vld [vmem:[%s6466_s25 + $0x98] sm:$0xff] }
 0x2a3   : > { %v4953_v16 = vadd.f32 %v4865_v15, %v4460_v35  ;;  %5984 = vmatmul.msk.bf16.gmra.mxu2 %vm399_vm1, %v3619_v39  ;;  %6196 = vmatmul.msk.bf16.gmra.mxu0 %vm399_vm1, %v4752_v41  ;;  %v4249_v15 = vrot.slane %v4247_v43, 3 }
 0x2a5   : > { %v5080_v57 = vadd.f32 %v7287_v48, %v4953_v16  ;;  %v7489_v30 = vpop.f32.mrf.mxu3  ;;  %v4250_v14 = vor.u32 %v4249_v15, %v4246_v63  ;;  %v3621_v16 = vsel %vm3096_vm6, %v3618_v27, %v3620_v6 }
 0x2a6   : > { %v3735_v50 = vpop.f32.mrf.mxu2 }
 0x2a7   : > { %v5121_v1 = vmax.f32 %v5080_v57, 0.0  ;;  %v3821_v47 = vadd.f32 %v3735_v50, %v3329_v38  ;;  %v3245_v42 = vpop.f32.mrf.mxu1  ;;  %v4251_v10 = vsel %vm4081_vm5, %v4241_v53, %v4250_v14  ;;  %v4754_v57 = vsel %vm4721_vm7, %v4751_v22, %v4753_v60 }
 0x2a8   : > { %v4870_v55 = vpop.f32.mrf.mxu0  ;;  %v3330_v18 = vadd.f32 %v3245_v42, %v6909_v24  ;;  %v7517_v42 = vld [vmem:[%s6466_s25 + $0x90] sm:$0xff] }
 0x2a9   : > { %5162 = vst [vmem:[%s7303_s13 + $0x58] sm:$0xff] %v5121_v1  ;;  %v4461_v2 = vadd.f32 %v7406_v34, %v3821_v47 }
 0x2aa   : > { %6093 = vmatmul.msk.bf16.gmra.mxu3 %vm399_vm1, %v4251_v10  ;;  %v3130_v10 = vrot.slane %v7517_v42, 2 }
 0x2ab   : > { %v4954_v46 = vadd.f32 %v4868_v62, %v4461_v2  ;;  %v3129_v62 = vsel %vm3096_vm6, %v3126_v51, %v3128_v19  ;;  %v6370_v51 = vld [vmem:[%s6466_s25 + $0xa8] sm:$0xff] }
 0x2ac   : > { %v4253_v52 = vshrl.u32 %v6370_v51, 16  ;;  %v4256_v43 = vshll.u32 %v6370_v51, 16 }
 0x2ad   : > { %v5081_v61 = vadd.f32 %v7287_v48, %v4954_v46  ;;  %v7505_v26 = vpop.f32.mrf.mxu3 }
 0x2ae   : > { %v3737_v34 = vpop.f32.mrf.mxu2  ;;  %v4255_v63 = vrot.slane %v4253_v52, 2  ;;  %v4258_v15 = vrot.slane %v4256_v43, 3  ;;  %v6371_v52 = vld [vmem:[%s6466_s25 + $0xb0] sm:$0x70] }
 0x2af   : > { %v5122_v39 = vmax.f32 %v5081_v61, 0.0  ;;  %v3822_v35 = vadd.f32 %v3737_v34, %v3330_v18  ;;  %v3248_v41 = vpop.f32.mrf.mxu1  ;;  %v3622_v61 = vrot.slane %v7520_v54, 2  ;;  %v6327_v54 = vld [vmem:[%s6466_s25 + $0x98] sm:$0xff] }
 0x2b0   : > { %v4873_v24 = vpop.f32.mrf.mxu0  ;;  %v3331_v50 = vadd.f32 %v3248_v41, %v6921_v13  ;;  %v4259_v13 = vor.u32 %v4258_v15, %v4255_v63  ;;  %v4755_v41 = vrot.slane %v7527_v23, 3  ;;  %v6348_v63 = vld [vmem:[%s6466_s25 + $0xa0] sm:$0xff] }
 0x2b1   : > { %5163 = vst [vmem:[%s7303_s13 + $0x60] sm:$0xff] %v5122_v39  ;;  %v4462_v53 = vadd.f32 %v7423_v8, %v3822_v35  ;;  %v7720_v39 = vld [vmem:[#allocation12_spill] sm:$0xff] }
 0x2b2   : > { %5879 = vmatmul.msk.bf16.gmra.mxu1 %vm399_vm1, %v3129_v62  ;;  %v4260_v18 = vsel %vm4081_vm5, %v4250_v14, %v4259_v13 }
 0x2b3   : > { %v4955_v38 = vadd.f32 %v4870_v55, %v4462_v53  ;;  %5985 = vmatmul.msk.bf16.gmra.mxu2 %vm399_vm1, %v3621_v16  ;;  %6197 = vmatmul.msk.bf16.gmra.mxu0 %vm399_vm1, %v4754_v57  ;;  %v3623_v57 = vsel %vm3096_vm6, %v3620_v6, %v3622_v61 }
 0x2b5   : > { %v5082_v27 = vadd.f32 %v7287_v48, %v4955_v38  ;;  %v7522_v49 = vpop.f32.mrf.mxu3 }
 0x2b6   : > { %v3740_v8 = vpop.f32.mrf.mxu2 }
 0x2b7   : > { %v5123_v1 = vmax.f32 %v5082_v27, 0.0  ;;  %v3823_v47 = vadd.f32 %v3740_v8, %v3331_v50  ;;  %v3250_v22 = vpop.f32.mrf.mxu1  ;;  %v4756_v27 = vsel %vm4721_vm7, %v4753_v60, %v4755_v41  ;;  %v6074_v8 = vld [vmem:[%s6466_s25 + $0xb0] sm:$0xf] }
 0x2b8   : > { %v4875_v55 = vpop.f32.mrf.mxu0  ;;  %v3332_v35 = vadd.f32 %v3250_v22, %v7720_v39  ;;  %v3132_v39 = vrot.slane %v6327_v54, 2 }
 0x2b9   : > { %5164 = vst [vmem:[%s7303_s13 + $0x68] sm:$0xff] %v5123_v1  ;;  %v4463_v2 = vadd.f32 %v7439_v58, %v3823_v47 }
 0x2ba   : > { %6094 = vmatmul.msk.bf16.gmra.mxu3 %vm399_vm1, %v4260_v18  ;;  %v6390_v18 = vld [vmem:[%s6466_s25 + $0xa0] sm:$0xff] }
 0x2bb   : > { %v4956_v46 = vadd.f32 %v4873_v24, %v4463_v2  ;;  %v3131_v24 = vsel %vm3096_vm6, %v3128_v19, %v3130_v10  ;;  %v6075_v19 = vor.u32 %v6371_v52, %v6074_v8 }
 0x2bd   : > { %v5083_v34 = vadd.f32 %v7287_v48, %v4956_v46  ;;  %v7538_v38 = vpop.f32.mrf.mxu3  ;;  %v4262_v60 = vshrl.u32 %v6075_v19, 16  ;;  %v4265_v1 = vshll.u32 %v6075_v19, 16 }
 0x2be   : > { %v3742_v58 = vpop.f32.mrf.mxu2 }
 0x2bf   : > { %v5124_v62 = vmax.f32 %v5083_v34, 0.0  ;;  %v3824_v16 = vadd.f32 %v3742_v58, %v3332_v35  ;;  %v3253_v53 = vpop.f32.mrf.mxu1  ;;  %v4264_v2 = vrot.slane %v4262_v60, 2  ;;  %v3624_v35 = vrot.slane %v6348_v63, 2  ;;  %v6391_v63 = vld [vmem:[%s6466_s25 + $0xa8] sm:$0xff] }
 0x2c0   : > { %v4878_v51 = vpop.f32.mrf.mxu0 }
 0x2c1   : > { %5165 = vst [vmem:[%s7303_s13 + $0x70] sm:$0xff] %v5124_v62  ;;  %v4464_v14 = vadd.f32 %v7456_v5, %v3824_v16  ;;  %v3333_v5 = vadd.f32 %v3253_v53, %v6947_v44  ;;  %v7721_v16 = vld [vmem:[#allocation13_spill] sm:$0xff]  ;;  %v3625_v8 = vsel %vm3096_vm6, %v3622_v61, %v3624_v35  ;;  %v7722_v61 = vld [vmem:[#allocation14_spill] sm:$0xff] }
 0x2c2   : > { %5880 = vmatmul.msk.bf16.gmra.mxu1 %vm399_vm1, %v3131_v24  ;;  %v4757_v24 = vrot.slane %v6390_v18, 3  ;;  %v7723_v18 = vld [vmem:[#allocation15_spill] sm:$0xff] }
 0x2c3   : > { %v4957_v50 = vadd.f32 %v4875_v55, %v4464_v14  ;;  %5986 = vmatmul.msk.bf16.gmra.mxu2 %vm399_vm1, %v3623_v57  ;;  %6198 = vmatmul.msk.bf16.gmra.mxu0 %vm399_vm1, %v4756_v27  ;;  %v4267_v55 = vrot.slane %v4265_v1, 3 }
 0x2c4   : > { %v4758_v19 = vsel %vm4721_vm7, %v4755_v41, %v4757_v24 }
 0x2c5   : > { %v5084_v6 = vadd.f32 %v7287_v48, %v4957_v50  ;;  %v7552_v15 = vpop.f32.mrf.mxu3  ;;  %v4268_v34 = vor.u32 %v4267_v55, %v4264_v2  ;;  %v3133_v50 = vsel %vm3096_vm6, %v3130_v10, %v3132_v39 }
 0x2c6   : > { %v3745_v43 = vpop.f32.mrf.mxu2 }
 0x2c7   : > { %v5125_v47 = vmax.f32 %v5084_v6, 0.0  ;;  %v3825_v22 = vadd.f32 %v3745_v43, %v3333_v5  ;;  %v3255_v42 = vpop.f32.mrf.mxu1  ;;  %v4269_v58 = vsel %vm4081_vm5, %v4259_v13, %v4268_v34 }
 0x2c8   : > { %v4880_v46 = vpop.f32.mrf.mxu0  ;;  %v3334_v53 = vadd.f32 %v3255_v42, %v7721_v16 }
 0x2c9   : > { %5166 = vst [vmem:[%s7303_s13 + $0x78] sm:$0xff] %v5125_v47  ;;  %v4465_v23 = vadd.f32 %v7472_v37, %v3825_v22  ;;  %v6328_v47 = vld [vmem:[%s6466_s25 + $0xa0] sm:$0xff]  ;;  %v6349_v22 = vld [vmem:[%s6466_s25 + $0xa8] sm:$0xff] }
 0x2ca   : > { %6095 = vmatmul.msk.bf16.gmra.mxu3 %vm399_vm1, %v4269_v58  ;;  %v3134_v55 = vrot.slane %v6328_v47, 2  ;;  %v4759_v58 = vrot.slane %v6391_v63, 3 }
 0x2cb   : > { %v4958_v44 = vadd.f32 %v4878_v51, %v4465_v23  ;;  %v3626_v23 = vrot.slane %v6349_v22, 2 }
 0x2cd   : > { %v5085_v62 = vadd.f32 %v7287_v48, %v4958_v44  ;;  %v7563_v51 = vpop.f32.mrf.mxu3 }
 0x2ce   : > { %v3747_v57 = vpop.f32.mrf.mxu2 }
 0x2cf   : > { %v5126_v14 = vmax.f32 %v5085_v62, 0.0  ;;  %v3826_v27 = vadd.f32 %v3747_v57, %v3334_v53  ;;  %v3258_v37 = vpop.f32.mrf.mxu1 }
 0x2d0   : > { %v4883_v52 = vpop.f32.mrf.mxu0  ;;  %v3335_v5 = vadd.f32 %v3258_v37, %v7722_v61  ;;  %v6392_v61 = vld [vmem:[%s6466_s25 + $0xb0] sm:$0x70] }
 0x2d1   : > { %5167 = vst [vmem:[%s7303_s13 + $0x80] sm:$0xff] %v5126_v14  ;;  %v4466_v13 = vadd.f32 %v7489_v30, %v3826_v27  ;;  %v3627_v14 = vsel %vm3096_vm6, %v3624_v35, %v3626_v23 }
 0x2d2   : > { %5881 = vmatmul.msk.bf16.gmra.mxu1 %vm399_vm1, %v3133_v50  ;;  %v4760_v50 = vsel %vm4721_vm7, %v4757_v24, %v4759_v58 }
 0x2d3   : > { %v4959_v6 = vadd.f32 %v4880_v46, %v4466_v13  ;;  %5987 = vmatmul.msk.bf16.gmra.mxu2 %vm399_vm1, %v3625_v8  ;;  %6199 = vmatmul.msk.bf16.gmra.mxu0 %vm399_vm1, %v4758_v19  ;;  %v5968_v19 = vld [vmem:[%s6466_s25 + $0xb0] sm:$0xf] }
 0x2d5   : > { %v5086_v10 = vadd.f32 %v7287_v48, %v4959_v6  ;;  %v7575_v42 = vpop.f32.mrf.mxu3  ;;  %v6350_v6 = vld [vmem:[%s6466_s25 + $0xb0] sm:$0x30] }
 0x2d6   : > { %v3750_v43 = vpop.f32.mrf.mxu2 }
 0x2d7   : > { %v5127_v60 = vmax.f32 %v5086_v10, 0.0  ;;  %v3827_v1 = vadd.f32 %v3750_v43, %v3335_v5  ;;  %v3260_v30 = vpop.f32.mrf.mxu1  ;;  %v6180_v10 = vld [vmem:[%s6466_s25 + $0xb0] sm:$0xf] }
 0x2d8   : > { %v4885_v54 = vpop.f32.mrf.mxu0  ;;  %v3336_v44 = vadd.f32 %v3260_v30, %v7723_v18 }
 0x2d9   : > { %5168 = vst [vmem:[%s7303_s13 + $0x88] sm:$0xff] %v5127_v60  ;;  %v4467_v41 = vadd.f32 %v7505_v26, %v3827_v1  ;;  %v3135_v26 = vsel %vm3096_vm6, %v3132_v39, %v3134_v55  ;;  %v5862_v39 = vld [vmem:[%s6466_s25 + $0xa8] sm:$0xf]  ;;  %v5969_v1 = vor.u32 %v6350_v6, %v5968_v19 }
 0x2da   : > { %6096 = vmatmul.msk.bf16.gmra.mxu3 %vm399_vm1, %v4268_v34 }
 0x2db   : > { %v4960_v2 = vadd.f32 %v4883_v52, %v4467_v41  ;;  %v6329_v52 = vld [vmem:[%s6466_s25 + $0xa8] sm:$0x30]  ;;  %v6181_v41 = vor.u32 %v6392_v61, %v6180_v10  ;;  %v3628_v63 = vrot.slane %v5969_v1, 2 }
 0x2dc   : > { %v5863_v60 = vor.u32 %v6329_v52, %v5862_v39 }
 0x2dd   : > { %v5087_v46 = vadd.f32 %v7287_v48, %v4960_v2  ;;  %v7585_v27 = vpop.f32.mrf.mxu3  ;;  %v4761_v18 = vrot.slane %v6181_v41, 3 }
 0x2de   : > { %v3752_v62 = vpop.f32.mrf.mxu2 }
 0x2df   : > { %v5128_v16 = vmax.f32 %v5087_v46, 0.0  ;;  %v3828_v53 = vadd.f32 %v3752_v62, %v3336_v44  ;;  %v3263_v57 = vpop.f32.mrf.mxu1 }
 0x2e0   : > { %v4888_v34 = vpop.f32.mrf.mxu0  ;;  %v3337_v13 = vadd.f32 %v3263_v57, %v7013_v21 }
 0x2e1   : > { %5169 = vst [vmem:[%s7303_s13 + $0x90] sm:$0xff] %v5128_v16  ;;  %v4468_v37 = vadd.f32 %v7522_v49, %v3828_v53 }
 0x2e2   : > { %5882 = vmatmul.msk.bf16.gmra.mxu1 %vm399_vm1, %v3135_v26  ;;  %v3629_v26 = vsel %vm3096_vm6, %v3626_v23, %v3628_v63 }
 0x2e3   : > { %v4961_v8 = vadd.f32 %v4885_v54, %v4468_v37  ;;  %5988 = vmatmul.msk.bf16.gmra.mxu2 %vm399_vm1, %v3627_v14  ;;  %6200 = vmatmul.msk.bf16.gmra.mxu0 %vm399_vm1, %v4760_v50  ;;  %v3136_v54 = vrot.slane %v5863_v60, 2 }
 0x2e5   : > { %v5088_v35 = vadd.f32 %v7287_v48, %v4961_v8  ;;  %v7601_v30 = vpop.f32.mrf.mxu3  ;;  %v3137_v57 = vsel %vm3096_vm6, %v3134_v55, %v3136_v54 }
 0x2e6   : > { %v3755_v49 = vpop.f32.mrf.mxu2 }
 0x2e7   : > { %v5129_v24 = vmax.f32 %v5088_v35, 0.0  ;;  %v3829_v5 = vadd.f32 %v3755_v49, %v3337_v13  ;;  %v3265_v43 = vpop.f32.mrf.mxu1 }
 0x2e8   : > { %v4890_v22 = vpop.f32.mrf.mxu0  ;;  %v3338_v46 = vadd.f32 %v3265_v43, %v7029_v25 }
 0x2e9   : > { %5170 = vst [vmem:[%s7303_s13 + $0x98] sm:$0xff] %v5129_v24  ;;  %v4469_v47 = vadd.f32 %v7538_v38, %v3829_v5 }
 0x2eb   : > { %v4962_v21 = vadd.f32 %v4888_v34, %v4469_v47  ;;  %v4762_v34 = vsel %vm4721_vm7, %v4759_v58, %v4761_v18 }
 0x2ed   : > { %v5089_v2 = vadd.f32 %v7287_v48, %v4962_v21  ;;  %v7609_v38 = vpop.f32.mrf.mxu3 }
 0x2ee   : > { %v3757_v44 = vpop.f32.mrf.mxu2 }
 0x2ef   : > { %v5130_v62 = vmax.f32 %v5089_v2, 0.0  ;;  %v3830_v16 = vadd.f32 %v3757_v44, %v3338_v46  ;;  %v3268_v53 = vpop.f32.mrf.mxu1 }
 0x2f0   : > { %v4893_v37 = vpop.f32.mrf.mxu0  ;;  %v3339_v55 = vadd.f32 %v3268_v53, %v7038_v17 }
 0x2f1   : > { %5171 = vst [vmem:[%s7303_s13 + $0xa0] sm:$0xff] %v5130_v62  ;;  %v4470_v14 = vadd.f32 %v7552_v15, %v3830_v16 }
 0x2f2   : > { %5883 = vmatmul.msk.bf16.gmra.mxu1 %vm399_vm1, %v3137_v57 }
 0x2f3   : > { %v4963_v50 = vadd.f32 %v4890_v22, %v4470_v14  ;;  %5989 = vmatmul.msk.bf16.gmra.mxu2 %vm399_vm1, %v3629_v26  ;;  %6201 = vmatmul.msk.bf16.gmra.mxu0 %vm399_vm1, %v4762_v34 }
 0x2f5   : > { %v5090_v25 = vadd.f32 %v7287_v48, %v4963_v50  ;;  %v4412_v15 = vpop.f32.mrf.mxu3 }
 0x2f6   : > { %v3760_v23 = vpop.f32.mrf.mxu2 }
 0x2f7   : > { %v5131_v8 = vmax.f32 %v5090_v25, 0.0  ;;  %v3831_v39 = vadd.f32 %v3760_v23, %v3339_v55  ;;  %v3270_v35 = vpop.f32.mrf.mxu1 }
 0x2f8   : > { %v4895_v13 = vpop.f32.mrf.mxu0  ;;  %v3340_v6 = vadd.f32 %v3270_v35, %v7048_v45 }
 0x2f9   : > { %5172 = vst [vmem:[%s7303_s13 + $0xa8] sm:$0xff] %v5131_v8  ;;  %v4471_v58 = vadd.f32 %v7563_v51, %v3831_v39 }
 0x2fb   : > { %v4964_v52 = vadd.f32 %v4893_v37, %v4471_v58 }
 0x2fd   : > { %v5091_v19 = vadd.f32 %v7287_v48, %v4964_v52  ;;  %v4415_v17 = vpop.f32.mrf.mxu3 }
 0x2fe   : > { %v3762_v49 = vpop.f32.mrf.mxu2 }
 0x2ff   : > { %v5132_v10 = vmax.f32 %v5091_v19, 0.0  ;;  %v3832_v61 = vadd.f32 %v3762_v49, %v3340_v6  ;;  %v3273_v24 = vpop.f32.mrf.mxu1 }
 0x300   : > { %v4898_v43 = vpop.f32.mrf.mxu0  ;;  %v3341_v45 = vadd.f32 %v3273_v24, %v7069_v36 }
 0x301   : > { %5173 = vst [vmem:[%s7303_s13 + $0xb0] sm:$0xff] %v5132_v10  ;;  %v4472_v5 = vadd.f32 %v7575_v42, %v3832_v61 }
 0x302   : > { %5884 = vmatmul.msk.bf16.gmra.mxu1 %vm399_vm1, %v3136_v54 }
 0x303   : > { %v4965_v60 = vadd.f32 %v4895_v13, %v4472_v5  ;;  %5990 = vmatmul.msk.bf16.gmra.mxu2 %vm399_vm1, %v3628_v63  ;;  %6202 = vmatmul.msk.bf16.gmra.mxu0 %vm399_vm1, %v4761_v18 }
 0x305   : > { %v5092_v51 = vadd.f32 %v7287_v48, %v4965_v60  ;;  %v4417_v21 = vpop.f32.mrf.mxu3 }
 0x306   : > { %v3765_v1 = vpop.f32.mrf.mxu2 }
 0x307   : > { %v5133_v47 = vmax.f32 %v5092_v51, 0.0  ;;  %v3833_v22 = vadd.f32 %v3765_v1, %v3341_v45  ;;  %v3275_v41 = vpop.f32.mrf.mxu1 }
 0x308   : > { %v4900_v2 = vpop.f32.mrf.mxu0  ;;  %v3342_v63 = vadd.f32 %v3275_v41, %v7084_v7 }
 0x309   : > { %5174 = vst [vmem:[%s7303_s13 + $0xb8] sm:$0xff] %v5133_v47  ;;  %v4473_v42 = vadd.f32 %v7585_v27, %v3833_v22 }
 0x30b   : > { %v4966_v46 = vadd.f32 %v4898_v43, %v4473_v42 }
 0x30d   : > { %v5093_v54 = vadd.f32 %v7287_v48, %v4966_v46  ;;  %v4420_v16 = vpop.f32.mrf.mxu3 }
 0x30e   : > { %v3767_v18 = vpop.f32.mrf.mxu2 }
 0x30f   : > { %v5134_v44 = vmax.f32 %v5093_v54, 0.0  ;;  %v3834_v62 = vadd.f32 %v3767_v18, %v3342_v63  ;;  %v3278_v36 = vpop.f32.mrf.mxu1 }
 0x310   : > { %v4903_v57 = vpop.f32.mrf.mxu0  ;;  %v3343_v27 = vadd.f32 %v3278_v36, %v7095_v56 }
 0x311   : > { %5175 = vst [vmem:[%s7303_s13 + $0xc0] sm:$0xff] %v5134_v44  ;;  %v4474_v53 = vadd.f32 %v7601_v30, %v3834_v62 }
 0x313   : > { %v4967_v26 = vadd.f32 %v4900_v2, %v4474_v53 }
 0x315   : > { %v5094_v14 = vadd.f32 %v7287_v48, %v4967_v26  ;;  %v4422_v25 = vpop.f32.mrf.mxu3 }
 0x316   : > { %v3770_v37 = vpop.f32.mrf.mxu2 }
 0x317   : > { %v5135_v34 = vmax.f32 %v5094_v14, 0.0  ;;  %v3835_v50 = vadd.f32 %v3770_v37, %v3343_v27  ;;  %v3280_v7 = vpop.f32.mrf.mxu1 }
 0x318   : > { %v4905_v23 = vpop.f32.mrf.mxu0  ;;  %v3344_v30 = vadd.f32 %v3280_v7, %v7108_v0 }
 0x319   : > { %5176 = vst [vmem:[%s7303_s13 + $0xc8] sm:$0xff] %v5135_v34  ;;  %v4475_v55 = vadd.f32 %v7609_v38, %v3835_v50 }
 0x31b   : > { %v4968_v8 = vadd.f32 %v4903_v57, %v4475_v55 }
 0x31d   : > { %v5095_v39 = vadd.f32 %v7287_v48, %v4968_v8  ;;  %v4425_v52 = vpop.f32.mrf.mxu3 }
 0x31e   : > { %v3772_v35 = vpop.f32.mrf.mxu2 }
 0x31f   : > { %v5136_v58 = vmax.f32 %v5095_v39, 0.0  ;;  %v3836_v13 = vadd.f32 %v3772_v35, %v3344_v30  ;;  %v3283_v56 = vpop.f32.mrf.mxu1 }
 0x320   : > { %v4908_v6 = vpop.f32.mrf.mxu0  ;;  %v3345_v38 = vadd.f32 %v3283_v56, %v7119_v33 }
 0x321   : > { %5177 = vst [vmem:[%s7303_s13 + $0xd0] sm:$0xff] %v5136_v58  ;;  %v4476_v19 = vadd.f32 %v4412_v15, %v3836_v13  ;;  %v7649_v15 = vld [vmem:[%s7694_s2] ss:$0 sm:$0xff] }
 0x323   : > { %v4969_v49 = vadd.f32 %v4905_v23, %v4476_v19 }
 0x325   : > { %v5096_v10 = vadd.f32 %v7287_v48, %v4969_v49  ;;  %v4427_v0 = vpop.f32.mrf.mxu3 }
 0x326   : > { %v3775_v61 = vpop.f32.mrf.mxu2 }
 0x327   : > { %v5137_v24 = vmax.f32 %v5096_v10, 0.0  ;;  %v3837_v5 = vadd.f32 %v3775_v61, %v3345_v38  ;;  %v3285_v43 = vpop.f32.mrf.mxu1 }
 0x328   : > { %v4910_v51 = vpop.f32.mrf.mxu0  ;;  %v3346_v48 = vadd.f32 %v3285_v43, %v7132_v4 }
 0x329   : > { %5178 = vst [vmem:[%s7303_s13 + $0xd8] sm:$0xff] %v5137_v24  ;;  %v4477_v60 = vadd.f32 %v4415_v17, %v3837_v5 }
 0x32b   : > { %v4970_v45 = vadd.f32 %v4908_v6, %v4477_v60 }
 0x32d   : > { %v5097_v1 = vadd.f32 %v7649_v15, %v4970_v45  ;;  %v4430_v42 = vpop.f32.mrf.mxu3 }
 0x32e   : > { %v3777_v33 = vpop.f32.mrf.mxu2 }
 0x32f   : > { %v5138_v47 = vmax.f32 %v5097_v1, 0.0  ;;  %v3838_v22 = vadd.f32 %v3777_v33, %v3346_v48  ;;  %v3288_v41 = vpop.f32.mrf.mxu1 }
 0x330   : > { %v4913_v17 = vpop.f32.mrf.mxu0  ;;  %v3347_v63 = vadd.f32 %v3288_v41, %v7143_v40 }
 0x331   : > { %5179 = vst [vmem:[%s7303_s13 + $0xe0] sm:$0xff] %v5138_v47  ;;  %v4478_v2 = vadd.f32 %v4417_v21, %v3838_v22 }
 0x333   : > { %v4971_v46 = vadd.f32 %v4910_v51, %v4478_v2 }
 0x335   : > { %v5098_v54 = vadd.f32 %v7649_v15, %v4971_v46  ;;  %v4432_v4 = vpop.f32.mrf.mxu3 }
 0x336   : > { %v3780_v18 = vpop.f32.mrf.mxu2 }
 0x337   : > { %v5139_v44 = vmax.f32 %v5098_v54, 0.0  ;;  %v3839_v62 = vadd.f32 %v3780_v18, %v3347_v63  ;;  %v3290_v36 = vpop.f32.mrf.mxu1 }
 0x338   : > { %v4915_v57 = vpop.f32.mrf.mxu0  ;;  %v3348_v21 = vadd.f32 %v3290_v36, %v7156_v32 }
 0x339   : > { %5180 = vst [vmem:[%s7303_s13 + $0xe8] sm:$0xff] %v5139_v44  ;;  %v4479_v53 = vadd.f32 %v4420_v16, %v3839_v62 }
 0x33b   : > { %v4972_v26 = vadd.f32 %v4913_v17, %v4479_v53 }
 0x33d   : > { %v5099_v14 = vadd.f32 %v7649_v15, %v4972_v26  ;;  %v4435_v40 = vpop.f32.mrf.mxu3 }
 0x33e   : > { %v3782_v27 = vpop.f32.mrf.mxu2 }
 0x33f   : > { %v5140_v37 = vmax.f32 %v5099_v14, 0.0  ;;  %v3840_v34 = vadd.f32 %v3782_v27, %v3348_v21  ;;  %v3293_v50 = vpop.f32.mrf.mxu1 }
 0x340   : > { %v4918_v55 = vpop.f32.mrf.mxu0  ;;  %v3349_v16 = vadd.f32 %v3293_v50, %v7167_v59 }
 0x341   : > { %5181 = vst [vmem:[%s7303_s13 + $0xf0] sm:$0xff] %v5140_v37  ;;  %v4480_v7 = vadd.f32 %v4422_v25, %v3840_v34 }
 0x343   : > { %v4973_v23 = vadd.f32 %v4915_v57, %v4480_v7 }
 0x345   : > { %v5100_v8 = vadd.f32 %v7649_v15, %v4973_v23  ;;  %v4437_v32 = vpop.f32.mrf.mxu3 }
 0x346   : > { %v3785_v39 = vpop.f32.mrf.mxu2 }
 0x347   : > { %v5141_v30 = vmax.f32 %v5100_v8, 0.0  ;;  %v3841_v35 = vadd.f32 %v3785_v39, %v3349_v16  ;;  %v3295_v58 = vpop.f32.mrf.mxu1 }
 0x348   : > { %v4920_v56 = vpop.f32.mrf.mxu0  ;;  %v3350_v25 = vadd.f32 %v3295_v58, %v7180_v31 }
 0x349   : > { %5182 = vst [vmem:[%s7303_s13 + $0xf8] sm:$0xff] %v5141_v30  ;;  %v4481_v13 = vadd.f32 %v4425_v52, %v3841_v35 }
 0x34b   : > { %v4974_v19 = vadd.f32 %v4918_v55, %v4481_v13 }
 0x34d   : > { %v5101_v6 = vadd.f32 %v7649_v15, %v4974_v19  ;;  %v4440_v59 = vpop.f32.mrf.mxu3 }
 0x34e   : > { %v3787_v49 = vpop.f32.mrf.mxu2 }
 0x34f   : > { %v5142_v10 = vmax.f32 %v5101_v6, 0.0  ;;  %v3842_v38 = vadd.f32 %v3787_v49, %v3350_v25  ;;  %v3298_v61 = vpop.f32.mrf.mxu1 }
 0x350   : > { %v4923_v5 = vpop.f32.mrf.mxu0  ;;  %v3351_v52 = vadd.f32 %v3298_v61, %v7191_v11 }
 0x351   : > { %5183 = vst [vmem:[%s7303_s13 + $0x100] sm:$0xff] %v5142_v10  ;;  %v4482_v24 = vadd.f32 %v4427_v0, %v3842_v38 }
 0x353   : > { %v4975_v43 = vadd.f32 %v4920_v56, %v4482_v24 }
 0x355   : > { %v5102_v60 = vadd.f32 %v7649_v15, %v4975_v43  ;;  %v4442_v31 = vpop.f32.mrf.mxu3 }
 0x356   : > { %v3790_v51 = vpop.f32.mrf.mxu2 }
 0x357   : > { %v5143_v45 = vmax.f32 %v5102_v60, 0.0  ;;  %v3843_v1 = vadd.f32 %v3790_v51, %v3351_v52  ;;  %v3300_v48 = vpop.f32.mrf.mxu1 }
 0x358   : > { %v4925_v47 = vpop.f32.mrf.mxu0  ;;  %v3352_v0 = vadd.f32 %v3300_v48, %v7204_v20 }
 0x359   : > { %5184 = vst [vmem:[%s7303_s13 + $0x108] sm:$0xff] %v5143_v45  ;;  %v4483_v33 = vadd.f32 %v4430_v42, %v3843_v1 }
 0x35b   : > { %v4976_v22 = vadd.f32 %v4923_v5, %v4483_v33 }
 0x35d   : > { %v5103_v41 = vadd.f32 %v7649_v15, %v4976_v22  ;;  %v4445_v11 = vpop.f32.mrf.mxu3 }
 0x35e   : > { %v3792_v2 = vpop.f32.mrf.mxu2 }
 0x35f   : > { %v5144_v17 = vmax.f32 %v5103_v41, 0.0  ;;  %v3844_v46 = vadd.f32 %v3792_v2, %v3352_v0  ;;  %v3303_v54 = vpop.f32.mrf.mxu1 }
 0x360   : > { %v4928_v18 = vpop.f32.mrf.mxu0  ;;  %v3353_v42 = vadd.f32 %v3303_v54, %v7213_v12 }
 0x361   : > { %5185 = vst [vmem:[%s7303_s13 + $0x110] sm:$0xff] %v5144_v17  ;;  %v4484_v63 = vadd.f32 %v4432_v4, %v3844_v46 }
 0x363   : > { %v4977_v44 = vadd.f32 %v4925_v47, %v4484_v63 }
 0x365   : > { %v5104_v62 = vadd.f32 %v7649_v15, %v4977_v44  ;;  %v4447_v20 = vpop.f32.mrf.mxu3 }
 0x366   : > { %v3795_v36 = vpop.f32.mrf.mxu2 }
 0x367   : > { %v5145_v53 = vmax.f32 %v5104_v62, 0.0  ;;  %v3845_v57 = vadd.f32 %v3795_v36, %v3353_v42  ;;  %v3305_v26 = vpop.f32.mrf.mxu1 }
 0x368   : > { %v4930_v21 = vpop.f32.mrf.mxu0  ;;  %v3354_v4 = vadd.f32 %v3305_v26, %v7226_v3 }
 0x369   : > { %5186 = vst [vmem:[%s7303_s13 + $0x118] sm:$0xff] %v5145_v53  ;;  %v4485_v14 = vadd.f32 %v4435_v40, %v3845_v57 }
 0x36b   : > { %v4978_v27 = vadd.f32 %v4928_v18, %v4485_v14 }
 0x36d   : > { %v5105_v37 = vadd.f32 %v7649_v15, %v4978_v27 }
 0x36e   : > { %v3797_v34 = vpop.f32.mrf.mxu2 }
 0x36f   : > { %v5146_v50 = vmax.f32 %v5105_v37, 0.0  ;;  %v3846_v7 = vadd.f32 %v3797_v34, %v3354_v4  ;;  %v3308_v55 = vpop.f32.mrf.mxu1 }
 0x370   : > { %v4933_v23 = vpop.f32.mrf.mxu0  ;;  %v3355_v40 = vadd.f32 %v3308_v55, %v7237_v9 }
 0x371   : > { %5187 = vst [vmem:[%s7303_s13 + $0x120] sm:$0xff] %v5146_v50  ;;  %v4486_v12 = vadd.f32 %v4437_v32, %v3846_v7 }
 0x373   : > { %v4979_v8 = vadd.f32 %v4930_v21, %v4486_v12 }
 0x375   : > { %v5106_v16 = vadd.f32 %v7649_v15, %v4979_v8 }
 0x376   : > { %v3800_v39 = vpop.f32.mrf.mxu2 }
 0x377   : > { %v5147_v30 = vmax.f32 %v5106_v16, 0.0  ;;  %v3847_v35 = vadd.f32 %v3800_v39, %v3355_v40  ;;  %v3310_v58 = vpop.f32.mrf.mxu1 }
 0x378   : > { %v4935_v3 = vpop.f32.mrf.mxu0  ;;  %v3356_v32 = vadd.f32 %v3310_v58, %v7250_v28 }
 0x379   : > { %5188 = vst [vmem:[%s7303_s13 + $0x128] sm:$0xff] %v5147_v30  ;;  %v4487_v13 = vadd.f32 %v4440_v59, %v3847_v35 }
 0x37b   : > { %v4980_v56 = vadd.f32 %v4933_v23, %v4487_v13 }
 0x37d   : > { %v5107_v19 = vadd.f32 %v7649_v15, %v4980_v56 }
 0x37e   : > { %v3802_v6 = vpop.f32.mrf.mxu2 }
 0x37f   : > { %v5148_v25 = vmax.f32 %v5107_v19, 0.0  ;;  %v3848_v49 = vadd.f32 %v3802_v6, %v3356_v32  ;;  %v3313_v10 = vpop.f32.mrf.mxu1 }
 0x380   : > { %v4938_v9 = vpop.f32.mrf.mxu0  ;;  %v3357_v59 = vadd.f32 %v3313_v10, %v7261_v29 }
 0x381   : > { %5189 = vst [vmem:[%s7303_s13 + $0x130] sm:$0xff] %v5148_v25  ;;  %v4488_v38 = vadd.f32 %v4442_v31, %v3848_v49 }
 0x383   : > { %v4981_v61 = vadd.f32 %v4935_v3, %v4488_v38 }
 0x385   : > { %v5108_v24 = vadd.f32 %v7649_v15, %v4981_v61 }
 0x386   : > { %v3805_v5 = vpop.f32.mrf.mxu2 }
 0x387   : > { %v5149_v43 = vmax.f32 %v5108_v24, 0.0  ;;  %v3849_v60 = vadd.f32 %v3805_v5, %v3357_v59  ;;  %v3315_v52 = vpop.f32.mrf.mxu1 }
 0x388   : > { %v4940_v28 = vpop.f32.mrf.mxu0 }
 0x389   : > { %5190 = vst [vmem:[%s7303_s13 + $0x138] sm:$0xff] %v5149_v43  ;;  %v4489_v51 = vadd.f32 %v4445_v11, %v3849_v60 }
 0x38b   : > { %v4982_v45 = vadd.f32 %v4938_v9, %v4489_v51 }
 0x38d   : > { %v5109_v1 = vadd.f32 %v7649_v15, %v4982_v45 }
 0x38e   : > { %v3807_v48 = vpop.f32.mrf.mxu2 }
 0x38f   : > { %v5150_v33 = vmax.f32 %v5109_v1, 0.0 }
 0x391   : > { %5191 = vst [vmem:[%s7303_s13 + $0x140] sm:$0xff] %v5150_v33 }
 0x392 PF: > { %s13_s12 = sadd.s32 1, %s6414_s12  }
 0x393   : > { %p10_p4 = scmp.ge.s32.totalorder %s13_s12, 4  }
 0x395   :  { %12 = sbr.rel (!%p10_p4) target bundleno = 1 (0x1), region = 70 }

</bundles_post_ra>
